<compile_context>
chip_gen: v7x
topology: tpu7x:2x2x1
jax: 0.10.0
libtpu: 0.0.40
codegen_flags: <defaults>
</compile_context>

<pallas_src>
import functools

import numpy as np
import jax
import jax.numpy as jnp
from jax import lax
from jax.experimental import pallas as pl
from jax.experimental.pallas import tpu as pltpu


DILATIONS = (1, 2, 4, 8)


# ----------------------------------------------------------------------------
# Fused kernel: one image, 4 dilated 3x3 convs + ReLU + residual sum.
# Activations are (C, M) slabs with M = H*W on the lane axis.
# ----------------------------------------------------------------------------
def _dblock_kernel(x_ref, w_ref, b_ref, o_ref, ap_ref, *, H, W, dilations, padl):
    M = H * W

    # One-time hygiene zeroing of the staging slab.  Its halo margins are only
    # ever read under a zero mask, so correctness never depends on this (safe
    # under a megacore grid split); do it once instead of per grid step.
    @pl.when(pl.program_id(0) == 0)
    def _init():
        ap_ref[...] = jnp.zeros_like(ap_ref)

    # Hoisted per-lane (h, w) coordinates of the flattened index m = h*W + w.
    # Power-of-two fast path avoids vector div/mod entirely.
    if (W & (W - 1)) == 0:
        m_idx = lax.broadcasted_iota(jnp.int32, (1, M), 1)
        w_idx = m_idx & (W - 1)
        h_idx = m_idx >> (W.bit_length() - 1)
    else:
        h_idx = jnp.asarray((np.arange(M) // W).reshape(1, M), jnp.int32)
        w_idx = jnp.asarray((np.arange(M) % W).reshape(1, M), jnp.int32)

    x = x_ref[...]                      # (C, M) f32, lane-dense
    total = x                           # residual accumulator: x + d1+..+d4
    cur = x                             # input of the next conv

    for k, d in enumerate(dilations):
        # Stage the current activation in the slab centre.  padl is a multiple
        # of 128 -> dense, unmasked stores (8 vregs worth, once per conv).
        ap_ref[:, pl.ds(padl, M)] = cur

        acc = None
        for ky in range(3):
            for kx in range(3):
                dy = (ky - 1) * d
                dx = (kx - 1) * d
                s = dy * W + dx                        # static flattened shift
                tap = ap_ref[:, pl.ds(padl + s, M)]    # (C, M) shifted window

                # Zero out-of-image positions ("same" padding + row-wrap fix).
                # dy/dx are static, so only the needed comparisons are built;
                # the (1, M) mask broadcasts over the channel sublanes.
                conds = []
                if dy > 0:
                    conds.append(h_idx < H - dy)
                elif dy < 0:
                    conds.append(h_idx >= -dy)
                if dx > 0:
                    conds.append(w_idx < W - dx)
                elif dx < 0:
                    conds.append(w_idx >= -dx)
                if conds:
                    mask = functools.reduce(jnp.logical_and, conds)
                    tap = jnp.where(mask, tap, 0.0)

                # bf16 operands -> native MXU path; f32 accumulation.
                p = jnp.dot(w_ref[k, ky * 3 + kx],
                            tap.astype(jnp.bfloat16),
                            preferred_element_type=jnp.float32)
                acc = p if acc is None else acc + p

        cur = jnp.maximum(acc + b_ref[k], 0.0)         # bias + ReLU, (C, M)
        total = total + cur

    o_ref[...] = total                                 # dense 256-lane store


# ----------------------------------------------------------------------------
# Wrapper: layout plumbing + pallas_call.
# ----------------------------------------------------------------------------
def dblock_forward(x, w, b, dilations=DILATIONS):
    """x: (N, C, H, W) NCHW.  w: (D, Cout, Cin, 3, 3) stacked OIHW.  b: (D, Cout)."""
    N, C, H, W = x.shape
    D = len(dilations)
    M = H * W
    # Halo margin (in lanes) around the flattened spatial axis, rounded up to a
    # multiple of 128 so the centre store stays lane-aligned.  Max |shift| of a
    # tap is max_dilation * (W + 1).
    padl = ((max(dilations) * (W + 1) + 127) // 128) * 128

    x2 = x.reshape(N, C, M)             # free: NCHW is already (C, HW)-major
    # Per-tap weight matrices, transposed to (Cout, Cin), pre-cast to bf16:
    # w_taps[k, ky*3+kx, co, ci] = w[k, co, ci, ky, kx].
    w_taps = jnp.transpose(w, (0, 3, 4, 1, 2)).reshape(D, 9, C, C)
    w_taps = w_taps.astype(jnp.bfloat16)
    b3 = b.astype(jnp.float32).reshape(D, C, 1)

    kernel = functools.partial(_dblock_kernel, H=H, W=W,
                               dilations=tuple(dilations), padl=padl)
    out2 = pl.pallas_call(
        kernel,
        out_shape=jax.ShapeDtypeStruct((N, C, M), jnp.float32),
        grid=(N,),
        in_specs=[
            pl.BlockSpec((None, C, M), lambda n: (n, 0, 0)),      # one image
            pl.BlockSpec((D, 9, C, C), lambda n: (0, 0, 0, 0)),   # all weights
            pl.BlockSpec((D, C, 1), lambda n: (0, 0, 0)),         # all biases
        ],
        out_specs=pl.BlockSpec((None, C, M), lambda n: (n, 0, 0)),
        scratch_shapes=[
            pltpu.VMEM((C, 2 * padl + M), jnp.float32),           # halo slab
        ],
        compiler_params=pltpu.CompilerParams(
            dimension_semantics=("parallel",)),   # v7x: batch over both TCs
    )(x2, w_taps, b3)
    return out2.reshape(N, C, H, W)


# ----------------------------------------------------------------------------
# Pure-JAX reference (correctness verification only).
# ----------------------------------------------------------------------------
def dblock_reference(x, w, b, dilations=DILATIONS):
    cur, total = x, x
    for k, d in enumerate(dilations):
        y = lax.conv_general_dilated(
            cur, w[k], window_strides=(1, 1),
            padding=((d, d), (d, d)), rhs_dilation=(d, d),
            dimension_numbers=("NCHW", "OIHW", "NCHW"),
            precision=lax.Precision.HIGHEST)
        y = jnp.maximum(y + b[k].reshape(1, -1, 1, 1), 0.0)
        total = total + y
        cur = y
    return total


# ----------------------------------------------------------------------------
if __name__ == "__main__":
    key = jax.random.PRNGKey(0)
    k_x, k_w = jax.random.split(key)

    # PyTorch equivalent: Dblock(channel=32) applied to x of shape (2, 32, 16, 16).
    N, C, H, W = 2, 32, 16, 16
    D = len(DILATIONS)

    x = jax.random.normal(k_x, (N, C, H, W), jnp.float32)
    w = 0.05 * jax.random.normal(k_w, (D, C, C, 3, 3), jnp.float32)
    b = jnp.zeros((D, C), jnp.float32)   # the module zeroes conv biases at init

    out = jax.jit(dblock_forward)(x, w, b)
    out = jax.block_until_ready(out)

    assert out.shape == (N, C, H, W), out.shape
    assert bool(jnp.all(jnp.isfinite(out)))

    ref = dblock_reference(x, w, b)
    max_err = float(jnp.max(jnp.abs(out - ref)))
    assert bool(jnp.allclose(out, ref, rtol=2e-2, atol=2e-2)), max_err

    print("KERNEL_OK")
</pallas_src>

<mosaic_0001>
module attributes {stable_mosaic.version = 11 : i64} {
  func.func @_dblock_kernel(%arg0: i32, %arg1: memref<1x32x256xf32, #tpu.memory_space<vmem>>, %arg2: memref<4x9x32x32xbf16, #tpu.memory_space<vmem>>, %arg3: memref<4x32x1xf32, #tpu.memory_space<vmem>>, %arg4: memref<1x32x256xf32, #tpu.memory_space<vmem>>, %arg5: memref<32x768xf32, #tpu.memory_space<vmem>>) attributes {dimension_semantics = [#tpu.dimension_semantics<parallel>], iteration_bounds = array<i64: 2>, scalar_prefetch = 0 : i64, scratch_operands = 1 : i64, tpu.core_type = #tpu.core_type<tc>, window_params = [{transform_indices = @transform_0, window_bounds = array<i64: 1, 32, 256>}, {pipeline_mode = #tpu.pipeline_mode<synchronous>, transform_indices = @transform_1, window_bounds = array<i64: 4, 9, 32, 32>}, {pipeline_mode = #tpu.pipeline_mode<synchronous>, transform_indices = @transform_2, window_bounds = array<i64: 4, 32, 1>}, {transform_indices = @transform_3, window_bounds = array<i64: 1, 32, 256>}]} {
    %c0_i32 = arith.constant 0 : i32
    %0 = arith.cmpi eq, %arg0, %c0_i32 : i32
    %1 = arith.extui %0 : i1 to i32
    %c0_i32_0 = arith.constant 0 : i32
    %2 = arith.cmpi ne, %1, %c0_i32_0 : i32
    scf.if %2 {
      %cst_315 = arith.constant 0.000000e+00 : f32
      %497 = vector.broadcast %cst_315 : f32 to vector<32x768xf32>
      %c0_316 = arith.constant 0 : index
      %c0_317 = arith.constant 0 : index
      %498 = vector.load %arg5[%c0_316, %c0_317] : memref<32x768xf32, #tpu.memory_space<vmem>>, vector<32x768xf32>
      tpu.vector_store %arg5[%c0_316, %c0_317], %497 {strides = array<i32>} : memref<32x768xf32, #tpu.memory_space<vmem>>, vector<32x768xf32>,
    } else {
    }
    %3 = tpu.iota {dimensions = array<i32: 1>} : vector<1x256xi32>
    %c15_i32 = arith.constant 15 : i32
    %4 = vector.broadcast %c15_i32 : i32 to vector<1x256xi32>
    %5 = arith.andi %3, %4 : vector<1x256xi32>
    %c4_i32 = arith.constant 4 : i32
    %6 = vector.broadcast %c4_i32 : i32 to vector<1x256xi32>
    %7 = arith.shrsi %3, %6 : vector<1x256xi32>
    %c0 = arith.constant 0 : index
    %c0_1 = arith.constant 0 : index
    %c0_2 = arith.constant 0 : index
    %8 = vector.load %arg1[%c0, %c0_1, %c0_2] : memref<1x32x256xf32, #tpu.memory_space<vmem>>, vector<1x32x256xf32>
    %9 = vector.shape_cast %8 : vector<1x32x256xf32> to vector<32x256xf32>
    %c0_3 = arith.constant 0 : index
    %c256 = arith.constant 256 : index
    %10 = vector.load %arg5[%c0_3, %c256] : memref<32x768xf32, #tpu.memory_space<vmem>>, vector<32x256xf32>
    tpu.vector_store %arg5[%c0_3, %c256], %9 {strides = array<i32>} : memref<32x768xf32, #tpu.memory_space<vmem>>, vector<32x256xf32>,
    %c0_4 = arith.constant 0 : index
    %c239 = arith.constant 239 : index
    %11 = vector.load %arg5[%c0_4, %c239] : memref<32x768xf32, #tpu.memory_space<vmem>>, vector<32x256xf32>
    %c1_i32 = arith.constant 1 : i32
    %12 = vector.broadcast %c1_i32 : i32 to vector<1x256xi32>
    %13 = arith.cmpi sge, %7, %12 : vector<1x256xi32>
    %c1_i32_5 = arith.constant 1 : i32
    %14 = vector.broadcast %c1_i32_5 : i32 to vector<1x256xi32>
    %15 = arith.cmpi sge, %5, %14 : vector<1x256xi32>
    %16 = arith.andi %13, %15 : vector<1x256xi1>
    %cst = arith.constant 0.000000e+00 : f32
    %17 = vector.shape_cast %16 : vector<1x256xi1> to vector<1x256xi1>
    %18 = vector.broadcast %17 : vector<1x256xi1> to vector<32x256xi1>
    %19 = vector.broadcast %cst : f32 to vector<32x256xf32>
    %20 = arith.select %18, %11, %19 : vector<32x256xi1>, vector<32x256xf32>
    %c0_6 = arith.constant 0 : index
    %c0_7 = arith.constant 0 : index
    %c0_8 = arith.constant 0 : index
    %c0_9 = arith.constant 0 : index
    %21 = vector.load %arg2[%c0_6, %c0_7, %c0_8, %c0_9] : memref<4x9x32x32xbf16, #tpu.memory_space<vmem>>, vector<1x1x32x32xbf16>
    %22 = vector.shape_cast %21 : vector<1x1x32x32xbf16> to vector<32x32xbf16>
    %23 = arith.truncf %20 : vector<32x256xf32> to vector<32x256xbf16>
    %cst_10 = arith.constant dense<0.000000e+00> : vector<32x256xf32>
    %24 = tpu.matmul %22, %23, %cst_10 {dimension_numbers = #tpu.dot_dimension_numbers<[1], [0], [0], [1], [0, 0, 1, 1], [], []>} : vector<32x32xbf16>, vector<32x256xbf16>, vector<32x256xf32> -> vector<32x256xf32>
    %c0_11 = arith.constant 0 : index
    %c240 = arith.constant 240 : index
    %25 = vector.load %arg5[%c0_11, %c240] : memref<32x768xf32, #tpu.memory_space<vmem>>, vector<32x256xf32>
    %c1_i32_12 = arith.constant 1 : i32
    %26 = vector.broadcast %c1_i32_12 : i32 to vector<1x256xi32>
    %27 = arith.cmpi sge, %7, %26 : vector<1x256xi32>
    %cst_13 = arith.constant 0.000000e+00 : f32
    %28 = vector.shape_cast %27 : vector<1x256xi1> to vector<1x256xi1>
    %29 = vector.broadcast %28 : vector<1x256xi1> to vector<32x256xi1>
    %30 = vector.broadcast %cst_13 : f32 to vector<32x256xf32>
    %31 = arith.select %29, %25, %30 : vector<32x256xi1>, vector<32x256xf32>
    %c0_14 = arith.constant 0 : index
    %c1 = arith.constant 1 : index
    %c0_15 = arith.constant 0 : index
    %c0_16 = arith.constant 0 : index
    %32 = vector.load %arg2[%c0_14, %c1, %c0_15, %c0_16] : memref<4x9x32x32xbf16, #tpu.memory_space<vmem>>, vector<1x1x32x32xbf16>
    %33 = vector.shape_cast %32 : vector<1x1x32x32xbf16> to vector<32x32xbf16>
    %34 = arith.truncf %31 : vector<32x256xf32> to vector<32x256xbf16>
    %cst_17 = arith.constant dense<0.000000e+00> : vector<32x256xf32>
    %35 = tpu.matmul %33, %34, %cst_17 {dimension_numbers = #tpu.dot_dimension_numbers<[1], [0], [0], [1], [0, 0, 1, 1], [], []>} : vector<32x32xbf16>, vector<32x256xbf16>, vector<32x256xf32> -> vector<32x256xf32>
    %36 = arith.addf %24, %35 : vector<32x256xf32>
    %c0_18 = arith.constant 0 : index
    %c241 = arith.constant 241 : index
    %37 = vector.load %arg5[%c0_18, %c241] : memref<32x768xf32, #tpu.memory_space<vmem>>, vector<32x256xf32>
    %c1_i32_19 = arith.constant 1 : i32
    %38 = vector.broadcast %c1_i32_19 : i32 to vector<1x256xi32>
    %39 = arith.cmpi sge, %7, %38 : vector<1x256xi32>
    %c15_i32_20 = arith.constant 15 : i32
    %40 = vector.broadcast %c15_i32_20 : i32 to vector<1x256xi32>
    %41 = arith.cmpi slt, %5, %40 : vector<1x256xi32>
    %42 = arith.andi %39, %41 : vector<1x256xi1>
    %cst_21 = arith.constant 0.000000e+00 : f32
    %43 = vector.shape_cast %42 : vector<1x256xi1> to vector<1x256xi1>
    %44 = vector.broadcast %43 : vector<1x256xi1> to vector<32x256xi1>
    %45 = vector.broadcast %cst_21 : f32 to vector<32x256xf32>
    %46 = arith.select %44, %37, %45 : vector<32x256xi1>, vector<32x256xf32>
    %c0_22 = arith.constant 0 : index
    %c2 = arith.constant 2 : index
    %c0_23 = arith.constant 0 : index
    %c0_24 = arith.constant 0 : index
    %47 = vector.load %arg2[%c0_22, %c2, %c0_23, %c0_24] : memref<4x9x32x32xbf16, #tpu.memory_space<vmem>>, vector<1x1x32x32xbf16>
    %48 = vector.shape_cast %47 : vector<1x1x32x32xbf16> to vector<32x32xbf16>
    %49 = arith.truncf %46 : vector<32x256xf32> to vector<32x256xbf16>
    %cst_25 = arith.constant dense<0.000000e+00> : vector<32x256xf32>
    %50 = tpu.matmul %48, %49, %cst_25 {dimension_numbers = #tpu.dot_dimension_numbers<[1], [0], [0], [1], [0, 0, 1, 1], [], []>} : vector<32x32xbf16>, vector<32x256xbf16>, vector<32x256xf32> -> vector<32x256xf32>
    %51 = arith.addf %36, %50 : vector<32x256xf32>
    %c0_26 = arith.constant 0 : index
    %c255 = arith.constant 255 : index
    %52 = vector.load %arg5[%c0_26, %c255] : memref<32x768xf32, #tpu.memory_space<vmem>>, vector<32x256xf32>
    %c1_i32_27 = arith.constant 1 : i32
    %53 = vector.broadcast %c1_i32_27 : i32 to vector<1x256xi32>
    %54 = arith.cmpi sge, %5, %53 : vector<1x256xi32>
    %cst_28 = arith.constant 0.000000e+00 : f32
    %55 = vector.shape_cast %54 : vector<1x256xi1> to vector<1x256xi1>
    %56 = vector.broadcast %55 : vector<1x256xi1> to vector<32x256xi1>
    %57 = vector.broadcast %cst_28 : f32 to vector<32x256xf32>
    %58 = arith.select %56, %52, %57 : vector<32x256xi1>, vector<32x256xf32>
    %c0_29 = arith.constant 0 : index
    %c3 = arith.constant 3 : index
    %c0_30 = arith.constant 0 : index
    %c0_31 = arith.constant 0 : index
    %59 = vector.load %arg2[%c0_29, %c3, %c0_30, %c0_31] : memref<4x9x32x32xbf16, #tpu.memory_space<vmem>>, vector<1x1x32x32xbf16>
    %60 = vector.shape_cast %59 : vector<1x1x32x32xbf16> to vector<32x32xbf16>
    %61 = arith.truncf %58 : vector<32x256xf32> to vector<32x256xbf16>
    %cst_32 = arith.constant dense<0.000000e+00> : vector<32x256xf32>
    %62 = tpu.matmul %60, %61, %cst_32 {dimension_numbers = #tpu.dot_dimension_numbers<[1], [0], [0], [1], [0, 0, 1, 1], [], []>} : vector<32x32xbf16>, vector<32x256xbf16>, vector<32x256xf32> -> vector<32x256xf32>
    %63 = arith.addf %51, %62 : vector<32x256xf32>
    %c0_33 = arith.constant 0 : index
    %c256_34 = arith.constant 256 : index
    %64 = vector.load %arg5[%c0_33, %c256_34] : memref<32x768xf32, #tpu.memory_space<vmem>>, vector<32x256xf32>
    %c0_35 = arith.constant 0 : index
    %c4 = arith.constant 4 : index
    %c0_36 = arith.constant 0 : index
    %c0_37 = arith.constant 0 : index
    %65 = vector.load %arg2[%c0_35, %c4, %c0_36, %c0_37] : memref<4x9x32x32xbf16, #tpu.memory_space<vmem>>, vector<1x1x32x32xbf16>
    %66 = vector.shape_cast %65 : vector<1x1x32x32xbf16> to vector<32x32xbf16>
    %67 = arith.truncf %64 : vector<32x256xf32> to vector<32x256xbf16>
    %cst_38 = arith.constant dense<0.000000e+00> : vector<32x256xf32>
    %68 = tpu.matmul %66, %67, %cst_38 {dimension_numbers = #tpu.dot_dimension_numbers<[1], [0], [0], [1], [0, 0, 1, 1], [], []>} : vector<32x32xbf16>, vector<32x256xbf16>, vector<32x256xf32> -> vector<32x256xf32>
    %69 = arith.addf %63, %68 : vector<32x256xf32>
    %c0_39 = arith.constant 0 : index
    %c257 = arith.constant 257 : index
    %70 = vector.load %arg5[%c0_39, %c257] : memref<32x768xf32, #tpu.memory_space<vmem>>, vector<32x256xf32>
    %c15_i32_40 = arith.constant 15 : i32
    %71 = vector.broadcast %c15_i32_40 : i32 to vector<1x256xi32>
    %72 = arith.cmpi slt, %5, %71 : vector<1x256xi32>
    %cst_41 = arith.constant 0.000000e+00 : f32
    %73 = vector.shape_cast %72 : vector<1x256xi1> to vector<1x256xi1>
    %74 = vector.broadcast %73 : vector<1x256xi1> to vector<32x256xi1>
    %75 = vector.broadcast %cst_41 : f32 to vector<32x256xf32>
    %76 = arith.select %74, %70, %75 : vector<32x256xi1>, vector<32x256xf32>
    %c0_42 = arith.constant 0 : index
    %c5 = arith.constant 5 : index
    %c0_43 = arith.constant 0 : index
    %c0_44 = arith.constant 0 : index
    %77 = vector.load %arg2[%c0_42, %c5, %c0_43, %c0_44] : memref<4x9x32x32xbf16, #tpu.memory_space<vmem>>, vector<1x1x32x32xbf16>
    %78 = vector.shape_cast %77 : vector<1x1x32x32xbf16> to vector<32x32xbf16>
    %79 = arith.truncf %76 : vector<32x256xf32> to vector<32x256xbf16>
    %cst_45 = arith.constant dense<0.000000e+00> : vector<32x256xf32>
    %80 = tpu.matmul %78, %79, %cst_45 {dimension_numbers = #tpu.dot_dimension_numbers<[1], [0], [0], [1], [0, 0, 1, 1], [], []>} : vector<32x32xbf16>, vector<32x256xbf16>, vector<32x256xf32> -> vector<32x256xf32>
    %81 = arith.addf %69, %80 : vector<32x256xf32>
    %c0_46 = arith.constant 0 : index
    %c271 = arith.constant 271 : index
    %82 = vector.load %arg5[%c0_46, %c271] : memref<32x768xf32, #tpu.memory_space<vmem>>, vector<32x256xf32>
    %c15_i32_47 = arith.constant 15 : i32
    %83 = vector.broadcast %c15_i32_47 : i32 to vector<1x256xi32>
    %84 = arith.cmpi slt, %7, %83 : vector<1x256xi32>
    %c1_i32_48 = arith.constant 1 : i32
    %85 = vector.broadcast %c1_i32_48 : i32 to vector<1x256xi32>
    %86 = arith.cmpi sge, %5, %85 : vector<1x256xi32>
    %87 = arith.andi %84, %86 : vector<1x256xi1>
    %cst_49 = arith.constant 0.000000e+00 : f32
    %88 = vector.shape_cast %87 : vector<1x256xi1> to vector<1x256xi1>
    %89 = vector.broadcast %88 : vector<1x256xi1> to vector<32x256xi1>
    %90 = vector.broadcast %cst_49 : f32 to vector<32x256xf32>
    %91 = arith.select %89, %82, %90 : vector<32x256xi1>, vector<32x256xf32>
    %c0_50 = arith.constant 0 : index
    %c6 = arith.constant 6 : index
    %c0_51 = arith.constant 0 : index
    %c0_52 = arith.constant 0 : index
    %92 = vector.load %arg2[%c0_50, %c6, %c0_51, %c0_52] : memref<4x9x32x32xbf16, #tpu.memory_space<vmem>>, vector<1x1x32x32xbf16>
    %93 = vector.shape_cast %92 : vector<1x1x32x32xbf16> to vector<32x32xbf16>
    %94 = arith.truncf %91 : vector<32x256xf32> to vector<32x256xbf16>
    %cst_53 = arith.constant dense<0.000000e+00> : vector<32x256xf32>
    %95 = tpu.matmul %93, %94, %cst_53 {dimension_numbers = #tpu.dot_dimension_numbers<[1], [0], [0], [1], [0, 0, 1, 1], [], []>} : vector<32x32xbf16>, vector<32x256xbf16>, vector<32x256xf32> -> vector<32x256xf32>
    %96 = arith.addf %81, %95 : vector<32x256xf32>
    %c0_54 = arith.constant 0 : index
    %c272 = arith.constant 272 : index
    %97 = vector.load %arg5[%c0_54, %c272] : memref<32x768xf32, #tpu.memory_space<vmem>>, vector<32x256xf32>
    %c15_i32_55 = arith.constant 15 : i32
    %98 = vector.broadcast %c15_i32_55 : i32 to vector<1x256xi32>
    %99 = arith.cmpi slt, %7, %98 : vector<1x256xi32>
    %cst_56 = arith.constant 0.000000e+00 : f32
    %100 = vector.shape_cast %99 : vector<1x256xi1> to vector<1x256xi1>
    %101 = vector.broadcast %100 : vector<1x256xi1> to vector<32x256xi1>
    %102 = vector.broadcast %cst_56 : f32 to vector<32x256xf32>
    %103 = arith.select %101, %97, %102 : vector<32x256xi1>, vector<32x256xf32>
    %c0_57 = arith.constant 0 : index
    %c7 = arith.constant 7 : index
    %c0_58 = arith.constant 0 : index
    %c0_59 = arith.constant 0 : index
    %104 = vector.load %arg2[%c0_57, %c7, %c0_58, %c0_59] : memref<4x9x32x32xbf16, #tpu.memory_space<vmem>>, vector<1x1x32x32xbf16>
    %105 = vector.shape_cast %104 : vector<1x1x32x32xbf16> to vector<32x32xbf16>
    %106 = arith.truncf %103 : vector<32x256xf32> to vector<32x256xbf16>
    %cst_60 = arith.constant dense<0.000000e+00> : vector<32x256xf32>
    %107 = tpu.matmul %105, %106, %cst_60 {dimension_numbers = #tpu.dot_dimension_numbers<[1], [0], [0], [1], [0, 0, 1, 1], [], []>} : vector<32x32xbf16>, vector<32x256xbf16>, vector<32x256xf32> -> vector<32x256xf32>
    %108 = arith.addf %96, %107 : vector<32x256xf32>
    %c0_61 = arith.constant 0 : index
    %c273 = arith.constant 273 : index
    %109 = vector.load %arg5[%c0_61, %c273] : memref<32x768xf32, #tpu.memory_space<vmem>>, vector<32x256xf32>
    %c15_i32_62 = arith.constant 15 : i32
    %110 = vector.broadcast %c15_i32_62 : i32 to vector<1x256xi32>
    %111 = arith.cmpi slt, %7, %110 : vector<1x256xi32>
    %c15_i32_63 = arith.constant 15 : i32
    %112 = vector.broadcast %c15_i32_63 : i32 to vector<1x256xi32>
    %113 = arith.cmpi slt, %5, %112 : vector<1x256xi32>
    %114 = arith.andi %111, %113 : vector<1x256xi1>
    %cst_64 = arith.constant 0.000000e+00 : f32
    %115 = vector.shape_cast %114 : vector<1x256xi1> to vector<1x256xi1>
    %116 = vector.broadcast %115 : vector<1x256xi1> to vector<32x256xi1>
    %117 = vector.broadcast %cst_64 : f32 to vector<32x256xf32>
    %118 = arith.select %116, %109, %117 : vector<32x256xi1>, vector<32x256xf32>
    %c0_65 = arith.constant 0 : index
    %c8 = arith.constant 8 : index
    %c0_66 = arith.constant 0 : index
    %c0_67 = arith.constant 0 : index
    %119 = vector.load %arg2[%c0_65, %c8, %c0_66, %c0_67] : memref<4x9x32x32xbf16, #tpu.memory_space<vmem>>, vector<1x1x32x32xbf16>
    %120 = vector.shape_cast %119 : vector<1x1x32x32xbf16> to vector<32x32xbf16>
    %121 = arith.truncf %118 : vector<32x256xf32> to vector<32x256xbf16>
    %cst_68 = arith.constant dense<0.000000e+00> : vector<32x256xf32>
    %122 = tpu.matmul %120, %121, %cst_68 {dimension_numbers = #tpu.dot_dimension_numbers<[1], [0], [0], [1], [0, 0, 1, 1], [], []>} : vector<32x32xbf16>, vector<32x256xbf16>, vector<32x256xf32> -> vector<32x256xf32>
    %123 = arith.addf %108, %122 : vector<32x256xf32>
    %c0_69 = arith.constant 0 : index
    %c0_70 = arith.constant 0 : index
    %c0_71 = arith.constant 0 : index
    %124 = vector.load %arg3[%c0_69, %c0_70, %c0_71] : memref<4x32x1xf32, #tpu.memory_space<vmem>>, vector<1x32x1xf32>
    %125 = vector.shape_cast %124 : vector<1x32x1xf32> to vector<32x1xf32>
    %126 = vector.broadcast %125 : vector<32x1xf32> to vector<32x256xf32>
    %127 = arith.addf %123, %126 : vector<32x256xf32>
    %cst_72 = arith.constant 0.000000e+00 : f32
    %128 = vector.broadcast %cst_72 : f32 to vector<32x256xf32>
    %129 = arith.maximumf %127, %128 : vector<32x256xf32>
    %130 = arith.addf %9, %129 : vector<32x256xf32>
    %c0_73 = arith.constant 0 : index
    %c256_74 = arith.constant 256 : index
    %131 = vector.load %arg5[%c0_73, %c256_74] : memref<32x768xf32, #tpu.memory_space<vmem>>, vector<32x256xf32>
    tpu.vector_store %arg5[%c0_73, %c256_74], %129 {strides = array<i32>} : memref<32x768xf32, #tpu.memory_space<vmem>>, vector<32x256xf32>,
    %c0_75 = arith.constant 0 : index
    %c222 = arith.constant 222 : index
    %132 = vector.load %arg5[%c0_75, %c222] : memref<32x768xf32, #tpu.memory_space<vmem>>, vector<32x256xf32>
    %c2_i32 = arith.constant 2 : i32
    %133 = vector.broadcast %c2_i32 : i32 to vector<1x256xi32>
    %134 = arith.cmpi sge, %7, %133 : vector<1x256xi32>
    %c2_i32_76 = arith.constant 2 : i32
    %135 = vector.broadcast %c2_i32_76 : i32 to vector<1x256xi32>
    %136 = arith.cmpi sge, %5, %135 : vector<1x256xi32>
    %137 = arith.andi %134, %136 : vector<1x256xi1>
    %cst_77 = arith.constant 0.000000e+00 : f32
    %138 = vector.shape_cast %137 : vector<1x256xi1> to vector<1x256xi1>
    %139 = vector.broadcast %138 : vector<1x256xi1> to vector<32x256xi1>
    %140 = vector.broadcast %cst_77 : f32 to vector<32x256xf32>
    %141 = arith.select %139, %132, %140 : vector<32x256xi1>, vector<32x256xf32>
    %c1_78 = arith.constant 1 : index
    %c0_79 = arith.constant 0 : index
    %c0_80 = arith.constant 0 : index
    %c0_81 = arith.constant 0 : index
    %142 = vector.load %arg2[%c1_78, %c0_79, %c0_80, %c0_81] : memref<4x9x32x32xbf16, #tpu.memory_space<vmem>>, vector<1x1x32x32xbf16>
    %143 = vector.shape_cast %142 : vector<1x1x32x32xbf16> to vector<32x32xbf16>
    %144 = arith.truncf %141 : vector<32x256xf32> to vector<32x256xbf16>
    %cst_82 = arith.constant dense<0.000000e+00> : vector<32x256xf32>
    %145 = tpu.matmul %143, %144, %cst_82 {dimension_numbers = #tpu.dot_dimension_numbers<[1], [0], [0], [1], [0, 0, 1, 1], [], []>} : vector<32x32xbf16>, vector<32x256xbf16>, vector<32x256xf32> -> vector<32x256xf32>
    %c0_83 = arith.constant 0 : index
    %c224 = arith.constant 224 : index
    %146 = vector.load %arg5[%c0_83, %c224] : memref<32x768xf32, #tpu.memory_space<vmem>>, vector<32x256xf32>
    %c2_i32_84 = arith.constant 2 : i32
    %147 = vector.broadcast %c2_i32_84 : i32 to vector<1x256xi32>
    %148 = arith.cmpi sge, %7, %147 : vector<1x256xi32>
    %cst_85 = arith.constant 0.000000e+00 : f32
    %149 = vector.shape_cast %148 : vector<1x256xi1> to vector<1x256xi1>
    %150 = vector.broadcast %149 : vector<1x256xi1> to vector<32x256xi1>
    %151 = vector.broadcast %cst_85 : f32 to vector<32x256xf32>
    %152 = arith.select %150, %146, %151 : vector<32x256xi1>, vector<32x256xf32>
    %c1_86 = arith.constant 1 : index
    %c1_87 = arith.constant 1 : index
    %c0_88 = arith.constant 0 : index
    %c0_89 = arith.constant 0 : index
    %153 = vector.load %arg2[%c1_86, %c1_87, %c0_88, %c0_89] : memref<4x9x32x32xbf16, #tpu.memory_space<vmem>>, vector<1x1x32x32xbf16>
    %154 = vector.shape_cast %153 : vector<1x1x32x32xbf16> to vector<32x32xbf16>
    %155 = arith.truncf %152 : vector<32x256xf32> to vector<32x256xbf16>
    %cst_90 = arith.constant dense<0.000000e+00> : vector<32x256xf32>
    %156 = tpu.matmul %154, %155, %cst_90 {dimension_numbers = #tpu.dot_dimension_numbers<[1], [0], [0], [1], [0, 0, 1, 1], [], []>} : vector<32x32xbf16>, vector<32x256xbf16>, vector<32x256xf32> -> vector<32x256xf32>
    %157 = arith.addf %145, %156 : vector<32x256xf32>
    %c0_91 = arith.constant 0 : index
    %c226 = arith.constant 226 : index
    %158 = vector.load %arg5[%c0_91, %c226] : memref<32x768xf32, #tpu.memory_space<vmem>>, vector<32x256xf32>
    %c2_i32_92 = arith.constant 2 : i32
    %159 = vector.broadcast %c2_i32_92 : i32 to vector<1x256xi32>
    %160 = arith.cmpi sge, %7, %159 : vector<1x256xi32>
    %c14_i32 = arith.constant 14 : i32
    %161 = vector.broadcast %c14_i32 : i32 to vector<1x256xi32>
    %162 = arith.cmpi slt, %5, %161 : vector<1x256xi32>
    %163 = arith.andi %160, %162 : vector<1x256xi1>
    %cst_93 = arith.constant 0.000000e+00 : f32
    %164 = vector.shape_cast %163 : vector<1x256xi1> to vector<1x256xi1>
    %165 = vector.broadcast %164 : vector<1x256xi1> to vector<32x256xi1>
    %166 = vector.broadcast %cst_93 : f32 to vector<32x256xf32>
    %167 = arith.select %165, %158, %166 : vector<32x256xi1>, vector<32x256xf32>
    %c1_94 = arith.constant 1 : index
    %c2_95 = arith.constant 2 : index
    %c0_96 = arith.constant 0 : index
    %c0_97 = arith.constant 0 : index
    %168 = vector.load %arg2[%c1_94, %c2_95, %c0_96, %c0_97] : memref<4x9x32x32xbf16, #tpu.memory_space<vmem>>, vector<1x1x32x32xbf16>
    %169 = vector.shape_cast %168 : vector<1x1x32x32xbf16> to vector<32x32xbf16>
    %170 = arith.truncf %167 : vector<32x256xf32> to vector<32x256xbf16>
    %cst_98 = arith.constant dense<0.000000e+00> : vector<32x256xf32>
    %171 = tpu.matmul %169, %170, %cst_98 {dimension_numbers = #tpu.dot_dimension_numbers<[1], [0], [0], [1], [0, 0, 1, 1], [], []>} : vector<32x32xbf16>, vector<32x256xbf16>, vector<32x256xf32> -> vector<32x256xf32>
    %172 = arith.addf %157, %171 : vector<32x256xf32>
    %c0_99 = arith.constant 0 : index
    %c254 = arith.constant 254 : index
    %173 = vector.load %arg5[%c0_99, %c254] : memref<32x768xf32, #tpu.memory_space<vmem>>, vector<32x256xf32>
    %c2_i32_100 = arith.constant 2 : i32
    %174 = vector.broadcast %c2_i32_100 : i32 to vector<1x256xi32>
    %175 = arith.cmpi sge, %5, %174 : vector<1x256xi32>
    %cst_101 = arith.constant 0.000000e+00 : f32
    %176 = vector.shape_cast %175 : vector<1x256xi1> to vector<1x256xi1>
    %177 = vector.broadcast %176 : vector<1x256xi1> to vector<32x256xi1>
    %178 = vector.broadcast %cst_101 : f32 to vector<32x256xf32>
    %179 = arith.select %177, %173, %178 : vector<32x256xi1>, vector<32x256xf32>
    %c1_102 = arith.constant 1 : index
    %c3_103 = arith.constant 3 : index
    %c0_104 = arith.constant 0 : index
    %c0_105 = arith.constant 0 : index
    %180 = vector.load %arg2[%c1_102, %c3_103, %c0_104, %c0_105] : memref<4x9x32x32xbf16, #tpu.memory_space<vmem>>, vector<1x1x32x32xbf16>
    %181 = vector.shape_cast %180 : vector<1x1x32x32xbf16> to vector<32x32xbf16>
    %182 = arith.truncf %179 : vector<32x256xf32> to vector<32x256xbf16>
    %cst_106 = arith.constant dense<0.000000e+00> : vector<32x256xf32>
    %183 = tpu.matmul %181, %182, %cst_106 {dimension_numbers = #tpu.dot_dimension_numbers<[1], [0], [0], [1], [0, 0, 1, 1], [], []>} : vector<32x32xbf16>, vector<32x256xbf16>, vector<32x256xf32> -> vector<32x256xf32>
    %184 = arith.addf %172, %183 : vector<32x256xf32>
    %c0_107 = arith.constant 0 : index
    %c256_108 = arith.constant 256 : index
    %185 = vector.load %arg5[%c0_107, %c256_108] : memref<32x768xf32, #tpu.memory_space<vmem>>, vector<32x256xf32>
    %c1_109 = arith.constant 1 : index
    %c4_110 = arith.constant 4 : index
    %c0_111 = arith.constant 0 : index
    %c0_112 = arith.constant 0 : index
    %186 = vector.load %arg2[%c1_109, %c4_110, %c0_111, %c0_112] : memref<4x9x32x32xbf16, #tpu.memory_space<vmem>>, vector<1x1x32x32xbf16>
    %187 = vector.shape_cast %186 : vector<1x1x32x32xbf16> to vector<32x32xbf16>
    %188 = arith.truncf %185 : vector<32x256xf32> to vector<32x256xbf16>
    %cst_113 = arith.constant dense<0.000000e+00> : vector<32x256xf32>
    %189 = tpu.matmul %187, %188, %cst_113 {dimension_numbers = #tpu.dot_dimension_numbers<[1], [0], [0], [1], [0, 0, 1, 1], [], []>} : vector<32x32xbf16>, vector<32x256xbf16>, vector<32x256xf32> -> vector<32x256xf32>
    %190 = arith.addf %184, %189 : vector<32x256xf32>
    %c0_114 = arith.constant 0 : index
    %c258 = arith.constant 258 : index
    %191 = vector.load %arg5[%c0_114, %c258] : memref<32x768xf32, #tpu.memory_space<vmem>>, vector<32x256xf32>
    %c14_i32_115 = arith.constant 14 : i32
    %192 = vector.broadcast %c14_i32_115 : i32 to vector<1x256xi32>
    %193 = arith.cmpi slt, %5, %192 : vector<1x256xi32>
    %cst_116 = arith.constant 0.000000e+00 : f32
    %194 = vector.shape_cast %193 : vector<1x256xi1> to vector<1x256xi1>
    %195 = vector.broadcast %194 : vector<1x256xi1> to vector<32x256xi1>
    %196 = vector.broadcast %cst_116 : f32 to vector<32x256xf32>
    %197 = arith.select %195, %191, %196 : vector<32x256xi1>, vector<32x256xf32>
    %c1_117 = arith.constant 1 : index
    %c5_118 = arith.constant 5 : index
    %c0_119 = arith.constant 0 : index
    %c0_120 = arith.constant 0 : index
    %198 = vector.load %arg2[%c1_117, %c5_118, %c0_119, %c0_120] : memref<4x9x32x32xbf16, #tpu.memory_space<vmem>>, vector<1x1x32x32xbf16>
    %199 = vector.shape_cast %198 : vector<1x1x32x32xbf16> to vector<32x32xbf16>
    %200 = arith.truncf %197 : vector<32x256xf32> to vector<32x256xbf16>
    %cst_121 = arith.constant dense<0.000000e+00> : vector<32x256xf32>
    %201 = tpu.matmul %199, %200, %cst_121 {dimension_numbers = #tpu.dot_dimension_numbers<[1], [0], [0], [1], [0, 0, 1, 1], [], []>} : vector<32x32xbf16>, vector<32x256xbf16>, vector<32x256xf32> -> vector<32x256xf32>
    %202 = arith.addf %190, %201 : vector<32x256xf32>
    %c0_122 = arith.constant 0 : index
    %c286 = arith.constant 286 : index
    %203 = vector.load %arg5[%c0_122, %c286] : memref<32x768xf32, #tpu.memory_space<vmem>>, vector<32x256xf32>
    %c14_i32_123 = arith.constant 14 : i32
    %204 = vector.broadcast %c14_i32_123 : i32 to vector<1x256xi32>
    %205 = arith.cmpi slt, %7, %204 : vector<1x256xi32>
    %c2_i32_124 = arith.constant 2 : i32
    %206 = vector.broadcast %c2_i32_124 : i32 to vector<1x256xi32>
    %207 = arith.cmpi sge, %5, %206 : vector<1x256xi32>
    %208 = arith.andi %205, %207 : vector<1x256xi1>
    %cst_125 = arith.constant 0.000000e+00 : f32
    %209 = vector.shape_cast %208 : vector<1x256xi1> to vector<1x256xi1>
    %210 = vector.broadcast %209 : vector<1x256xi1> to vector<32x256xi1>
    %211 = vector.broadcast %cst_125 : f32 to vector<32x256xf32>
    %212 = arith.select %210, %203, %211 : vector<32x256xi1>, vector<32x256xf32>
    %c1_126 = arith.constant 1 : index
    %c6_127 = arith.constant 6 : index
    %c0_128 = arith.constant 0 : index
    %c0_129 = arith.constant 0 : index
    %213 = vector.load %arg2[%c1_126, %c6_127, %c0_128, %c0_129] : memref<4x9x32x32xbf16, #tpu.memory_space<vmem>>, vector<1x1x32x32xbf16>
    %214 = vector.shape_cast %213 : vector<1x1x32x32xbf16> to vector<32x32xbf16>
    %215 = arith.truncf %212 : vector<32x256xf32> to vector<32x256xbf16>
    %cst_130 = arith.constant dense<0.000000e+00> : vector<32x256xf32>
    %216 = tpu.matmul %214, %215, %cst_130 {dimension_numbers = #tpu.dot_dimension_numbers<[1], [0], [0], [1], [0, 0, 1, 1], [], []>} : vector<32x32xbf16>, vector<32x256xbf16>, vector<32x256xf32> -> vector<32x256xf32>
    %217 = arith.addf %202, %216 : vector<32x256xf32>
    %c0_131 = arith.constant 0 : index
    %c288 = arith.constant 288 : index
    %218 = vector.load %arg5[%c0_131, %c288] : memref<32x768xf32, #tpu.memory_space<vmem>>, vector<32x256xf32>
    %c14_i32_132 = arith.constant 14 : i32
    %219 = vector.broadcast %c14_i32_132 : i32 to vector<1x256xi32>
    %220 = arith.cmpi slt, %7, %219 : vector<1x256xi32>
    %cst_133 = arith.constant 0.000000e+00 : f32
    %221 = vector.shape_cast %220 : vector<1x256xi1> to vector<1x256xi1>
    %222 = vector.broadcast %221 : vector<1x256xi1> to vector<32x256xi1>
    %223 = vector.broadcast %cst_133 : f32 to vector<32x256xf32>
    %224 = arith.select %222, %218, %223 : vector<32x256xi1>, vector<32x256xf32>
    %c1_134 = arith.constant 1 : index
    %c7_135 = arith.constant 7 : index
    %c0_136 = arith.constant 0 : index
    %c0_137 = arith.constant 0 : index
    %225 = vector.load %arg2[%c1_134, %c7_135, %c0_136, %c0_137] : memref<4x9x32x32xbf16, #tpu.memory_space<vmem>>, vector<1x1x32x32xbf16>
    %226 = vector.shape_cast %225 : vector<1x1x32x32xbf16> to vector<32x32xbf16>
    %227 = arith.truncf %224 : vector<32x256xf32> to vector<32x256xbf16>
    %cst_138 = arith.constant dense<0.000000e+00> : vector<32x256xf32>
    %228 = tpu.matmul %226, %227, %cst_138 {dimension_numbers = #tpu.dot_dimension_numbers<[1], [0], [0], [1], [0, 0, 1, 1], [], []>} : vector<32x32xbf16>, vector<32x256xbf16>, vector<32x256xf32> -> vector<32x256xf32>
    %229 = arith.addf %217, %228 : vector<32x256xf32>
    %c0_139 = arith.constant 0 : index
    %c290 = arith.constant 290 : index
    %230 = vector.load %arg5[%c0_139, %c290] : memref<32x768xf32, #tpu.memory_space<vmem>>, vector<32x256xf32>
    %c14_i32_140 = arith.constant 14 : i32
    %231 = vector.broadcast %c14_i32_140 : i32 to vector<1x256xi32>
    %232 = arith.cmpi slt, %7, %231 : vector<1x256xi32>
    %c14_i32_141 = arith.constant 14 : i32
    %233 = vector.broadcast %c14_i32_141 : i32 to vector<1x256xi32>
    %234 = arith.cmpi slt, %5, %233 : vector<1x256xi32>
    %235 = arith.andi %232, %234 : vector<1x256xi1>
    %cst_142 = arith.constant 0.000000e+00 : f32
    %236 = vector.shape_cast %235 : vector<1x256xi1> to vector<1x256xi1>
    %237 = vector.broadcast %236 : vector<1x256xi1> to vector<32x256xi1>
    %238 = vector.broadcast %cst_142 : f32 to vector<32x256xf32>
    %239 = arith.select %237, %230, %238 : vector<32x256xi1>, vector<32x256xf32>
    %c1_143 = arith.constant 1 : index
    %c8_144 = arith.constant 8 : index
    %c0_145 = arith.constant 0 : index
    %c0_146 = arith.constant 0 : index
    %240 = vector.load %arg2[%c1_143, %c8_144, %c0_145, %c0_146] : memref<4x9x32x32xbf16, #tpu.memory_space<vmem>>, vector<1x1x32x32xbf16>
    %241 = vector.shape_cast %240 : vector<1x1x32x32xbf16> to vector<32x32xbf16>
    %242 = arith.truncf %239 : vector<32x256xf32> to vector<32x256xbf16>
    %cst_147 = arith.constant dense<0.000000e+00> : vector<32x256xf32>
    %243 = tpu.matmul %241, %242, %cst_147 {dimension_numbers = #tpu.dot_dimension_numbers<[1], [0], [0], [1], [0, 0, 1, 1], [], []>} : vector<32x32xbf16>, vector<32x256xbf16>, vector<32x256xf32> -> vector<32x256xf32>
    %244 = arith.addf %229, %243 : vector<32x256xf32>
    %c1_148 = arith.constant 1 : index
    %c0_149 = arith.constant 0 : index
    %c0_150 = arith.constant 0 : index
    %245 = vector.load %arg3[%c1_148, %c0_149, %c0_150] : memref<4x32x1xf32, #tpu.memory_space<vmem>>, vector<1x32x1xf32>
    %246 = vector.shape_cast %245 : vector<1x32x1xf32> to vector<32x1xf32>
    %247 = vector.broadcast %246 : vector<32x1xf32> to vector<32x256xf32>
    %248 = arith.addf %244, %247 : vector<32x256xf32>
    %cst_151 = arith.constant 0.000000e+00 : f32
    %249 = vector.broadcast %cst_151 : f32 to vector<32x256xf32>
    %250 = arith.maximumf %248, %249 : vector<32x256xf32>
    %251 = arith.addf %130, %250 : vector<32x256xf32>
    %c0_152 = arith.constant 0 : index
    %c256_153 = arith.constant 256 : index
    %252 = vector.load %arg5[%c0_152, %c256_153] : memref<32x768xf32, #tpu.memory_space<vmem>>, vector<32x256xf32>
    tpu.vector_store %arg5[%c0_152, %c256_153], %250 {strides = array<i32>} : memref<32x768xf32, #tpu.memory_space<vmem>>, vector<32x256xf32>,
    %c0_154 = arith.constant 0 : index
    %c188 = arith.constant 188 : index
    %253 = vector.load %arg5[%c0_154, %c188] : memref<32x768xf32, #tpu.memory_space<vmem>>, vector<32x256xf32>
    %c4_i32_155 = arith.constant 4 : i32
    %254 = vector.broadcast %c4_i32_155 : i32 to vector<1x256xi32>
    %255 = arith.cmpi sge, %7, %254 : vector<1x256xi32>
    %c4_i32_156 = arith.constant 4 : i32
    %256 = vector.broadcast %c4_i32_156 : i32 to vector<1x256xi32>
    %257 = arith.cmpi sge, %5, %256 : vector<1x256xi32>
    %258 = arith.andi %255, %257 : vector<1x256xi1>
    %cst_157 = arith.constant 0.000000e+00 : f32
    %259 = vector.shape_cast %258 : vector<1x256xi1> to vector<1x256xi1>
    %260 = vector.broadcast %259 : vector<1x256xi1> to vector<32x256xi1>
    %261 = vector.broadcast %cst_157 : f32 to vector<32x256xf32>
    %262 = arith.select %260, %253, %261 : vector<32x256xi1>, vector<32x256xf32>
    %c2_158 = arith.constant 2 : index
    %c0_159 = arith.constant 0 : index
    %c0_160 = arith.constant 0 : index
    %c0_161 = arith.constant 0 : index
    %263 = vector.load %arg2[%c2_158, %c0_159, %c0_160, %c0_161] : memref<4x9x32x32xbf16, #tpu.memory_space<vmem>>, vector<1x1x32x32xbf16>
    %264 = vector.shape_cast %263 : vector<1x1x32x32xbf16> to vector<32x32xbf16>
    %265 = arith.truncf %262 : vector<32x256xf32> to vector<32x256xbf16>
    %cst_162 = arith.constant dense<0.000000e+00> : vector<32x256xf32>
    %266 = tpu.matmul %264, %265, %cst_162 {dimension_numbers = #tpu.dot_dimension_numbers<[1], [0], [0], [1], [0, 0, 1, 1], [], []>} : vector<32x32xbf16>, vector<32x256xbf16>, vector<32x256xf32> -> vector<32x256xf32>
    %c0_163 = arith.constant 0 : index
    %c192 = arith.constant 192 : index
    %267 = vector.load %arg5[%c0_163, %c192] : memref<32x768xf32, #tpu.memory_space<vmem>>, vector<32x256xf32>
    %c4_i32_164 = arith.constant 4 : i32
    %268 = vector.broadcast %c4_i32_164 : i32 to vector<1x256xi32>
    %269 = arith.cmpi sge, %7, %268 : vector<1x256xi32>
    %cst_165 = arith.constant 0.000000e+00 : f32
    %270 = vector.shape_cast %269 : vector<1x256xi1> to vector<1x256xi1>
    %271 = vector.broadcast %270 : vector<1x256xi1> to vector<32x256xi1>
    %272 = vector.broadcast %cst_165 : f32 to vector<32x256xf32>
    %273 = arith.select %271, %267, %272 : vector<32x256xi1>, vector<32x256xf32>
    %c2_166 = arith.constant 2 : index
    %c1_167 = arith.constant 1 : index
    %c0_168 = arith.constant 0 : index
    %c0_169 = arith.constant 0 : index
    %274 = vector.load %arg2[%c2_166, %c1_167, %c0_168, %c0_169] : memref<4x9x32x32xbf16, #tpu.memory_space<vmem>>, vector<1x1x32x32xbf16>
    %275 = vector.shape_cast %274 : vector<1x1x32x32xbf16> to vector<32x32xbf16>
    %276 = arith.truncf %273 : vector<32x256xf32> to vector<32x256xbf16>
    %cst_170 = arith.constant dense<0.000000e+00> : vector<32x256xf32>
    %277 = tpu.matmul %275, %276, %cst_170 {dimension_numbers = #tpu.dot_dimension_numbers<[1], [0], [0], [1], [0, 0, 1, 1], [], []>} : vector<32x32xbf16>, vector<32x256xbf16>, vector<32x256xf32> -> vector<32x256xf32>
    %278 = arith.addf %266, %277 : vector<32x256xf32>
    %c0_171 = arith.constant 0 : index
    %c196 = arith.constant 196 : index
    %279 = vector.load %arg5[%c0_171, %c196] : memref<32x768xf32, #tpu.memory_space<vmem>>, vector<32x256xf32>
    %c4_i32_172 = arith.constant 4 : i32
    %280 = vector.broadcast %c4_i32_172 : i32 to vector<1x256xi32>
    %281 = arith.cmpi sge, %7, %280 : vector<1x256xi32>
    %c12_i32 = arith.constant 12 : i32
    %282 = vector.broadcast %c12_i32 : i32 to vector<1x256xi32>
    %283 = arith.cmpi slt, %5, %282 : vector<1x256xi32>
    %284 = arith.andi %281, %283 : vector<1x256xi1>
    %cst_173 = arith.constant 0.000000e+00 : f32
    %285 = vector.shape_cast %284 : vector<1x256xi1> to vector<1x256xi1>
    %286 = vector.broadcast %285 : vector<1x256xi1> to vector<32x256xi1>
    %287 = vector.broadcast %cst_173 : f32 to vector<32x256xf32>
    %288 = arith.select %286, %279, %287 : vector<32x256xi1>, vector<32x256xf32>
    %c2_174 = arith.constant 2 : index
    %c2_175 = arith.constant 2 : index
    %c0_176 = arith.constant 0 : index
    %c0_177 = arith.constant 0 : index
    %289 = vector.load %arg2[%c2_174, %c2_175, %c0_176, %c0_177] : memref<4x9x32x32xbf16, #tpu.memory_space<vmem>>, vector<1x1x32x32xbf16>
    %290 = vector.shape_cast %289 : vector<1x1x32x32xbf16> to vector<32x32xbf16>
    %291 = arith.truncf %288 : vector<32x256xf32> to vector<32x256xbf16>
    %cst_178 = arith.constant dense<0.000000e+00> : vector<32x256xf32>
    %292 = tpu.matmul %290, %291, %cst_178 {dimension_numbers = #tpu.dot_dimension_numbers<[1], [0], [0], [1], [0, 0, 1, 1], [], []>} : vector<32x32xbf16>, vector<32x256xbf16>, vector<32x256xf32> -> vector<32x256xf32>
    %293 = arith.addf %278, %292 : vector<32x256xf32>
    %c0_179 = arith.constant 0 : index
    %c252 = arith.constant 252 : index
    %294 = vector.load %arg5[%c0_179, %c252] : memref<32x768xf32, #tpu.memory_space<vmem>>, vector<32x256xf32>
    %c4_i32_180 = arith.constant 4 : i32
    %295 = vector.broadcast %c4_i32_180 : i32 to vector<1x256xi32>
    %296 = arith.cmpi sge, %5, %295 : vector<1x256xi32>
    %cst_181 = arith.constant 0.000000e+00 : f32
    %297 = vector.shape_cast %296 : vector<1x256xi1> to vector<1x256xi1>
    %298 = vector.broadcast %297 : vector<1x256xi1> to vector<32x256xi1>
    %299 = vector.broadcast %cst_181 : f32 to vector<32x256xf32>
    %300 = arith.select %298, %294, %299 : vector<32x256xi1>, vector<32x256xf32>
    %c2_182 = arith.constant 2 : index
    %c3_183 = arith.constant 3 : index
    %c0_184 = arith.constant 0 : index
    %c0_185 = arith.constant 0 : index
    %301 = vector.load %arg2[%c2_182, %c3_183, %c0_184, %c0_185] : memref<4x9x32x32xbf16, #tpu.memory_space<vmem>>, vector<1x1x32x32xbf16>
    %302 = vector.shape_cast %301 : vector<1x1x32x32xbf16> to vector<32x32xbf16>
    %303 = arith.truncf %300 : vector<32x256xf32> to vector<32x256xbf16>
    %cst_186 = arith.constant dense<0.000000e+00> : vector<32x256xf32>
    %304 = tpu.matmul %302, %303, %cst_186 {dimension_numbers = #tpu.dot_dimension_numbers<[1], [0], [0], [1], [0, 0, 1, 1], [], []>} : vector<32x32xbf16>, vector<32x256xbf16>, vector<32x256xf32> -> vector<32x256xf32>
    %305 = arith.addf %293, %304 : vector<32x256xf32>
    %c0_187 = arith.constant 0 : index
    %c256_188 = arith.constant 256 : index
    %306 = vector.load %arg5[%c0_187, %c256_188] : memref<32x768xf32, #tpu.memory_space<vmem>>, vector<32x256xf32>
    %c2_189 = arith.constant 2 : index
    %c4_190 = arith.constant 4 : index
    %c0_191 = arith.constant 0 : index
    %c0_192 = arith.constant 0 : index
    %307 = vector.load %arg2[%c2_189, %c4_190, %c0_191, %c0_192] : memref<4x9x32x32xbf16, #tpu.memory_space<vmem>>, vector<1x1x32x32xbf16>
    %308 = vector.shape_cast %307 : vector<1x1x32x32xbf16> to vector<32x32xbf16>
    %309 = arith.truncf %306 : vector<32x256xf32> to vector<32x256xbf16>
    %cst_193 = arith.constant dense<0.000000e+00> : vector<32x256xf32>
    %310 = tpu.matmul %308, %309, %cst_193 {dimension_numbers = #tpu.dot_dimension_numbers<[1], [0], [0], [1], [0, 0, 1, 1], [], []>} : vector<32x32xbf16>, vector<32x256xbf16>, vector<32x256xf32> -> vector<32x256xf32>
    %311 = arith.addf %305, %310 : vector<32x256xf32>
    %c0_194 = arith.constant 0 : index
    %c260 = arith.constant 260 : index
    %312 = vector.load %arg5[%c0_194, %c260] : memref<32x768xf32, #tpu.memory_space<vmem>>, vector<32x256xf32>
    %c12_i32_195 = arith.constant 12 : i32
    %313 = vector.broadcast %c12_i32_195 : i32 to vector<1x256xi32>
    %314 = arith.cmpi slt, %5, %313 : vector<1x256xi32>
    %cst_196 = arith.constant 0.000000e+00 : f32
    %315 = vector.shape_cast %314 : vector<1x256xi1> to vector<1x256xi1>
    %316 = vector.broadcast %315 : vector<1x256xi1> to vector<32x256xi1>
    %317 = vector.broadcast %cst_196 : f32 to vector<32x256xf32>
    %318 = arith.select %316, %312, %317 : vector<32x256xi1>, vector<32x256xf32>
    %c2_197 = arith.constant 2 : index
    %c5_198 = arith.constant 5 : index
    %c0_199 = arith.constant 0 : index
    %c0_200 = arith.constant 0 : index
    %319 = vector.load %arg2[%c2_197, %c5_198, %c0_199, %c0_200] : memref<4x9x32x32xbf16, #tpu.memory_space<vmem>>, vector<1x1x32x32xbf16>
    %320 = vector.shape_cast %319 : vector<1x1x32x32xbf16> to vector<32x32xbf16>
    %321 = arith.truncf %318 : vector<32x256xf32> to vector<32x256xbf16>
    %cst_201 = arith.constant dense<0.000000e+00> : vector<32x256xf32>
    %322 = tpu.matmul %320, %321, %cst_201 {dimension_numbers = #tpu.dot_dimension_numbers<[1], [0], [0], [1], [0, 0, 1, 1], [], []>} : vector<32x32xbf16>, vector<32x256xbf16>, vector<32x256xf32> -> vector<32x256xf32>
    %323 = arith.addf %311, %322 : vector<32x256xf32>
    %c0_202 = arith.constant 0 : index
    %c316 = arith.constant 316 : index
    %324 = vector.load %arg5[%c0_202, %c316] : memref<32x768xf32, #tpu.memory_space<vmem>>, vector<32x256xf32>
    %c12_i32_203 = arith.constant 12 : i32
    %325 = vector.broadcast %c12_i32_203 : i32 to vector<1x256xi32>
    %326 = arith.cmpi slt, %7, %325 : vector<1x256xi32>
    %c4_i32_204 = arith.constant 4 : i32
    %327 = vector.broadcast %c4_i32_204 : i32 to vector<1x256xi32>
    %328 = arith.cmpi sge, %5, %327 : vector<1x256xi32>
    %329 = arith.andi %326, %328 : vector<1x256xi1>
    %cst_205 = arith.constant 0.000000e+00 : f32
    %330 = vector.shape_cast %329 : vector<1x256xi1> to vector<1x256xi1>
    %331 = vector.broadcast %330 : vector<1x256xi1> to vector<32x256xi1>
    %332 = vector.broadcast %cst_205 : f32 to vector<32x256xf32>
    %333 = arith.select %331, %324, %332 : vector<32x256xi1>, vector<32x256xf32>
    %c2_206 = arith.constant 2 : index
    %c6_207 = arith.constant 6 : index
    %c0_208 = arith.constant 0 : index
    %c0_209 = arith.constant 0 : index
    %334 = vector.load %arg2[%c2_206, %c6_207, %c0_208, %c0_209] : memref<4x9x32x32xbf16, #tpu.memory_space<vmem>>, vector<1x1x32x32xbf16>
    %335 = vector.shape_cast %334 : vector<1x1x32x32xbf16> to vector<32x32xbf16>
    %336 = arith.truncf %333 : vector<32x256xf32> to vector<32x256xbf16>
    %cst_210 = arith.constant dense<0.000000e+00> : vector<32x256xf32>
    %337 = tpu.matmul %335, %336, %cst_210 {dimension_numbers = #tpu.dot_dimension_numbers<[1], [0], [0], [1], [0, 0, 1, 1], [], []>} : vector<32x32xbf16>, vector<32x256xbf16>, vector<32x256xf32> -> vector<32x256xf32>
    %338 = arith.addf %323, %337 : vector<32x256xf32>
    %c0_211 = arith.constant 0 : index
    %c320 = arith.constant 320 : index
    %339 = vector.load %arg5[%c0_211, %c320] : memref<32x768xf32, #tpu.memory_space<vmem>>, vector<32x256xf32>
    %c12_i32_212 = arith.constant 12 : i32
    %340 = vector.broadcast %c12_i32_212 : i32 to vector<1x256xi32>
    %341 = arith.cmpi slt, %7, %340 : vector<1x256xi32>
    %cst_213 = arith.constant 0.000000e+00 : f32
    %342 = vector.shape_cast %341 : vector<1x256xi1> to vector<1x256xi1>
    %343 = vector.broadcast %342 : vector<1x256xi1> to vector<32x256xi1>
    %344 = vector.broadcast %cst_213 : f32 to vector<32x256xf32>
    %345 = arith.select %343, %339, %344 : vector<32x256xi1>, vector<32x256xf32>
    %c2_214 = arith.constant 2 : index
    %c7_215 = arith.constant 7 : index
    %c0_216 = arith.constant 0 : index
    %c0_217 = arith.constant 0 : index
    %346 = vector.load %arg2[%c2_214, %c7_215, %c0_216, %c0_217] : memref<4x9x32x32xbf16, #tpu.memory_space<vmem>>, vector<1x1x32x32xbf16>
    %347 = vector.shape_cast %346 : vector<1x1x32x32xbf16> to vector<32x32xbf16>
    %348 = arith.truncf %345 : vector<32x256xf32> to vector<32x256xbf16>
    %cst_218 = arith.constant dense<0.000000e+00> : vector<32x256xf32>
    %349 = tpu.matmul %347, %348, %cst_218 {dimension_numbers = #tpu.dot_dimension_numbers<[1], [0], [0], [1], [0, 0, 1, 1], [], []>} : vector<32x32xbf16>, vector<32x256xbf16>, vector<32x256xf32> -> vector<32x256xf32>
    %350 = arith.addf %338, %349 : vector<32x256xf32>
    %c0_219 = arith.constant 0 : index
    %c324 = arith.constant 324 : index
    %351 = vector.load %arg5[%c0_219, %c324] : memref<32x768xf32, #tpu.memory_space<vmem>>, vector<32x256xf32>
    %c12_i32_220 = arith.constant 12 : i32
    %352 = vector.broadcast %c12_i32_220 : i32 to vector<1x256xi32>
    %353 = arith.cmpi slt, %7, %352 : vector<1x256xi32>
    %c12_i32_221 = arith.constant 12 : i32
    %354 = vector.broadcast %c12_i32_221 : i32 to vector<1x256xi32>
    %355 = arith.cmpi slt, %5, %354 : vector<1x256xi32>
    %356 = arith.andi %353, %355 : vector<1x256xi1>
    %cst_222 = arith.constant 0.000000e+00 : f32
    %357 = vector.shape_cast %356 : vector<1x256xi1> to vector<1x256xi1>
    %358 = vector.broadcast %357 : vector<1x256xi1> to vector<32x256xi1>
    %359 = vector.broadcast %cst_222 : f32 to vector<32x256xf32>
    %360 = arith.select %358, %351, %359 : vector<32x256xi1>, vector<32x256xf32>
    %c2_223 = arith.constant 2 : index
    %c8_224 = arith.constant 8 : index
    %c0_225 = arith.constant 0 : index
    %c0_226 = arith.constant 0 : index
    %361 = vector.load %arg2[%c2_223, %c8_224, %c0_225, %c0_226] : memref<4x9x32x32xbf16, #tpu.memory_space<vmem>>, vector<1x1x32x32xbf16>
    %362 = vector.shape_cast %361 : vector<1x1x32x32xbf16> to vector<32x32xbf16>
    %363 = arith.truncf %360 : vector<32x256xf32> to vector<32x256xbf16>
    %cst_227 = arith.constant dense<0.000000e+00> : vector<32x256xf32>
    %364 = tpu.matmul %362, %363, %cst_227 {dimension_numbers = #tpu.dot_dimension_numbers<[1], [0], [0], [1], [0, 0, 1, 1], [], []>} : vector<32x32xbf16>, vector<32x256xbf16>, vector<32x256xf32> -> vector<32x256xf32>
    %365 = arith.addf %350, %364 : vector<32x256xf32>
    %c2_228 = arith.constant 2 : index
    %c0_229 = arith.constant 0 : index
    %c0_230 = arith.constant 0 : index
    %366 = vector.load %arg3[%c2_228, %c0_229, %c0_230] : memref<4x32x1xf32, #tpu.memory_space<vmem>>, vector<1x32x1xf32>
    %367 = vector.shape_cast %366 : vector<1x32x1xf32> to vector<32x1xf32>
    %368 = vector.broadcast %367 : vector<32x1xf32> to vector<32x256xf32>
    %369 = arith.addf %365, %368 : vector<32x256xf32>
    %cst_231 = arith.constant 0.000000e+00 : f32
    %370 = vector.broadcast %cst_231 : f32 to vector<32x256xf32>
    %371 = arith.maximumf %369, %370 : vector<32x256xf32>
    %372 = arith.addf %251, %371 : vector<32x256xf32>
    %c0_232 = arith.constant 0 : index
    %c256_233 = arith.constant 256 : index
    %373 = vector.load %arg5[%c0_232, %c256_233] : memref<32x768xf32, #tpu.memory_space<vmem>>, vector<32x256xf32>
    tpu.vector_store %arg5[%c0_232, %c256_233], %371 {strides = array<i32>} : memref<32x768xf32, #tpu.memory_space<vmem>>, vector<32x256xf32>,
    %c0_234 = arith.constant 0 : index
    %c120 = arith.constant 120 : index
    %374 = vector.load %arg5[%c0_234, %c120] : memref<32x768xf32, #tpu.memory_space<vmem>>, vector<32x256xf32>
    %c8_i32 = arith.constant 8 : i32
    %375 = vector.broadcast %c8_i32 : i32 to vector<1x256xi32>
    %376 = arith.cmpi sge, %7, %375 : vector<1x256xi32>
    %c8_i32_235 = arith.constant 8 : i32
    %377 = vector.broadcast %c8_i32_235 : i32 to vector<1x256xi32>
    %378 = arith.cmpi sge, %5, %377 : vector<1x256xi32>
    %379 = arith.andi %376, %378 : vector<1x256xi1>
    %cst_236 = arith.constant 0.000000e+00 : f32
    %380 = vector.shape_cast %379 : vector<1x256xi1> to vector<1x256xi1>
    %381 = vector.broadcast %380 : vector<1x256xi1> to vector<32x256xi1>
    %382 = vector.broadcast %cst_236 : f32 to vector<32x256xf32>
    %383 = arith.select %381, %374, %382 : vector<32x256xi1>, vector<32x256xf32>
    %c3_237 = arith.constant 3 : index
    %c0_238 = arith.constant 0 : index
    %c0_239 = arith.constant 0 : index
    %c0_240 = arith.constant 0 : index
    %384 = vector.load %arg2[%c3_237, %c0_238, %c0_239, %c0_240] : memref<4x9x32x32xbf16, #tpu.memory_space<vmem>>, vector<1x1x32x32xbf16>
    %385 = vector.shape_cast %384 : vector<1x1x32x32xbf16> to vector<32x32xbf16>
    %386 = arith.truncf %383 : vector<32x256xf32> to vector<32x256xbf16>
    %cst_241 = arith.constant dense<0.000000e+00> : vector<32x256xf32>
    %387 = tpu.matmul %385, %386, %cst_241 {dimension_numbers = #tpu.dot_dimension_numbers<[1], [0], [0], [1], [0, 0, 1, 1], [], []>} : vector<32x32xbf16>, vector<32x256xbf16>, vector<32x256xf32> -> vector<32x256xf32>
    %c0_242 = arith.constant 0 : index
    %c128 = arith.constant 128 : index
    %388 = vector.load %arg5[%c0_242, %c128] : memref<32x768xf32, #tpu.memory_space<vmem>>, vector<32x256xf32>
    %c8_i32_243 = arith.constant 8 : i32
    %389 = vector.broadcast %c8_i32_243 : i32 to vector<1x256xi32>
    %390 = arith.cmpi sge, %7, %389 : vector<1x256xi32>
    %cst_244 = arith.constant 0.000000e+00 : f32
    %391 = vector.shape_cast %390 : vector<1x256xi1> to vector<1x256xi1>
    %392 = vector.broadcast %391 : vector<1x256xi1> to vector<32x256xi1>
    %393 = vector.broadcast %cst_244 : f32 to vector<32x256xf32>
    %394 = arith.select %392, %388, %393 : vector<32x256xi1>, vector<32x256xf32>
    %c3_245 = arith.constant 3 : index
    %c1_246 = arith.constant 1 : index
    %c0_247 = arith.constant 0 : index
    %c0_248 = arith.constant 0 : index
    %395 = vector.load %arg2[%c3_245, %c1_246, %c0_247, %c0_248] : memref<4x9x32x32xbf16, #tpu.memory_space<vmem>>, vector<1x1x32x32xbf16>
    %396 = vector.shape_cast %395 : vector<1x1x32x32xbf16> to vector<32x32xbf16>
    %397 = arith.truncf %394 : vector<32x256xf32> to vector<32x256xbf16>
    %cst_249 = arith.constant dense<0.000000e+00> : vector<32x256xf32>
    %398 = tpu.matmul %396, %397, %cst_249 {dimension_numbers = #tpu.dot_dimension_numbers<[1], [0], [0], [1], [0, 0, 1, 1], [], []>} : vector<32x32xbf16>, vector<32x256xbf16>, vector<32x256xf32> -> vector<32x256xf32>
    %399 = arith.addf %387, %398 : vector<32x256xf32>
    %c0_250 = arith.constant 0 : index
    %c136 = arith.constant 136 : index
    %400 = vector.load %arg5[%c0_250, %c136] : memref<32x768xf32, #tpu.memory_space<vmem>>, vector<32x256xf32>
    %c8_i32_251 = arith.constant 8 : i32
    %401 = vector.broadcast %c8_i32_251 : i32 to vector<1x256xi32>
    %402 = arith.cmpi sge, %7, %401 : vector<1x256xi32>
    %c8_i32_252 = arith.constant 8 : i32
    %403 = vector.broadcast %c8_i32_252 : i32 to vector<1x256xi32>
    %404 = arith.cmpi slt, %5, %403 : vector<1x256xi32>
    %405 = arith.andi %402, %404 : vector<1x256xi1>
    %cst_253 = arith.constant 0.000000e+00 : f32
    %406 = vector.shape_cast %405 : vector<1x256xi1> to vector<1x256xi1>
    %407 = vector.broadcast %406 : vector<1x256xi1> to vector<32x256xi1>
    %408 = vector.broadcast %cst_253 : f32 to vector<32x256xf32>
    %409 = arith.select %407, %400, %408 : vector<32x256xi1>, vector<32x256xf32>
    %c3_254 = arith.constant 3 : index
    %c2_255 = arith.constant 2 : index
    %c0_256 = arith.constant 0 : index
    %c0_257 = arith.constant 0 : index
    %410 = vector.load %arg2[%c3_254, %c2_255, %c0_256, %c0_257] : memref<4x9x32x32xbf16, #tpu.memory_space<vmem>>, vector<1x1x32x32xbf16>
    %411 = vector.shape_cast %410 : vector<1x1x32x32xbf16> to vector<32x32xbf16>
    %412 = arith.truncf %409 : vector<32x256xf32> to vector<32x256xbf16>
    %cst_258 = arith.constant dense<0.000000e+00> : vector<32x256xf32>
    %413 = tpu.matmul %411, %412, %cst_258 {dimension_numbers = #tpu.dot_dimension_numbers<[1], [0], [0], [1], [0, 0, 1, 1], [], []>} : vector<32x32xbf16>, vector<32x256xbf16>, vector<32x256xf32> -> vector<32x256xf32>
    %414 = arith.addf %399, %413 : vector<32x256xf32>
    %c0_259 = arith.constant 0 : index
    %c248 = arith.constant 248 : index
    %415 = vector.load %arg5[%c0_259, %c248] : memref<32x768xf32, #tpu.memory_space<vmem>>, vector<32x256xf32>
    %c8_i32_260 = arith.constant 8 : i32
    %416 = vector.broadcast %c8_i32_260 : i32 to vector<1x256xi32>
    %417 = arith.cmpi sge, %5, %416 : vector<1x256xi32>
    %cst_261 = arith.constant 0.000000e+00 : f32
    %418 = vector.shape_cast %417 : vector<1x256xi1> to vector<1x256xi1>
    %419 = vector.broadcast %418 : vector<1x256xi1> to vector<32x256xi1>
    %420 = vector.broadcast %cst_261 : f32 to vector<32x256xf32>
    %421 = arith.select %419, %415, %420 : vector<32x256xi1>, vector<32x256xf32>
    %c3_262 = arith.constant 3 : index
    %c3_263 = arith.constant 3 : index
    %c0_264 = arith.constant 0 : index
    %c0_265 = arith.constant 0 : index
    %422 = vector.load %arg2[%c3_262, %c3_263, %c0_264, %c0_265] : memref<4x9x32x32xbf16, #tpu.memory_space<vmem>>, vector<1x1x32x32xbf16>
    %423 = vector.shape_cast %422 : vector<1x1x32x32xbf16> to vector<32x32xbf16>
    %424 = arith.truncf %421 : vector<32x256xf32> to vector<32x256xbf16>
    %cst_266 = arith.constant dense<0.000000e+00> : vector<32x256xf32>
    %425 = tpu.matmul %423, %424, %cst_266 {dimension_numbers = #tpu.dot_dimension_numbers<[1], [0], [0], [1], [0, 0, 1, 1], [], []>} : vector<32x32xbf16>, vector<32x256xbf16>, vector<32x256xf32> -> vector<32x256xf32>
    %426 = arith.addf %414, %425 : vector<32x256xf32>
    %c0_267 = arith.constant 0 : index
    %c256_268 = arith.constant 256 : index
    %427 = vector.load %arg5[%c0_267, %c256_268] : memref<32x768xf32, #tpu.memory_space<vmem>>, vector<32x256xf32>
    %c3_269 = arith.constant 3 : index
    %c4_270 = arith.constant 4 : index
    %c0_271 = arith.constant 0 : index
    %c0_272 = arith.constant 0 : index
    %428 = vector.load %arg2[%c3_269, %c4_270, %c0_271, %c0_272] : memref<4x9x32x32xbf16, #tpu.memory_space<vmem>>, vector<1x1x32x32xbf16>
    %429 = vector.shape_cast %428 : vector<1x1x32x32xbf16> to vector<32x32xbf16>
    %430 = arith.truncf %427 : vector<32x256xf32> to vector<32x256xbf16>
    %cst_273 = arith.constant dense<0.000000e+00> : vector<32x256xf32>
    %431 = tpu.matmul %429, %430, %cst_273 {dimension_numbers = #tpu.dot_dimension_numbers<[1], [0], [0], [1], [0, 0, 1, 1], [], []>} : vector<32x32xbf16>, vector<32x256xbf16>, vector<32x256xf32> -> vector<32x256xf32>
    %432 = arith.addf %426, %431 : vector<32x256xf32>
    %c0_274 = arith.constant 0 : index
    %c264 = arith.constant 264 : index
    %433 = vector.load %arg5[%c0_274, %c264] : memref<32x768xf32, #tpu.memory_space<vmem>>, vector<32x256xf32>
    %c8_i32_275 = arith.constant 8 : i32
    %434 = vector.broadcast %c8_i32_275 : i32 to vector<1x256xi32>
    %435 = arith.cmpi slt, %5, %434 : vector<1x256xi32>
    %cst_276 = arith.constant 0.000000e+00 : f32
    %436 = vector.shape_cast %435 : vector<1x256xi1> to vector<1x256xi1>
    %437 = vector.broadcast %436 : vector<1x256xi1> to vector<32x256xi1>
    %438 = vector.broadcast %cst_276 : f32 to vector<32x256xf32>
    %439 = arith.select %437, %433, %438 : vector<32x256xi1>, vector<32x256xf32>
    %c3_277 = arith.constant 3 : index
    %c5_278 = arith.constant 5 : index
    %c0_279 = arith.constant 0 : index
    %c0_280 = arith.constant 0 : index
    %440 = vector.load %arg2[%c3_277, %c5_278, %c0_279, %c0_280] : memref<4x9x32x32xbf16, #tpu.memory_space<vmem>>, vector<1x1x32x32xbf16>
    %441 = vector.shape_cast %440 : vector<1x1x32x32xbf16> to vector<32x32xbf16>
    %442 = arith.truncf %439 : vector<32x256xf32> to vector<32x256xbf16>
    %cst_281 = arith.constant dense<0.000000e+00> : vector<32x256xf32>
    %443 = tpu.matmul %441, %442, %cst_281 {dimension_numbers = #tpu.dot_dimension_numbers<[1], [0], [0], [1], [0, 0, 1, 1], [], []>} : vector<32x32xbf16>, vector<32x256xbf16>, vector<32x256xf32> -> vector<32x256xf32>
    %444 = arith.addf %432, %443 : vector<32x256xf32>
    %c0_282 = arith.constant 0 : index
    %c376 = arith.constant 376 : index
    %445 = vector.load %arg5[%c0_282, %c376] : memref<32x768xf32, #tpu.memory_space<vmem>>, vector<32x256xf32>
    %c8_i32_283 = arith.constant 8 : i32
    %446 = vector.broadcast %c8_i32_283 : i32 to vector<1x256xi32>
    %447 = arith.cmpi slt, %7, %446 : vector<1x256xi32>
    %c8_i32_284 = arith.constant 8 : i32
    %448 = vector.broadcast %c8_i32_284 : i32 to vector<1x256xi32>
    %449 = arith.cmpi sge, %5, %448 : vector<1x256xi32>
    %450 = arith.andi %447, %449 : vector<1x256xi1>
    %cst_285 = arith.constant 0.000000e+00 : f32
    %451 = vector.shape_cast %450 : vector<1x256xi1> to vector<1x256xi1>
    %452 = vector.broadcast %451 : vector<1x256xi1> to vector<32x256xi1>
    %453 = vector.broadcast %cst_285 : f32 to vector<32x256xf32>
    %454 = arith.select %452, %445, %453 : vector<32x256xi1>, vector<32x256xf32>
    %c3_286 = arith.constant 3 : index
    %c6_287 = arith.constant 6 : index
    %c0_288 = arith.constant 0 : index
    %c0_289 = arith.constant 0 : index
    %455 = vector.load %arg2[%c3_286, %c6_287, %c0_288, %c0_289] : memref<4x9x32x32xbf16, #tpu.memory_space<vmem>>, vector<1x1x32x32xbf16>
    %456 = vector.shape_cast %455 : vector<1x1x32x32xbf16> to vector<32x32xbf16>
    %457 = arith.truncf %454 : vector<32x256xf32> to vector<32x256xbf16>
    %cst_290 = arith.constant dense<0.000000e+00> : vector<32x256xf32>
    %458 = tpu.matmul %456, %457, %cst_290 {dimension_numbers = #tpu.dot_dimension_numbers<[1], [0], [0], [1], [0, 0, 1, 1], [], []>} : vector<32x32xbf16>, vector<32x256xbf16>, vector<32x256xf32> -> vector<32x256xf32>
    %459 = arith.addf %444, %458 : vector<32x256xf32>
    %c0_291 = arith.constant 0 : index
    %c384 = arith.constant 384 : index
    %460 = vector.load %arg5[%c0_291, %c384] : memref<32x768xf32, #tpu.memory_space<vmem>>, vector<32x256xf32>
    %c8_i32_292 = arith.constant 8 : i32
    %461 = vector.broadcast %c8_i32_292 : i32 to vector<1x256xi32>
    %462 = arith.cmpi slt, %7, %461 : vector<1x256xi32>
    %cst_293 = arith.constant 0.000000e+00 : f32
    %463 = vector.shape_cast %462 : vector<1x256xi1> to vector<1x256xi1>
    %464 = vector.broadcast %463 : vector<1x256xi1> to vector<32x256xi1>
    %465 = vector.broadcast %cst_293 : f32 to vector<32x256xf32>
    %466 = arith.select %464, %460, %465 : vector<32x256xi1>, vector<32x256xf32>
    %c3_294 = arith.constant 3 : index
    %c7_295 = arith.constant 7 : index
    %c0_296 = arith.constant 0 : index
    %c0_297 = arith.constant 0 : index
    %467 = vector.load %arg2[%c3_294, %c7_295, %c0_296, %c0_297] : memref<4x9x32x32xbf16, #tpu.memory_space<vmem>>, vector<1x1x32x32xbf16>
    %468 = vector.shape_cast %467 : vector<1x1x32x32xbf16> to vector<32x32xbf16>
    %469 = arith.truncf %466 : vector<32x256xf32> to vector<32x256xbf16>
    %cst_298 = arith.constant dense<0.000000e+00> : vector<32x256xf32>
    %470 = tpu.matmul %468, %469, %cst_298 {dimension_numbers = #tpu.dot_dimension_numbers<[1], [0], [0], [1], [0, 0, 1, 1], [], []>} : vector<32x32xbf16>, vector<32x256xbf16>, vector<32x256xf32> -> vector<32x256xf32>
    %471 = arith.addf %459, %470 : vector<32x256xf32>
    %c0_299 = arith.constant 0 : index
    %c392 = arith.constant 392 : index
    %472 = vector.load %arg5[%c0_299, %c392] : memref<32x768xf32, #tpu.memory_space<vmem>>, vector<32x256xf32>
    %c8_i32_300 = arith.constant 8 : i32
    %473 = vector.broadcast %c8_i32_300 : i32 to vector<1x256xi32>
    %474 = arith.cmpi slt, %7, %473 : vector<1x256xi32>
    %c8_i32_301 = arith.constant 8 : i32
    %475 = vector.broadcast %c8_i32_301 : i32 to vector<1x256xi32>
    %476 = arith.cmpi slt, %5, %475 : vector<1x256xi32>
    %477 = arith.andi %474, %476 : vector<1x256xi1>
    %cst_302 = arith.constant 0.000000e+00 : f32
    %478 = vector.shape_cast %477 : vector<1x256xi1> to vector<1x256xi1>
    %479 = vector.broadcast %478 : vector<1x256xi1> to vector<32x256xi1>
    %480 = vector.broadcast %cst_302 : f32 to vector<32x256xf32>
    %481 = arith.select %479, %472, %480 : vector<32x256xi1>, vector<32x256xf32>
    %c3_303 = arith.constant 3 : index
    %c8_304 = arith.constant 8 : index
    %c0_305 = arith.constant 0 : index
    %c0_306 = arith.constant 0 : index
    %482 = vector.load %arg2[%c3_303, %c8_304, %c0_305, %c0_306] : memref<4x9x32x32xbf16, #tpu.memory_space<vmem>>, vector<1x1x32x32xbf16>
    %483 = vector.shape_cast %482 : vector<1x1x32x32xbf16> to vector<32x32xbf16>
    %484 = arith.truncf %481 : vector<32x256xf32> to vector<32x256xbf16>
    %cst_307 = arith.constant dense<0.000000e+00> : vector<32x256xf32>
    %485 = tpu.matmul %483, %484, %cst_307 {dimension_numbers = #tpu.dot_dimension_numbers<[1], [0], [0], [1], [0, 0, 1, 1], [], []>} : vector<32x32xbf16>, vector<32x256xbf16>, vector<32x256xf32> -> vector<32x256xf32>
    %486 = arith.addf %471, %485 : vector<32x256xf32>
    %c3_308 = arith.constant 3 : index
    %c0_309 = arith.constant 0 : index
    %c0_310 = arith.constant 0 : index
    %487 = vector.load %arg3[%c3_308, %c0_309, %c0_310] : memref<4x32x1xf32, #tpu.memory_space<vmem>>, vector<1x32x1xf32>
    %488 = vector.shape_cast %487 : vector<1x32x1xf32> to vector<32x1xf32>
    %489 = vector.broadcast %488 : vector<32x1xf32> to vector<32x256xf32>
    %490 = arith.addf %486, %489 : vector<32x256xf32>
    %cst_311 = arith.constant 0.000000e+00 : f32
    %491 = vector.broadcast %cst_311 : f32 to vector<32x256xf32>
    %492 = arith.maximumf %490, %491 : vector<32x256xf32>
    %493 = arith.addf %372, %492 : vector<32x256xf32>
    %c0_312 = arith.constant 0 : index
    %c0_313 = arith.constant 0 : index
    %c0_314 = arith.constant 0 : index
    %494 = vector.load %arg4[%c0_312, %c0_313, %c0_314] : memref<1x32x256xf32, #tpu.memory_space<vmem>>, vector<1x32x256xf32>
    %495 = vector.shape_cast %494 : vector<1x32x256xf32> to vector<32x256xf32>
    %496 = vector.shape_cast %493 : vector<32x256xf32> to vector<1x32x256xf32>
    tpu.vector_store %arg4[%c0_312, %c0_313, %c0_314], %496 {strides = array<i32>} : memref<1x32x256xf32, #tpu.memory_space<vmem>>, vector<1x32x256xf32>,
    return
  }
  func.func @transform_0(%arg0: i32) -> (i32, i32, i32) {
    %c0_i32 = arith.constant 0 : i32
    %c0_i32_0 = arith.constant 0 : i32
    %c0_i32_1 = arith.constant 0 : i32
    return %arg0, %c0_i32, %c0_i32_0 : i32, i32, i32
  }
  func.func @transform_1(%arg0: i32) -> (i32, i32, i32, i32) {
    %c0_i32 = arith.constant 0 : i32
    %c0_i32_0 = arith.constant 0 : i32
    %c0_i32_1 = arith.constant 0 : i32
    %c0_i32_2 = arith.constant 0 : i32
    %c0_i32_3 = arith.constant 0 : i32
    return %c0_i32, %c0_i32_0, %c0_i32_1, %c0_i32_2 : i32, i32, i32, i32
  }
  func.func @transform_2(%arg0: i32) -> (i32, i32, i32) {
    %c0_i32 = arith.constant 0 : i32
    %c0_i32_0 = arith.constant 0 : i32
    %c0_i32_1 = arith.constant 0 : i32
    %c0_i32_2 = arith.constant 0 : i32
    return %c0_i32, %c0_i32_0, %c0_i32_1 : i32, i32, i32
  }
  func.func @transform_3(%arg0: i32) -> (i32, i32, i32) {
    %c0_i32 = arith.constant 0 : i32
    %c0_i32_0 = arith.constant 0 : i32
    %c0_i32_1 = arith.constant 0 : i32
    return %arg0, %c0_i32, %c0_i32_0 : i32, i32, i32
  }
}

</mosaic_0001>

<bundles_post_ra>
// kernel: dblock_forward.1
= control target key start
LH: loop header
LB: loop body
LE: loop exit
PB: predicated region body
PF: predicated region fallthrough
CT: control target
= control target key end

     0   :  { %s7465_s12 = smov 0   ;;  %s9528_s0 = inlined_call_operand.vmem [shape: f32[2,32,256], index: 0, kind: input, shape index: {}]   ;;  %s9529_s1 = inlined_call_operand.vmem [shape: bf16[4,9,32,32], index: 1, kind: input, shape index: {}]   ;;  %s9530_s2 = inlined_call_operand.vmem [shape: f32[4,32,1], index: 2, kind: input, shape index: {}]   ;;  %s9531_s3 = inlined_call_operand.vmem [shape: f32[2,32,256], index: 3, kind: output, shape index: {}]  }
   0x1 LB: > { %s5447_s13 = sadd.s32 4294967295, %s7418_s12   ;;  %p5451_p0 = scmp.ge.s32.totalorder %s7418_s12, 1  ;;  %s7418_s12 = sphi %s7465_s12, %s13_s12  }
   0x2   : > { %p137_p1 = scmp.lt.s32.totalorder %s7418_s12, 3 }
   0x4   : > { %p138_p2 = pnand %p5451_p0, %p137_p1 }
   0x5   : > { %p161_p3 = scmp.lt.s32.totalorder (!%p138_p2), %s5447_s13, 1  ;;  %p5456_p4 = scmp.ne.s32.totalorder (!%p138_p2), %s5447_s13, 0 }
   0x6   : > { %141 = sbr.rel (%p138_p2) target bundleno = 1947 (0x79b), region = 32 }
   0xd   : > { %s162_s14 = scalar_select %p161_p3, %s5447_s13, 1 }
   0xe   : > { %175 = sbr.rel (%p5456_p4) target bundleno = 23 (0x17), region = 36  ;;  %v7420_v0 = vmov (!%p5456_p4), 0.0  }
   0xf   : > { %s6139_s15 = sshll.u32 %s162_s14, 6  ;;  %176 = vst [vmem:[#allocation2] sm:$0xff] (!%p5456_p4), %v7420_v0  ;;  %177 = vst [vmem:[#allocation2 + $0x8] sm:$0xff] (!%p5456_p4), %v7420_v0 }
  0x10   : > { %s7476_s18 = scalar_lea.vmem %s9528_s0, %s6139_s15  ;;  %s7481_s21 = scalar_lea.vmem %s9531_s3, %s6139_s15  ;;  %180 = vst [vmem:[#allocation2 + $0x20] sm:$0xff] (!%p5456_p4), %v7420_v0  ;;  %181 = vst [vmem:[#allocation2 + $0x28] sm:$0xff] (!%p5456_p4), %v7420_v0 }
  0x11   : > { %182 = vst [vmem:[#allocation2 + $0x30] sm:$0xff] (!%p5456_p4), %v7420_v0  ;;  %183 = vst [vmem:[#allocation2 + $0x38] sm:$0xff] (!%p5456_p4), %v7420_v0 }
  0x12   : > { %186 = vst [vmem:[#allocation2 + $0x50] sm:$0xff] (!%p5456_p4), %v7420_v0  ;;  %187 = vst [vmem:[#allocation2 + $0x58] sm:$0xff] (!%p5456_p4), %v7420_v0 }
  0x13   : > { %188 = vst [vmem:[#allocation2 + $0x60] sm:$0xff] (!%p5456_p4), %v7420_v0  ;;  %189 = vst [vmem:[#allocation2 + $0x68] sm:$0xff] (!%p5456_p4), %v7420_v0 }
  0x14   : > { %192 = vst [vmem:[#allocation2 + $0x80] sm:$0xff] (!%p5456_p4), %v7420_v0  ;;  %193 = vst [vmem:[#allocation2 + $0x88] sm:$0xff] (!%p5456_p4), %v7420_v0 }
  0x15   : > { %194 = vst [vmem:[#allocation2 + $0x90] sm:$0xff] %v7420_v0  ;;  %195 = vst [vmem:[#allocation2 + $0x98] sm:$0xff] %v7420_v0 }
  0x16   : > { %198 = vst [vmem:[#allocation2 + $0xb0] sm:$0xff] %v7420_v0  ;;  %199 = vst [vmem:[#allocation2 + $0xb8] sm:$0xff] %v7420_v0 }
  0x17 PF: > { %v7484_v3 = vld [vmem:[%s7476_s18] sm:$0xff]  ;;  %v7487_v5 = vld [vmem:[%s7476_s18 + $0x8] sm:$0xff]  ;;  %v7498_v9 = vld [vmem:[%s7476_s18 + $0x10] sm:$0xff]  ;;  %s7421_s22 = smov 16   ;;  %v7422_v19 = vmov 0   ;;  %s7423_s23 = smov 17   ;;  %v200_v30 = vlaneseq }
  0x18   : > { %v223_v1 = vld [vmem:[#allocation2 + $0x8] sm:$0xff]  ;;  %v7490_v6 = vld [vmem:[%s7476_s18 + $0x20] sm:$0xff]  ;;  %v6435_v8 = vpack.i.bf16 %v7487_v5, %v7484_v3  ;;  %v7501_v10 = vld [vmem:[%s7476_s18 + $0x18] sm:$0xff]  ;;  %425 = vmatprep.mubr.bf16.mxu0 %v7422_v19  ;;  %6670 = vset.pattern.permute.xlu0 %v7422_v19  ;;  %s7424_s24 = smov 15   ;;  %s7425_s25 = smov 1   ;;  %v6560_v27 = vpack.i.bf16 %v7498_v9, %v7484_v3  ;;  %vm342_vm0 = vcmask 130048  }
  0x19   : > { %v7493_v7 = vld [vmem:[%s7476_s18 + $0x28] sm:$0xff]  ;;  %v6440_v12 = vpack.i.bf16 %v7501_v10, %v7498_v9  ;;  %v7508_v15 = vld [vmem:[%s7476_s18 + $0x30] sm:$0xff]  ;;  %v7511_v16 = vld [vmem:[%s7476_s18 + $0x38] sm:$0xff]  ;;  %6671 = vset.pattern.permute.xlu1 %v7422_v19  ;;  %1726 = vmatprep.mubr.bf16.mxu1 %v7422_v19  ;;  %s7426_s26 = smov 127   ;;  %s7427_s27 = smov 113   ;;  %v201_v31 = vand.u32 127, %v200_v30 }
  0x1a   : > { %v226_v2 = vld [vmem:[#allocation2 + $0x38] sm:$0xff]  ;;  %v6445_v11 = vpack.i.bf16 %v7493_v7, %v7490_v6  ;;  %6436 = vrot.lane.b32.xlu0 %v6435_v8, %s7421_s22  ;;  %v6450_v18 = vpack.i.bf16 %v7511_v16, %v7508_v15  ;;  %v885_v21 = vld [vmem:[#allocation2 + $0x20] sm:$0xff]  ;;  %v6575_v28 = vpack.i.bf16 %v7508_v15, %v7490_v6  ;;  %s7428_s28 = smov 112   ;;  %s7429_s29 = smov 111   ;;  %vm281_vm6 = vcmask 138240  }
  0x1b   : > { %v6430_v4 = vpack.i.bf16 %v226_v2, %v223_v1  ;;  %v888_v20 = vld [vmem:[#allocation2 + $0x50] sm:$0xff]  ;;  %v6550_v24 = vpack.i.bf16 %v885_v21, %v7487_v5  ;;  %v202_v32 = vadd.s32 128, %v201_v31  ;;  %v7529_v36 = vshra.s32 %v201_v31, 4  ;;  %s7434_s30 = smov 126   ;;  %s7435_s4 = smov 98  }
  0x1c   : > { %v229_v13 = vld [vmem:[#allocation2 + $0x68] sm:$0xff]  ;;  %v6555_v23 = vpack.i.bf16 %v888_v20, %v7501_v10  ;;  %v7554_v62 = vand.u32 15, %v201_v31  ;;  %vm386_vm9 = vcmask 261120   ;;  %vm547_vm14 = vcmask 121856   ;;  %s7436_s5 = smov 96   ;;  %s7437_s6 = smov 94  }
  0x1d   : > { %6431 = vrot.lane.b32.xlu1 %v6430_v4, %s7421_s22  ;;  %v891_v22 = vld [vmem:[#allocation2 + $0x80] sm:$0xff]  ;;  %v894_v26 = vld [vmem:[#allocation2 + $0xb0] sm:$0xff]  ;;  %v7527_v35 = vshra.s32 %v202_v32, 4  ;;  %vm235_vm2 = vcmp.ge.s32.totalorder %v7529_v36, 1  ;;  %v7533_v45 = vand.u32 15, %v202_v32 }
  0x1e   : > { %v232_v14 = vld [vmem:[#allocation2 + $0x98] sm:$0xff]  ;;  %6441 = vrot.lane.b32.xlu0 %v6440_v12, %s7421_s22  ;;  %v6565_v25 = vpack.i.bf16 %v891_v22, %v7493_v7  ;;  %v6570_v29 = vpack.i.bf16 %v894_v26, %v7511_v16  ;;  %vm7549_vm4 = vmpackc.low %vm235_vm2, %vm235_vm2  ;;  %vm237_vm8 = vcmp.ge.s32.totalorder %v7554_v62, 1  ;;  %v7332_v22 = vld [vmem:[%s9529_s1 + $0x10] sm:$0xff]  }
  0x1f   : > { %v6455_v17 = vpack.i.bf16 %v232_v14, %v229_v13  ;;  %vm236_vm1 = vcmp.ge.s32.totalorder %v7527_v35, 1  ;;  %vm238_vm5 = vcmp.ge.s32.totalorder %v7533_v45, 1  ;;  %vm7589_vm11 = vmand %vm235_vm2, %vm237_vm8  ;;  %vm516_vm13 = vcmp.lt.s32.totalorder %v7533_v45, 15 }
  0x20   : > { %vm7541_vm3 = vmpackc.low %vm236_vm1, %vm236_vm1 }
  0x21   : > { %6446 = vrot.lane.b32.xlu1 %v6445_v11, %s7421_s22  ;;  %vm7568_vm7 = vmand %vm236_vm1, %vm238_vm5 }
  0x22   : > { %6451 = vrot.lane.b32.xlu0 %v6450_v18, %s7421_s22  ;;  %vm5479_vm10 = vmpackc.low %vm7568_vm7, %vm7568_vm7 }
  0x23   : > { %vm5482_vm12 = vmpackc.low %vm7589_vm11, %vm7589_vm11 }
  0x24   : > { %vm7622_vm15 = vmand %vm236_vm1, %vm516_vm13 }
  0x25   : > { %6456 = vrot.lane.b32.xlu1 %v6455_v17, %s7421_s22  ;;  %vm5499_vm1 = vmpackc.low %vm7622_vm15, %vm7622_vm15 }
  0x26   : > { %6461 = vrot.lane.b32.xlu0 %v6435_v8, %s7423_s23  ;;  %vm5522_vm7 = vmpackc.low %vm237_vm8, %vm237_vm8 }
  0x27   : > { %vm7753_vm11 = vmpackc.low %vm516_vm13, %vm516_vm13 }
  0x29   : > { %6466 = vrot.lane.b32.xlu1 %v6440_v12, %s7423_s23 }
  0x2a   : > { %6471 = vrot.lane.b32.xlu0 %v6430_v4, %s7423_s23 }
  0x2d   : > { %6476 = vrot.lane.b32.xlu1 %v6445_v11, %s7423_s23 }
  0x2e   : > { %6481 = vrot.lane.b32.xlu0 %v6450_v18, %s7423_s23 }
  0x31   : > { %6486 = vrot.lane.b32.xlu1 %v6455_v17, %s7423_s23 }
  0x32   : > { %6491 = vrot.lane.b32.xlu0 %v6435_v8, %s7424_s24 }
  0x35   : > { %6496 = vrot.lane.b32.xlu1 %v6440_v12, %s7424_s24 }
  0x36   : > { %6501 = vrot.lane.b32.xlu0 %v6430_v4, %s7424_s24 }
  0x39   : > { %6506 = vrot.lane.b32.xlu1 %v6445_v11, %s7424_s24 }
  0x3a   : > { %6511 = vrot.lane.b32.xlu0 %v6450_v18, %s7424_s24 }
  0x3d   : > { %6516 = vrot.lane.b32.xlu1 %v6455_v17, %s7424_s24 }
  0x3e   : > { %6521 = vrot.lane.b32.xlu0 %v6435_v8, %s7425_s25 }
  0x41   : > { %6526 = vrot.lane.b32.xlu1 %v6440_v12, %s7425_s25 }
  0x42   : > { %6531 = vrot.lane.b32.xlu0 %v6430_v4, %s7425_s25 }
  0x45   : > { %6536 = vrot.lane.b32.xlu1 %v6445_v11, %s7425_s25 }
  0x46   : > { %6541 = vrot.lane.b32.xlu0 %v6450_v18, %s7425_s25 }
  0x49   : > { %6546 = vrot.lane.b32.xlu1 %v6455_v17, %s7425_s25  ;;  %v7334_v17 = vld [vmem:[%s9529_s1] sm:$0xff]  }
  0x4a   : > { %6551 = vrot.lane.b32.xlu0 %v6550_v24, %s7426_s26 }
  0x4d   : > { %6556 = vrot.lane.b32.xlu1 %v6555_v23, %s7426_s26 }
  0x4e   : > { %6561 = vrot.lane.b32.xlu0 %v6560_v27, %s7426_s26 }
  0x51   : > { %6566 = vrot.lane.b32.xlu1 %v6565_v25, %s7426_s26 }
  0x52   : > { %6571 = vrot.lane.b32.xlu0 %v6570_v29, %s7426_s26 }
  0x55   : > { %6576 = vrot.lane.b32.xlu1 %v6575_v28, %s7426_s26  ;;  %s7430_s26 = smov 32  }
  0x56   : > { %6581 = vrot.lane.b32.xlu0 %v6550_v24, %s7427_s27 }
  0x59   : > { %6586 = vrot.lane.b32.xlu1 %v6555_v23, %s7427_s27 }
  0x5a   : > { %6591 = vrot.lane.b32.xlu0 %v6560_v27, %s7427_s27 }
  0x5d   : > { %6596 = vrot.lane.b32.xlu1 %v6565_v25, %s7427_s27 }
  0x5e   : > { %6601 = vrot.lane.b32.xlu0 %v6570_v29, %s7427_s27 }
  0x61   : > { %6606 = vrot.lane.b32.xlu1 %v6575_v28, %s7427_s27  ;;  %s7431_s27 = smov 34  }
  0x62   : > { %6611 = vrot.lane.b32.xlu0 %v6550_v24, %s7428_s28 }
  0x65   : > { %6616 = vrot.lane.b32.xlu1 %v6555_v23, %s7428_s28 }
  0x66   : > { %6621 = vrot.lane.b32.xlu0 %v6560_v27, %s7428_s28 }
  0x69   : > { %6626 = vrot.lane.b32.xlu1 %v6565_v25, %s7428_s28 }
  0x6a   : > { %6631 = vrot.lane.b32.xlu0 %v6570_v29, %s7428_s28 }
  0x6d   : > { %6636 = vrot.lane.b32.xlu1 %v6575_v28, %s7428_s28  ;;  %s7432_s28 = smov 30  }
  0x6e   : > { %6641 = vrot.lane.b32.xlu0 %v6550_v24, %s7429_s29 }
  0x71   : > { %6646 = vrot.lane.b32.xlu1 %v6555_v23, %s7429_s29 }
  0x72   : > { %6651 = vrot.lane.b32.xlu0 %v6560_v27, %s7429_s29 }
  0x75   : > { %6656 = vrot.lane.b32.xlu1 %v6565_v25, %s7429_s29 }
  0x76   : > { %6661 = vrot.lane.b32.xlu0 %v6570_v29, %s7429_s29 }
  0x79   : > { %6666 = vrot.lane.b32.xlu1 %v6575_v28, %s7429_s29  ;;  %s7433_s29 = smov 2  }
  0x8c   : > { %v6437_v34 = vpop.permute.xlu0 %6436 }
  0x8d   : > { %v6439_v38 = vunpack.i.h.bf16 %v6437_v34  ;;  %v6438_v39 = vunpack.i.l.bf16 %v6437_v34 }
  0x8f   : > { %v6432_v33 = vpop.permute.xlu1 %6431  ;;  %v344_v46 = vsel %vm342_vm0, %v6438_v39, %v6439_v38 }
  0x90   : > { %v6433_v37 = vunpack.i.l.bf16 %v6432_v33  ;;  %v6442_v41 = vpop.permute.xlu0 %6441  ;;  %v6434_v42 = vunpack.i.h.bf16 %v6432_v33 }
  0x91   : > { %v6444_v43 = vunpack.i.h.bf16 %v6442_v41  ;;  %v6443_v44 = vunpack.i.l.bf16 %v6442_v41 }
  0x92   : > { %v343_v47 = vsel %vm342_vm0, %v6433_v37, %v6438_v39 }
  0x93   : > { %v6447_v40 = vpop.permute.xlu1 %6446  ;;  %v346_v51 = vsel %vm342_vm0, %v6443_v44, %v6444_v43  ;;  %v345_v53 = vsel %vm342_vm0, %v6434_v42, %v6443_v44 }
  0x94   : > { %v6449_v48 = vunpack.i.h.bf16 %v6447_v40  ;;  %v6448_v49 = vunpack.i.l.bf16 %v6447_v40  ;;  %v6452_v56 = vpop.permute.xlu0 %6451  ;;  %v5464_v57 = vpack.c.bf16 %v346_v51, %v344_v46  ;;  %v5467_v59 = vpack.c.bf16 %v345_v53, %v343_v47  ;;  %v7333_v46 = vld [vmem:[%s9529_s1 + $0x18] sm:$0xff]  }
  0x95   : > { %v6454_v60 = vunpack.i.h.bf16 %v6452_v56  ;;  %v6453_v61 = vunpack.i.l.bf16 %v6452_v56 }
  0x96   : > { %5465 = vmatprep.subr.msk.bf16.mxu0 %vm7541_vm3, %v5464_v57  ;;  %v348_v0 = vsel %vm342_vm0, %v6448_v49, %v6449_v48 }
  0x97   : > { %v6457_v50 = vpop.permute.xlu1 %6456  ;;  %v350_v2 = vsel %vm342_vm0, %v6453_v61, %v6454_v60  ;;  %5468 = vmatpush1.bf16.msk.msra.mxu0 %vm7549_vm4, %v5467_v59  ;;  %v1469_v59 = vld [vmem:[%s9530_s2] sm:$0xff]  ;;  %v1470_v60 = vld [vmem:[%s9530_s2 + $0x8] sm:$0xff] }
  0x98   : > { %v6459_v54 = vunpack.i.h.bf16 %v6457_v50  ;;  %v6458_v55 = vunpack.i.l.bf16 %v6457_v50  ;;  %v6462_v8 = vpop.permute.xlu0 %6461  ;;  %v5470_v13 = vpack.c.bf16 %v350_v2, %v348_v0  ;;  %1475 = vperm.xlu0 %6670, %v1469_v59   ;;  %1480 = vperm.xlu1 %6671, %v1470_v60  }
  0x99   : > { %v6464_v18 = vunpack.i.h.bf16 %v6462_v8  ;;  %v6463_v20 = vunpack.i.l.bf16 %v6462_v8 }
  0x9a   : > { %v347_v63 = vsel %vm342_vm0, %v6458_v55, %v6448_v49  ;;  %v349_v1 = vsel %vm342_vm0, %v6459_v54, %v6453_v61  ;;  %5471 = vmatprep.subr.msk.bf16.mxu0 %vm7541_vm3, %v5470_v13  ;;  %vm515_vm0 = vcmp.lt.s32.totalorder %v7554_v62, 15  ;;  %v1471_v13 = vld [vmem:[%s9530_s2 + $0x10] sm:$0xff] }
  0x9b   : > { %v6467_v4 = vpop.permute.xlu1 %6466  ;;  %v5473_v14 = vpack.c.bf16 %v349_v1, %v347_v63  ;;  %v283_v23 = vsel %vm281_vm6, %v6463_v20, %v6464_v18  ;;  %vm7654_vm3 = vmand %vm235_vm2, %vm515_vm0 }
  0x9c   : > { %v6469_v11 = vunpack.i.h.bf16 %v6467_v4  ;;  %v6468_v12 = vunpack.i.l.bf16 %v6467_v4  ;;  %v6472_v25 = vpop.permute.xlu0 %6471  ;;  %vm5502_vm2 = vmpackc.low %vm7654_vm3, %vm7654_vm3  ;;  %1485 = vperm.xlu1 %6671, %v1471_v13   ;;  %v803_v13 = vpack.c.bf16 %v7501_v10, %v7487_v5  ;;  %v7338_v5 = vld [vmem:[%s9529_s1 + $0x30] sm:$0xff]   ;;  %v802_v10 = vpack.c.bf16 %v7498_v9, %v7484_v3  ;;  %v7339_v9 = vld [vmem:[%s9529_s1 + $0x38] sm:$0xff]  }
  0x9d   : > { %5474 = vmatpush1.bf16.msk.msra.mxu0 %vm7549_vm4, %v5473_v14  ;;  %v6474_v28 = vunpack.i.h.bf16 %v6472_v25  ;;  %v6473_v29 = vunpack.i.l.bf16 %v6472_v25  ;;  %v1472_v14 = vld [vmem:[%s9530_s2 + $0x18] sm:$0xff]  ;;  %vm686_vm4 = vcmask 7168   ;;  %vm7775_vm15 = vmpackc.low %vm515_vm0, %vm515_vm0 }
  0x9e   : > { %v285_v21 = vsel %vm281_vm6, %v6468_v12, %v6469_v11  ;;  %1490 = vperm.xlu0 %6670, %v1472_v14   ;;  %v7337_v14 = vld [vmem:[%s9529_s1 + $0x28] sm:$0xff]  }
  0x9f   : > { %v6477_v24 = vpop.permute.xlu1 %6476  ;;  %v5480_v26 = vpack.c.bf16 %v285_v21, %v283_v23  ;;  %v284_v32 = vsel %vm281_vm6, %v6474_v28, %v6468_v12  ;;  %v282_v33 = vsel %vm281_vm6, %v6473_v29, %v6463_v20 }
  0xa0   : > { %v6479_v30 = vunpack.i.h.bf16 %v6477_v24  ;;  %v6478_v31 = vunpack.i.l.bf16 %v6477_v24  ;;  %5475 = vmatmul.mubr.msk.bf16.vlgmr.msra.gmra.mrb[0].mxu0 %vm386_vm9, %v7332_v22  ;;  %v5483_v37 = vpack.c.bf16 %v284_v32, %v282_v33  ;;  %v6482_v38 = vpop.permute.xlu0 %6481 }
  0xa1   : > { %5481 = vmatprep.subr.msk.bf16.mxu0 %vm5479_vm10, %v5480_v26  ;;  %435 = vmatprep.mubr.bf16.mxu0 %v7422_v19  ;;  %v6484_v42 = vunpack.i.h.bf16 %v6482_v38  ;;  %v6483_v43 = vunpack.i.l.bf16 %v6482_v38 }
  0xa2   : > { %v287_v41 = vsel %vm281_vm6, %v6478_v31, %v6479_v30  ;;  %5484 = vmatpush1.bf16.msk.msra.mxu0 %vm5482_vm12, %v5483_v37 }
  0xa3   : > { %v6487_v34 = vpop.permute.xlu1 %6486  ;;  %v289_v47 = vsel %vm281_vm6, %v6483_v43, %v6484_v42  ;;  %v7335_v42 = vld [vmem:[%s9529_s1 + $0x8] sm:$0xff]  }
  0xa4   : > { %v6489_v39 = vunpack.i.h.bf16 %v6487_v34  ;;  %v6488_v40 = vunpack.i.l.bf16 %v6487_v34  ;;  %v6492_v51 = vpop.permute.xlu0 %6491  ;;  %v5486_v52 = vpack.c.bf16 %v289_v47, %v287_v41 }
  0xa5   : > { %v6494_v56 = vunpack.i.h.bf16 %v6492_v51  ;;  %v6493_v57 = vunpack.i.l.bf16 %v6492_v51 }
  0xa6   : > { %v286_v44 = vsel %vm281_vm6, %v6488_v40, %v6478_v31  ;;  %v288_v48 = vsel %vm281_vm6, %v6489_v39, %v6483_v43  ;;  %5487 = vmatprep.subr.msk.bf16.mxu0 %vm5479_vm10, %v5486_v52  ;;  %vm7706_vm6 = vmpackc.low %vm238_vm5, %vm238_vm5  ;;  %vm935_vm10 = vcmask 1039360  }
  0xa7   : > { %v6497_v49 = vpop.permute.xlu1 %6496  ;;  %v5489_v50 = vpack.c.bf16 %v288_v48, %v286_v44  ;;  %v549_v61 = vsel %vm547_vm14, %v6493_v57, %v6494_v56 }
  0xa8   : > { %v6499_v53 = vunpack.i.h.bf16 %v6497_v49  ;;  %v6498_v54 = vunpack.i.l.bf16 %v6497_v49  ;;  %5476 = vmatmul.mubr.msk.bf16.gmra.mrb[4].mxu0 %vm386_vm9, %v7333_v46  ;;  %v6502_v0 = vpop.permute.xlu0 %6501 }
  0xa9   : > { %5490 = vmatpush1.bf16.msk.msra.mxu0 %vm5482_vm12, %v5489_v50  ;;  %494 = vmatprep.mubr.bf16.mxu0 %v7422_v19  ;;  %v6504_v2 = vunpack.i.h.bf16 %v6502_v0  ;;  %v6503_v4 = vunpack.i.l.bf16 %v6502_v0  ;;  %v7336_v0 = vld [vmem:[%s9529_s1 + $0x20] sm:$0xff]   ;;  %vm1078_vm12 = vcmask 924672  }
  0xaa   : > { %v551_v58 = vsel %vm547_vm14, %v6498_v54, %v6499_v53 }
  0xab   : > { %v6507_v63 = vpop.permute.xlu1 %6506  ;;  %v5500_v1 = vpack.c.bf16 %v551_v58, %v549_v61  ;;  %v550_v18 = vsel %vm547_vm14, %v6504_v2, %v6498_v54  ;;  %v548_v20 = vsel %vm547_vm14, %v6503_v4, %v6493_v57 }
  0xac   : > { %v6509_v8 = vunpack.i.h.bf16 %v6507_v63  ;;  %v6508_v11 = vunpack.i.l.bf16 %v6507_v63  ;;  %v5503_v22 = vpack.c.bf16 %v550_v18, %v548_v20  ;;  %v6512_v23 = vpop.permute.xlu0 %6511 }
  0xad   : > { %5501 = vmatprep.subr.msk.bf16.mxu0 %vm5499_vm1, %v5500_v1  ;;  %v6514_v27 = vunpack.i.h.bf16 %v6512_v23  ;;  %v6513_v28 = vunpack.i.l.bf16 %v6512_v23 }
  0xae   : > { %v553_v26 = vsel %vm547_vm14, %v6508_v11, %v6509_v8 }
  0xaf   : > { %v6517_v21 = vpop.permute.xlu1 %6516  ;;  %v555_v30 = vsel %vm547_vm14, %v6513_v28, %v6514_v27 }
  0xb0   : > { %v6519_v24 = vunpack.i.h.bf16 %v6517_v21  ;;  %v6518_v25 = vunpack.i.l.bf16 %v6517_v21  ;;  %5491 = vmatmul.mubr.msk.bf16.vlgmr.msra.gmra.mrb[0].mxu0 %vm386_vm9, %v7334_v17  ;;  %v6522_v34 = vpop.permute.xlu0 %6521  ;;  %v5506_v37 = vpack.c.bf16 %v555_v30, %v553_v26 }
  0xb1   : > { %5504 = vmatpush1.bf16.msk.msra.mxu0 %vm5502_vm2, %v5503_v22  ;;  %504 = vmatprep.mubr.bf16.mxu0 %v7422_v19  ;;  %v6524_v40 = vunpack.i.h.bf16 %v6522_v34  ;;  %v6523_v41 = vunpack.i.l.bf16 %v6522_v34 }
  0xb2   : > { %v552_v29 = vsel %vm547_vm14, %v6518_v25, %v6508_v11  ;;  %v554_v31 = vsel %vm547_vm14, %v6519_v24, %v6513_v28  ;;  %5507 = vmatprep.subr.msk.bf16.mxu0 %vm5499_vm1, %v5506_v37  ;;  %v805_v25 = vpack.c.bf16 %v7511_v16, %v7493_v7  ;;  %vm1047_vm14 = vcmp.lt.s32.totalorder %v7527_v35, 15 }
  0xb3   : > { %v6527_v32 = vpop.permute.xlu1 %6526  ;;  %v5509_v33 = vpack.c.bf16 %v554_v31, %v552_v29  ;;  %v688_v44 = vsel %vm686_vm4, %v6523_v41, %v6524_v40  ;;  %v804_v29 = vpack.c.bf16 %v7508_v15, %v7490_v6  ;;  %vm7788_vm1 = vmand %vm1047_vm14, %vm238_vm5  ;;  %vm1046_vm5 = vcmp.lt.s32.totalorder %v7529_v36, 15 }
  0xb4   : > { %v6529_v38 = vunpack.i.h.bf16 %v6527_v32  ;;  %v6528_v39 = vunpack.i.l.bf16 %v6527_v32  ;;  %v6532_v48 = vpop.permute.xlu0 %6531  ;;  %vm5567_vm3 = vmpackc.low %vm7788_vm1, %vm7788_vm1 }
  0xb5   : > { %5510 = vmatpush1.bf16.msk.msra.mxu0 %vm5502_vm2, %v5509_v33  ;;  %v6534_v50 = vunpack.i.h.bf16 %v6532_v48  ;;  %v6533_v51 = vunpack.i.l.bf16 %v6532_v48  ;;  %vm7821_vm2 = vmand %vm1046_vm5, %vm237_vm8 }
  0xb6   : > { %v690_v43 = vsel %vm686_vm4, %v6528_v39, %v6529_v38  ;;  %vm7850_vm8 = vmpackc.low %vm1047_vm14, %vm1047_vm14 }
  0xb7   : > { %v6537_v46 = vpop.permute.xlu1 %6536  ;;  %v5520_v49 = vpack.c.bf16 %v690_v43, %v688_v44  ;;  %v689_v55 = vsel %vm686_vm4, %v6534_v50, %v6528_v39  ;;  %v687_v56 = vsel %vm686_vm4, %v6533_v51, %v6523_v41  ;;  %v7340_v50 = vld [vmem:[%s9529_s1 + $0x40] sm:$0xff]  }
  0xb8   : > { %v6539_v52 = vunpack.i.h.bf16 %v6537_v46  ;;  %v6538_v53 = vunpack.i.l.bf16 %v6537_v46  ;;  %5492 = vmatmul.mubr.msk.bf16.gmra.mrb[4].mxu0 %vm386_vm9, %v7335_v42  ;;  %v6542_v57 = vpop.permute.xlu0 %6541  ;;  %v5523_v1 = vpack.c.bf16 %v689_v55, %v687_v56 }
  0xb9   : > { %5521 = vmatprep.subr.msk.bf16.mxu0 %vm7706_vm6, %v5520_v49  ;;  %629 = vmatprep.mubr.bf16.mxu0 %v7422_v19  ;;  %v6544_v61 = vunpack.i.h.bf16 %v6542_v57  ;;  %v6543_v63 = vunpack.i.l.bf16 %v6542_v57 }
  0xba   : > { %v692_v60 = vsel %vm686_vm4, %v6538_v53, %v6539_v52 }
  0xbb   : > { %v6547_v54 = vpop.permute.xlu1 %6546  ;;  %v694_v2 = vsel %vm686_vm4, %v6543_v63, %v6544_v61 }
  0xbc   : > { %v6549_v58 = vunpack.i.h.bf16 %v6547_v54  ;;  %v6548_v59 = vunpack.i.l.bf16 %v6547_v54  ;;  %v5526_v11 = vpack.c.bf16 %v694_v2, %v692_v60  ;;  %v6552_v17 = vpop.permute.xlu0 %6551 }
  0xbd   : > { %v6554_v20 = vunpack.i.h.bf16 %v6552_v17  ;;  %v6553_v21 = vunpack.i.l.bf16 %v6552_v17 }
  0xbe   : > { %v691_v4 = vsel %vm686_vm4, %v6548_v59, %v6538_v53  ;;  %v693_v8 = vsel %vm686_vm4, %v6549_v58, %v6543_v63  ;;  %vm1217_vm4 = vcmask 916480  }
  0xbf   : > { %v5529_v12 = vpack.c.bf16 %v693_v8, %v691_v4  ;;  %v6557_v18 = vpop.permute.xlu1 %6556  ;;  %v937_v26 = vsel %vm935_vm10, %v6553_v21, %v6554_v20 }
  0xc0   : > { %5511 = vmatmul.mubr.msk.bf16.vlgmr.msra.gmra.mrb[0].mxu0 %vm386_vm9, %v7336_v0  ;;  %v6559_v22 = vunpack.i.h.bf16 %v6557_v18  ;;  %v6558_v23 = vunpack.i.l.bf16 %v6557_v18  ;;  %v6562_v24 = vpop.permute.xlu0 %6561 }
  0xc1   : > { %5524 = vmatpush1.bf16.msk.msra.mxu0 %vm5522_vm7, %v5523_v1  ;;  %639 = vmatprep.mubr.bf16.mxu0 %v7422_v19  ;;  %v6564_v16 = vunpack.i.h.bf16 %v6562_v24  ;;  %v6563_v33 = vunpack.i.l.bf16 %v6562_v24  ;;  %v7341_v1 = vld [vmem:[%s9529_s1 + $0x48] sm:$0xff]  }
  0xc2   : > { %5527 = vmatprep.subr.msk.bf16.mxu0 %vm7706_vm6, %v5526_v11  ;;  %v939_v27 = vsel %vm935_vm10, %v6558_v23, %v6559_v22  ;;  %vm5570_vm6 = vmpackc.low %vm7821_vm2, %vm7821_vm2  ;;  %vm1539_vm2 = vcmp.ge.s32.totalorder %v7554_v62, 2 }
  0xc3   : > { %v6567_v28 = vpop.permute.xlu1 %6566  ;;  %v5548_v30 = vpack.c.bf16 %v939_v27, %v937_v26  ;;  %v938_v38 = vsel %vm935_vm10, %v6564_v16, %v6558_v23  ;;  %v936_v40 = vsel %vm935_vm10, %v6563_v33, %v6553_v21 }
  0xc4   : > { %v6572_v7 = vpop.permute.xlu0 %6571  ;;  %v6569_v31 = vunpack.i.h.bf16 %v6567_v28  ;;  %v6568_v32 = vunpack.i.l.bf16 %v6567_v28  ;;  %v5551_v51 = vpack.c.bf16 %v938_v38, %v936_v40  ;;  %v7343_v38 = vld [vmem:[%s9529_s1 + $0x58] sm:$0xff]  }
  0xc5   : > { %5530 = vmatpush1.bf16.msk.msra.mxu0 %vm5522_vm7, %v5529_v12  ;;  %v6574_v6 = vunpack.i.h.bf16 %v6572_v7  ;;  %v6573_v15 = vunpack.i.l.bf16 %v6572_v7  ;;  %vm1358_vm7 = vcmask 908288  }
  0xc6   : > { %822 = vmatprep.subr.bf16.mxu0 %v803_v13  ;;  %v941_v39 = vsel %vm935_vm10, %v6568_v32, %v6569_v31 }
  0xc7   : > { %v6577_v34 = vpop.permute.xlu1 %6576  ;;  %v943_v41 = vsel %vm935_vm10, %v6573_v15, %v6574_v6 }
  0xc8   : > { %5512 = vmatmul.mubr.msk.bf16.gmra.mrb[4].mxu0 %vm386_vm9, %v7337_v14  ;;  %v6582_v37 = vpop.permute.xlu0 %6581  ;;  %v6579_v42 = vunpack.i.h.bf16 %v6577_v34  ;;  %v6578_v43 = vunpack.i.l.bf16 %v6577_v34  ;;  %v5554_v56 = vpack.c.bf16 %v943_v41, %v941_v39  ;;  %v1525_v34 = vld [vmem:[#allocation2 + $0x8] sm:$0xff] }
  0xc9   : > { %768 = vmatprep.mubr.bf16.mxu0 %v7422_v19  ;;  %v6584_v46 = vunpack.i.h.bf16 %v6582_v37  ;;  %v6583_v47 = vunpack.i.l.bf16 %v6582_v37 }
  0xca   : > { %v940_v54 = vsel %vm935_vm10, %v6578_v43, %v6568_v32  ;;  %v942_v55 = vsel %vm935_vm10, %v6579_v42, %v6573_v15  ;;  %vm7876_vm10 = vmpackc.low %vm1046_vm5, %vm1046_vm5 }
  0xcb   : > { %v6587_v44 = vpop.permute.xlu1 %6586  ;;  %v1080_v57 = vsel %vm1078_vm12, %v6583_v47, %v6584_v46  ;;  %v5557_v61 = vpack.c.bf16 %v942_v55, %v940_v54 }
  0xcc   : > { %v6589_v48 = vunpack.i.h.bf16 %v6587_v44  ;;  %v6588_v49 = vunpack.i.l.bf16 %v6587_v44  ;;  %v6592_v52 = vpop.permute.xlu0 %6591 }
  0xcd   : > { %v6594_v2 = vunpack.i.h.bf16 %v6592_v52  ;;  %v6593_v11 = vunpack.i.l.bf16 %v6592_v52 }
  0xce   : > { %v1082_v58 = vsel %vm1078_vm12, %v6588_v49, %v6589_v48 }
  0xcf   : > { %v6597_v59 = vpop.permute.xlu1 %6596  ;;  %v5568_v63 = vpack.c.bf16 %v1082_v58, %v1080_v57  ;;  %v1081_v18 = vsel %vm1078_vm12, %v6594_v2, %v6588_v49  ;;  %v1079_v21 = vsel %vm1078_vm12, %v6593_v11, %v6583_v47 }
  0xd0   : > { %5531 = vmatmul.mubr.msk.bf16.vlgmr.msra.gmra.mrb[0].mxu0 %vm386_vm9, %v7338_v5  ;;  %v6602_v0 = vpop.permute.xlu0 %6601  ;;  %v6599_v4 = vunpack.i.h.bf16 %v6597_v59  ;;  %v6598_v8 = vunpack.i.l.bf16 %v6597_v59  ;;  %v7344_v59 = vld [vmem:[%s9529_s1 + $0x60] sm:$0xff]  }
  0xd1   : > { %823 = vmatpush1.bf16.msra.mxu0 %v802_v10  ;;  %778 = vmatprep.mubr.bf16.mxu0 %v7422_v19  ;;  %v6604_v12 = vunpack.i.h.bf16 %v6602_v0  ;;  %v6603_v13 = vunpack.i.l.bf16 %v6602_v0 }
  0xd2   : > { %824 = vmatprep.subr.bf16.mxu0 %v805_v25  ;;  %v1084_v20 = vsel %vm1078_vm12, %v6598_v8, %v6599_v4 }
  0xd3   : > { %v6607_v14 = vpop.permute.xlu1 %6606  ;;  %v1086_v22 = vsel %vm1078_vm12, %v6603_v13, %v6604_v12 }
  0xd4   : > { %v6612_v17 = vpop.permute.xlu0 %6611  ;;  %v6609_v23 = vunpack.i.h.bf16 %v6607_v14  ;;  %v6608_v5 = vunpack.i.l.bf16 %v6607_v14  ;;  %v5574_v16 = vpack.c.bf16 %v1086_v22, %v1084_v20 }
  0xd5   : > { %825 = vmatpush1.bf16.msra.mxu0 %v804_v29  ;;  %v6614_v25 = vunpack.i.h.bf16 %v6612_v17  ;;  %v6613_v26 = vunpack.i.l.bf16 %v6612_v17  ;;  %v7342_v29 = vld [vmem:[%s9529_s1 + $0x50] sm:$0xff]   ;;  %v7345_v17 = vld [vmem:[%s9529_s1 + $0x68] sm:$0xff]  }
  0xd6   : > { %5549 = vmatprep.subr.msk.bf16.mxu0 %vm7753_vm11, %v5548_v30  ;;  %v5571_v30 = vpack.c.bf16 %v1081_v18, %v1079_v21  ;;  %v1083_v7 = vsel %vm1078_vm12, %v6608_v5, %v6598_v8 }
  0xd7   : > { %v6617_v10 = vpop.permute.xlu1 %6616  ;;  %v1219_v31 = vsel %vm1217_vm4, %v6613_v26, %v6614_v25 }
  0xd8   : > { %5532 = vmatmul.mubr.msk.bf16.gmra.mrb[4].mxu0 %vm386_vm9, %v7339_v9  ;;  %v6619_v27 = vunpack.i.h.bf16 %v6617_v10  ;;  %v6618_v28 = vunpack.i.l.bf16 %v6617_v10  ;;  %v6622_v3 = vpop.permute.xlu0 %6621  ;;  %v1085_v9 = vsel %vm1078_vm12, %v6609_v23, %v6603_v13 }
  0xd9   : > { %854 = vmatprep.mubr.bf16.mxu0 %v7422_v19  ;;  %v5577_v6 = vpack.c.bf16 %v1085_v9, %v1083_v7  ;;  %v6624_v39 = vunpack.i.h.bf16 %v6622_v3  ;;  %v6623_v42 = vunpack.i.l.bf16 %v6622_v3  ;;  %v7346_v3 = vld [vmem:[%s9529_s1 + $0x70] sm:$0xff]  }
  0xda   : > { %v1221_v32 = vsel %vm1217_vm4, %v6618_v28, %v6619_v27 }
  0xdb   : > { %v6627_v33 = vpop.permute.xlu1 %6626  ;;  %v5588_v15 = vpack.c.bf16 %v1221_v32, %v1219_v31  ;;  %v1220_v48 = vsel %vm1217_vm4, %v6624_v39, %v6618_v28 }
  0xdc   : > { %v6632_v37 = vpop.permute.xlu0 %6631  ;;  %v6629_v40 = vunpack.i.h.bf16 %v6627_v33  ;;  %v6628_v41 = vunpack.i.l.bf16 %v6627_v33  ;;  %v7347_v33 = vld [vmem:[%s9529_s1 + $0x78] sm:$0xff]  }
  0xdd   : > { %v6634_v43 = vunpack.i.h.bf16 %v6632_v37  ;;  %v6633_v44 = vunpack.i.l.bf16 %v6632_v37  ;;  %v1528_v37 = vld [vmem:[#allocation2 + $0x38] sm:$0xff] }
  0xde   : > { %v1223_v49 = vsel %vm1217_vm4, %v6628_v41, %v6629_v40 }
  0xdf   : > { %v6637_v46 = vpop.permute.xlu1 %6636 }
  0xe0   : > { %5539 = vmatmul.mubr.msk.bf16.vlgmr.msra.gmra.mrb[0].mxu0 %vm386_vm9, %v7340_v50  ;;  %v6642_v47 = vpop.permute.xlu0 %6641  ;;  %v1218_v50 = vsel %vm1217_vm4, %v6623_v42, %v6613_v26  ;;  %v6639_v52 = vunpack.i.h.bf16 %v6637_v46  ;;  %v6638_v53 = vunpack.i.l.bf16 %v6637_v46 }
  0xe1   : > { %5552 = vmatpush1.bf16.msk.msra.mxu0 %vm7775_vm15, %v5551_v51  ;;  %864 = vmatprep.mubr.bf16.mxu0 %v7422_v19  ;;  %v1225_v51 = vsel %vm1217_vm4, %v6633_v44, %v6634_v43  ;;  %v6644_v55 = vunpack.i.h.bf16 %v6642_v47  ;;  %v5591_v60 = vpack.c.bf16 %v1220_v48, %v1218_v50 }
  0xe2   : > { %5555 = vmatprep.subr.msk.bf16.mxu0 %vm7753_vm11, %v5554_v56  ;;  %v6643_v56 = vunpack.i.l.bf16 %v6642_v47  ;;  %v1224_v0 = vsel %vm1217_vm4, %v6639_v52, %v6633_v44  ;;  %vm7889_vm11 = vmand %vm1047_vm14, %vm516_vm13 }
  0xe3   : > { %v6647_v54 = vpop.permute.xlu1 %6646  ;;  %vm5607_vm12 = vmpackc.low %vm7889_vm11, %vm7889_vm11  ;;  %vm1817_vm11 = vcmp.lt.s32.totalorder %v7533_v45, 14 }
  0xe4   : > { %v6649_v57 = vunpack.i.h.bf16 %v6647_v54  ;;  %v6648_v58 = vunpack.i.l.bf16 %v6647_v54  ;;  %v6652_v2 = vpop.permute.xlu0 %6651  ;;  %v1360_v4 = vsel %vm1358_vm7, %v6643_v56, %v6644_v55  ;;  %vm1328_vm13 = vmand %vm1046_vm5, %vm515_vm0  ;;  %vm1538_vm0 = vcmp.ge.s32.totalorder %v7527_v35, 2 }
  0xe5   : > { %5558 = vmatpush1.bf16.msk.msra.mxu0 %vm7775_vm15, %v5557_v61  ;;  %v6654_v20 = vunpack.i.h.bf16 %v6652_v2  ;;  %v6653_v21 = vunpack.i.l.bf16 %v6652_v2  ;;  %vm5610_vm14 = vmpackc.low %vm1328_vm13, %vm1328_vm13  ;;  %vm1537_vm15 = vcmp.ge.s32.totalorder %v7529_v36, 2  ;;  %vm1540_vm5 = vcmp.ge.s32.totalorder %v7533_v45, 2 }
  0xe6   : > { %5569 = vmatprep.subr.msk.bf16.mxu0 %vm5567_vm3, %v5568_v63  ;;  %v1222_v63 = vsel %vm1217_vm4, %v6638_v53, %v6628_v41  ;;  %v1362_v8 = vsel %vm1358_vm7, %v6648_v58, %v6649_v57  ;;  %vm8031_vm1 = vmpackc.low %vm1538_vm0, %vm1538_vm0  ;;  %vm1583_vm4 = vcmask 277504  }
  0xe7   : > { %v5597_v12 = vpack.c.bf16 %v1224_v0, %v1222_v63  ;;  %v6657_v13 = vpop.permute.xlu1 %6656  ;;  %v5608_v14 = vpack.c.bf16 %v1362_v8, %v1360_v4  ;;  %v1361_v25 = vsel %vm1358_vm7, %v6654_v20, %v6648_v58  ;;  %v1359_v26 = vsel %vm1358_vm7, %v6653_v21, %v6643_v56  ;;  %vm8116_vm13 = vmand %vm1538_vm0, %vm1817_vm11 }
  0xe8   : > { %5540 = vmatmul.mubr.msk.bf16.gmra.mrb[4].mxu0 %vm386_vm9, %v7341_v1  ;;  %v5594_v1 = vpack.c.bf16 %v1225_v51, %v1223_v49  ;;  %v6662_v18 = vpop.permute.xlu0 %6661  ;;  %v6659_v22 = vunpack.i.h.bf16 %v6657_v13  ;;  %v6658_v23 = vunpack.i.l.bf16 %v6657_v13  ;;  %v5611_v7 = vpack.c.bf16 %v1361_v25, %v1359_v26  ;;  %v2186_v25 = vld [vmem:[#allocation2 + $0x20] sm:$0xff]  ;;  %v2189_v26 = vld [vmem:[#allocation2 + $0x50] sm:$0xff] }
  0xe9   : > { %1017 = vmatprep.mubr.bf16.mxu0 %v7422_v19  ;;  %v6664_v5 = vunpack.i.h.bf16 %v6662_v18  ;;  %v6663_v10 = vunpack.i.l.bf16 %v6662_v18  ;;  %v1534_v18 = vld [vmem:[#allocation2 + $0x98] sm:$0xff] }
  0xeb   : > { %v6667_v24 = vpop.permute.xlu1 %6666 }
  0xec   : > { %v6669_v27 = vunpack.i.h.bf16 %v6667_v24  ;;  %v6668_v28 = vunpack.i.l.bf16 %v6667_v24 }
  0xee   : > { %v1363_v9 = vsel %vm1358_vm7, %v6668_v28, %v6658_v23 }
  0xf0   : > { %5559 = vmatmul.mubr.msk.bf16.vlgmr.msra.gmra.mrb[0].mxu0 %vm386_vm9, %v7342_v29  ;;  %v1364_v29 = vsel %vm1358_vm7, %v6658_v23, %v6659_v22 }
  0xf1   : > { %5572 = vmatpush1.bf16.msk.msra.mxu0 %vm5570_vm6, %v5571_v30  ;;  %1027 = vmatprep.mubr.bf16.mxu0 %v7422_v19  ;;  %v1366_v30 = vsel %vm1358_vm7, %v6663_v10, %v6664_v5 }
  0xf2   : > { %5575 = vmatprep.subr.msk.bf16.mxu0 %vm5567_vm3, %v5574_v16  ;;  %v1365_v16 = vsel %vm1358_vm7, %v6669_v27, %v6663_v10  ;;  %v5614_v31 = vpack.c.bf16 %v1366_v30, %v1364_v29  ;;  %v2192_v29 = vld [vmem:[#allocation2 + $0x80] sm:$0xff]  ;;  %v2195_v30 = vld [vmem:[#allocation2 + $0xb0] sm:$0xff]  ;;  %vm8040_vm3 = vmpackc.low %vm1537_vm15, %vm1537_vm15 }
  0xf3   : > { %v5617_v32 = vpack.c.bf16 %v1365_v16, %v1363_v9  ;;  %v5789_v9 = vld [vmem:[%s9530_s2 + $0x20] sm:$0xff]  ;;  %v5790_v16 = vld [vmem:[%s9530_s2 + $0x28] sm:$0xff] }
  0xf5   : > { %5578 = vmatpush1.bf16.msk.msra.mxu0 %vm5570_vm6, %v5577_v6  ;;  %v7348_v6 = vld [vmem:[%s9529_s1 + $0x80] sm:$0xff]   ;;  %vm8060_vm6 = vmand %vm1538_vm0, %vm1540_vm5 }
  0xf6   : > { %5589 = vmatprep.subr.msk.bf16.mxu0 %vm7850_vm8, %v5588_v15  ;;  %v7349_v15 = vld [vmem:[%s9529_s1 + $0x88] sm:$0xff]   ;;  %vm5647_vm7 = vmpackc.low %vm8060_vm6, %vm8060_vm6 }
  0xf7   : > { %vm5667_vm0 = vmpackc.low %vm8116_vm13, %vm8116_vm13  ;;  %vm2379_vm13 = vcmask 801792  }
  0xf8   : > { %5560 = vmatmul.mubr.msk.bf16.gmra.mrb[4].mxu0 %vm386_vm9, %v7343_v38  ;;  %v7948_v38 = vpack.i.bf16 %v1528_v37, %v1525_v34  ;;  %vm5690_vm6 = vmpackc.low %vm1539_vm2, %vm1539_vm2 }
  0xf9   : > { %1160 = vmatprep.mubr.bf16.mxu0 %v7422_v19 }
  0xfa   : > { %6673 = vrot.lane.b32.xlu1 %v7948_v38, %s7430_s26 }
 0x100   : > { %5579 = vmatmul.mubr.msk.bf16.vlgmr.msra.gmra.mrb[0].mxu0 %vm386_vm9, %v7344_v59 }
 0x101   : > { %5592 = vmatpush1.bf16.msk.msra.mxu0 %vm7876_vm10, %v5591_v60  ;;  %1170 = vmatprep.mubr.bf16.mxu0 %v7422_v19 }
 0x102   : > { %5595 = vmatprep.subr.msk.bf16.mxu0 %vm7850_vm8, %v5594_v1  ;;  %vm8073_vm8 = vmand %vm1537_vm15, %vm1539_vm2 }
 0x105   : > { %5598 = vmatpush1.bf16.msk.msra.mxu0 %vm7876_vm10, %v5597_v12  ;;  %vm5650_vm10 = vmpackc.low %vm8073_vm8, %vm8073_vm8  ;;  %vm2236_vm8 = vcmask 1031168  }
 0x106   : > { %5609 = vmatprep.subr.msk.bf16.mxu0 %vm5607_vm12, %v5608_v14 }
 0x108   : > { %5580 = vmatmul.mubr.msk.bf16.gmra.mrb[4].mxu0 %vm386_vm9, %v7345_v17  ;;  %v1531_v17 = vld [vmem:[#allocation2 + $0x68] sm:$0xff] }
 0x109   : > { %1299 = vmatprep.mubr.bf16.mxu0 %v7422_v19  ;;  %v6697_v10 = vpack.i.bf16 %v1534_v18, %v1531_v17 }
 0x110   : > { %5599 = vmatmul.mubr.msk.bf16.vlgmr.msra.gmra.mrb[0].mxu0 %vm386_vm9, %v7346_v3 }
 0x111   : > { %5612 = vmatpush1.bf16.msk.msra.mxu0 %vm5610_vm14, %v5611_v7  ;;  %1309 = vmatprep.mubr.bf16.mxu0 %v7422_v19 }
 0x112   : > { %5615 = vmatprep.subr.msk.bf16.mxu0 %vm5607_vm12, %v5614_v31  ;;  %v5791_v31 = vld [vmem:[%s9530_s2 + $0x30] sm:$0xff]  ;;  %vm1848_vm12 = vcmask 244736  }
 0x115   : > { %5618 = vmatpush1.bf16.msk.msra.mxu0 %vm5610_vm14, %v5617_v32  ;;  %v5792_v32 = vld [vmem:[%s9530_s2 + $0x38] sm:$0xff]  ;;  %vm1816_vm14 = vcmp.lt.s32.totalorder %v7554_v62, 14 }
 0x117   : > { %v1476_v39 = vpop.permute.xlu0 %1475  ;;  %v1481_v41 = vpop.permute.xlu1 %1480 }
 0x118   : > { %5600 = vmatmul.mubr.msk.bf16.gmra.mrb[4].mxu0 %vm386_vm9, %v7347_v33 }
 0x119   : > { %1440 = vmatprep.mubr.bf16.mxu0 %v7422_v19 }
 0x11b   : > { %v1486_v57 = vpop.permute.xlu1 %1485 }
 0x11d   : > { %v1491_v0 = vpop.permute.xlu0 %1490 }
 0x120   : > { %5619 = vmatmul.mubr.msk.bf16.vlgmr.msra.gmra.mrb[0].mxu0 %vm386_vm9, %v7348_v6 }
 0x121   : > { %1450 = vmatprep.mubr.bf16.mxu0 %v7422_v19 }
 0x128   : > { %5620 = vmatmul.mubr.msk.bf16.gmra.mrb[4].mxu0 %vm386_vm9, %v7349_v15 }
 0x129   : > { %3029 = vmatprep.mubr.bf16.mxu0 %v7422_v19 }
 0x16c   : > { %v6674_v33 = vpop.permute.xlu1 %6673 }
 0x16d   : > { %v6676_v15 = vunpack.i.h.bf16 %v6674_v33  ;;  %v6675_v34 = vunpack.i.l.bf16 %v6674_v33 }
 0x1f3   : > { %v1442_v40 = vpop.f32.mrb[0].mxu0 }
 0x1f4   : > { %v1493_v42 = vadd.f32 %v1476_v39, %v1442_v40  ;;  %v1444_v43 = vpop.f32.mrb[1].mxu0 }
 0x1f5   : > { %v1494_v44 = vadd.f32 %v1476_v39, %v1444_v43  ;;  %v1446_v46 = vpop.f32.mrb[2].mxu0 }
 0x1f6   : > { %v7952_v47 = vmax.f32 %v1493_v42, 0.0  ;;  %v1495_v48 = vadd.f32 %v1481_v41, %v1446_v46  ;;  %v1448_v49 = vpop.f32.mrb[3].mxu0 }
 0x1f7   : > { %v7954_v50 = vmax.f32 %v1494_v44, 0.0  ;;  %v1496_v51 = vadd.f32 %v1481_v41, %v1448_v49 }
 0x1f8   : > { %v7956_v52 = vmax.f32 %v1495_v48, 0.0 }
 0x1f9   : > { %v7958_v53 = vmax.f32 %v1496_v51, 0.0  ;;  %v6677_v54 = vpack.i.bf16 %v7954_v50, %v7952_v47  ;;  %v6792_v27 = vpack.i.bf16 %v2186_v25, %v7954_v50 }
 0x1fa   : > { %v7964_v55 = vpack.i.bf16 %v7956_v52, %v7952_v47  ;;  %v2103_v56 = vpack.c.bf16 %v7956_v52, %v7952_v47 }
 0x1fb   : > { %v1452_v58 = vpop.f32.mrb[4].mxu0  ;;  %6678 = vrot.lane.b32.xlu1 %v6677_v54, %s7430_s26  ;;  %v6682_v59 = vpack.i.bf16 %v7958_v53, %v7956_v52  ;;  %v2104_v60 = vpack.c.bf16 %v7958_v53, %v7954_v50  ;;  %v6797_v28 = vpack.i.bf16 %v2189_v26, %v7958_v53 }
 0x1fc   : > { %v1497_v61 = vadd.f32 %v1486_v57, %v1452_v58  ;;  %v1454_v63 = vpop.f32.mrb[5].mxu0 }
 0x1fd   : > { %v1498_v1 = vadd.f32 %v1486_v57, %v1454_v63  ;;  %v1456_v2 = vpop.f32.mrb[6].mxu0  ;;  %6683 = vrot.lane.b32.xlu0 %v6682_v59, %s7430_s26 }
 0x1fe   : > { %v7974_v4 = vmax.f32 %v1497_v61, 0.0  ;;  %v1499_v8 = vadd.f32 %v1491_v0, %v1456_v2  ;;  %v1458_v11 = vpop.f32.mrb[7].mxu0 }
 0x1ff   : > { %v7976_v12 = vmax.f32 %v1498_v1, 0.0  ;;  %v1500_v13 = vadd.f32 %v1491_v0, %v1458_v11 }
 0x200   : > { %v7978_v14 = vmax.f32 %v1499_v8, 0.0 }
 0x201   : > { %v7980_v20 = vmax.f32 %v1500_v13, 0.0  ;;  %v6687_v21 = vpack.i.bf16 %v7976_v12, %v7974_v4  ;;  %v6807_v3 = vpack.i.bf16 %v2192_v29, %v7976_v12  ;;  %v7350_v29 = vld [vmem:[%s9529_s1 + $0xa0] sm:$0xff]  }
 0x202   : > { %v7986_v22 = vpack.i.bf16 %v7978_v14, %v7974_v4  ;;  %v2105_v23 = vpack.c.bf16 %v7978_v14, %v7974_v4 }
 0x203   : > { %6688 = vrot.lane.b32.xlu0 %v6687_v21, %s7430_s26  ;;  %v6692_v5 = vpack.i.bf16 %v7980_v20, %v7978_v14  ;;  %v2106_v24 = vpack.c.bf16 %v7980_v20, %v7976_v12  ;;  %v6812_v7 = vpack.i.bf16 %v2195_v30, %v7980_v20 }
 0x205   : > { %6693 = vrot.lane.b32.xlu1 %v6692_v5, %s7430_s26 }
 0x207   : > { %6698 = vrot.lane.b32.xlu0 %v6697_v10, %s7430_s26 }
 0x209   : > { %6703 = vrot.lane.b32.xlu1 %v6677_v54, %s7431_s27 }
 0x20b   : > { %6708 = vrot.lane.b32.xlu0 %v6682_v59, %s7431_s27 }
 0x20d   : > { %6713 = vrot.lane.b32.xlu1 %v7948_v38, %s7431_s27 }
 0x20f   : > { %6718 = vrot.lane.b32.xlu0 %v6687_v21, %s7431_s27 }
 0x211   : > { %6723 = vrot.lane.b32.xlu1 %v6692_v5, %s7431_s27 }
 0x213   : > { %6728 = vrot.lane.b32.xlu0 %v6697_v10, %s7431_s27 }
 0x215   : > { %6733 = vrot.lane.b32.xlu1 %v6677_v54, %s7432_s28 }
 0x217   : > { %6738 = vrot.lane.b32.xlu0 %v6682_v59, %s7432_s28 }
 0x219   : > { %6743 = vrot.lane.b32.xlu1 %v7948_v38, %s7432_s28 }
 0x21b   : > { %6748 = vrot.lane.b32.xlu0 %v6687_v21, %s7432_s28 }
 0x21d   : > { %6753 = vrot.lane.b32.xlu1 %v6692_v5, %s7432_s28 }
 0x21f   : > { %6758 = vrot.lane.b32.xlu0 %v6697_v10, %s7432_s28 }
 0x221   : > { %6763 = vrot.lane.b32.xlu1 %v6677_v54, %s7433_s29 }
 0x223   : > { %6768 = vrot.lane.b32.xlu0 %v6682_v59, %s7433_s29 }
 0x225   : > { %6773 = vrot.lane.b32.xlu1 %v7948_v38, %s7433_s29 }
 0x227   : > { %6778 = vrot.lane.b32.xlu0 %v6687_v21, %s7433_s29 }
 0x229   : > { %6783 = vrot.lane.b32.xlu1 %v6692_v5, %s7433_s29 }
 0x22b   : > { %6788 = vrot.lane.b32.xlu0 %v6697_v10, %s7433_s29  ;;  %s7443_s29 = smov 8  }
 0x22d   : > { %6793 = vrot.lane.b32.xlu1 %v6792_v27, %s7434_s30 }
 0x22f   : > { %6798 = vrot.lane.b32.xlu0 %v6797_v28, %s7434_s30 }
 0x231   : > { %6803 = vrot.lane.b32.xlu1 %v7964_v55, %s7434_s30 }
 0x233   : > { %6808 = vrot.lane.b32.xlu0 %v6807_v3, %s7434_s30 }
 0x235   : > { %6813 = vrot.lane.b32.xlu1 %v6812_v7, %s7434_s30 }
 0x237   : > { %6818 = vrot.lane.b32.xlu0 %v7986_v22, %s7434_s30  ;;  %s7438_s30 = smov 64  }
 0x239   : > { %6823 = vrot.lane.b32.xlu1 %v6792_v27, %s7435_s4 }
 0x23b   : > { %6828 = vrot.lane.b32.xlu0 %v6797_v28, %s7435_s4 }
 0x23d   : > { %6833 = vrot.lane.b32.xlu1 %v7964_v55, %s7435_s4 }
 0x23f   : > { %6838 = vrot.lane.b32.xlu0 %v6807_v3, %s7435_s4 }
 0x241   : > { %6843 = vrot.lane.b32.xlu1 %v6812_v7, %s7435_s4 }
 0x243   : > { %6848 = vrot.lane.b32.xlu0 %v7986_v22, %s7435_s4  ;;  %s7440_s4 = smov 60  }
 0x245   : > { %6853 = vrot.lane.b32.xlu1 %v6792_v27, %s7436_s5 }
 0x247   : > { %6858 = vrot.lane.b32.xlu0 %v6797_v28, %s7436_s5 }
 0x249   : > { %6863 = vrot.lane.b32.xlu1 %v7964_v55, %s7436_s5 }
 0x24b   : > { %6868 = vrot.lane.b32.xlu0 %v6807_v3, %s7436_s5 }
 0x24d   : > { %6873 = vrot.lane.b32.xlu1 %v6812_v7, %s7436_s5 }
 0x24f   : > { %6878 = vrot.lane.b32.xlu0 %v7986_v22, %s7436_s5  ;;  %s7441_s5 = smov 4  }
 0x251   : > { %6883 = vrot.lane.b32.xlu1 %v6792_v27, %s7437_s6 }
 0x253   : > { %6888 = vrot.lane.b32.xlu0 %v6797_v28, %s7437_s6 }
 0x255   : > { %6893 = vrot.lane.b32.xlu1 %v7964_v55, %s7437_s6 }
 0x257   : > { %6898 = vrot.lane.b32.xlu0 %v6807_v3, %s7437_s6 }
 0x259   : > { %6903 = vrot.lane.b32.xlu1 %v6812_v7, %s7437_s6 }
 0x25b   : > { %6908 = vrot.lane.b32.xlu0 %v7986_v22, %s7437_s6  ;;  %s7442_s6 = smov 124  }
 0x25d   : > { %2777 = vperm.xlu1 %6671, %v5789_v9  }
 0x25f   : > { %2782 = vperm.xlu0 %6670, %v5790_v16  }
 0x261   : > { %2787 = vperm.xlu1 %6671, %v5791_v31  }
 0x263   : > { %2792 = vperm.xlu0 %6670, %v5792_v32  }
 0x26d   : > { %v6679_v6 = vpop.permute.xlu1 %6678 }
 0x26e   : > { %v6681_v37 = vunpack.i.h.bf16 %v6679_v6  ;;  %v6680_v38 = vunpack.i.l.bf16 %v6679_v6 }
 0x26f   : > { %v6684_v39 = vpop.permute.xlu0 %6683 }
 0x270   : > { %v6686_v40 = vunpack.i.h.bf16 %v6684_v39  ;;  %v6685_v41 = vunpack.i.l.bf16 %v6684_v39  ;;  %v1646_v42 = vsel %vm386_vm9, %v6680_v38, %v6681_v37  ;;  %v1645_v46 = vsel %vm386_vm9, %v6675_v34, %v6680_v38 }
 0x272   : > { %v1648_v43 = vsel %vm386_vm9, %v6685_v41, %v6686_v40  ;;  %v1647_v48 = vsel %vm386_vm9, %v6676_v15, %v6685_v41 }
 0x273   : > { %v5632_v49 = vpack.c.bf16 %v1648_v43, %v1646_v42  ;;  %v5635_v54 = vpack.c.bf16 %v1647_v48, %v1645_v46 }
 0x275   : > { %5633 = vmatprep.subr.msk.bf16.mxu1 %vm8031_vm1, %v5632_v49  ;;  %v6689_v55 = vpop.permute.xlu0 %6688  ;;  %v7351_v49 = vld [vmem:[%s9529_s1 + $0xa8] sm:$0xff]  }
 0x276   : > { %v6691_v57 = vunpack.i.h.bf16 %v6689_v55  ;;  %v6690_v58 = vunpack.i.l.bf16 %v6689_v55  ;;  %5636 = vmatpush1.bf16.msk.msra.mxu1 %vm8040_vm3, %v5635_v54 }
 0x277   : > { %v6694_v59 = vpop.permute.xlu1 %6693 }
 0x278   : > { %v6696_v61 = vunpack.i.h.bf16 %v6694_v59  ;;  %v6695_v63 = vunpack.i.l.bf16 %v6694_v59  ;;  %v1650_v1 = vsel %vm386_vm9, %v6690_v58, %v6691_v57 }
 0x279   : > { %v6699_v0 = vpop.permute.xlu0 %6698 }
 0x27a   : > { %v1652_v2 = vsel %vm386_vm9, %v6695_v63, %v6696_v61  ;;  %v6701_v8 = vunpack.i.h.bf16 %v6699_v0  ;;  %v6700_v11 = vunpack.i.l.bf16 %v6699_v0 }
 0x27b   : > { %v6704_v13 = vpop.permute.xlu1 %6703  ;;  %v5638_v17 = vpack.c.bf16 %v1652_v2, %v1650_v1 }
 0x27c   : > { %v1649_v18 = vsel %vm386_vm9, %v6700_v11, %v6690_v58  ;;  %v1651_v21 = vsel %vm386_vm9, %v6701_v8, %v6695_v63  ;;  %v6706_v22 = vunpack.i.h.bf16 %v6704_v13  ;;  %v6705_v5 = vunpack.i.l.bf16 %v6704_v13 }
 0x27d   : > { %v6709_v10 = vpop.permute.xlu0 %6708  ;;  %5639 = vmatprep.subr.msk.bf16.mxu1 %vm8031_vm1, %v5638_v17  ;;  %v5641_v25 = vpack.c.bf16 %v1651_v21, %v1649_v18  ;;  %vm8137_vm1 = vmand %vm1537_vm15, %vm1816_vm14 }
 0x27e   : > { %v6711_v27 = vunpack.i.h.bf16 %v6709_v10  ;;  %v6710_v28 = vunpack.i.l.bf16 %v6709_v10  ;;  %v1585_v7 = vsel %vm1583_vm4, %v6705_v5, %v6706_v22  ;;  %vm5670_vm15 = vmpackc.low %vm8137_vm1, %vm8137_vm1  ;;  %vm2347_vm1 = vcmp.lt.s32.totalorder %v7529_v36, 14 }
 0x27f   : > { %v6714_v30 = vpop.permute.xlu1 %6713  ;;  %5642 = vmatpush1.bf16.msk.msra.mxu1 %vm8040_vm3, %v5641_v25  ;;  %vm1987_vm3 = vcmask 15360  }
 0x280   : > { %v1587_v9 = vsel %vm1583_vm4, %v6710_v28, %v6711_v27  ;;  %v6716_v16 = vunpack.i.h.bf16 %v6714_v30  ;;  %v6715_v31 = vunpack.i.l.bf16 %v6714_v30 }
 0x281   : > { %v6719_v32 = vpop.permute.xlu0 %6718  ;;  %v5648_v33 = vpack.c.bf16 %v1587_v9, %v1585_v7 }
 0x282   : > { %v1586_v6 = vsel %vm1583_vm4, %v6716_v16, %v6710_v28  ;;  %v1584_v15 = vsel %vm1583_vm4, %v6715_v31, %v6705_v5  ;;  %v6721_v34 = vunpack.i.h.bf16 %v6719_v32  ;;  %v6720_v37 = vunpack.i.l.bf16 %v6719_v32  ;;  %5643 = vmatmul.mubr.msk.bf16.vlgmr.msra.gmra.mrb[0].mxu1 %vm386_vm9, %v7350_v29  ;;  %v7352_v28 = vld [vmem:[%s9529_s1 + $0x90] sm:$0xff]  }
 0x283   : > { %v5651_v38 = vpack.c.bf16 %v1586_v6, %v1584_v15  ;;  %v6724_v39 = vpop.permute.xlu1 %6723  ;;  %5649 = vmatprep.subr.msk.bf16.mxu1 %vm5647_vm7, %v5648_v33  ;;  %1736 = vmatprep.mubr.bf16.mxu1 %v7422_v19 }
 0x284   : > { %v6726_v40 = vunpack.i.h.bf16 %v6724_v39  ;;  %v6725_v41 = vunpack.i.l.bf16 %v6724_v39  ;;  %v1589_v43 = vsel %vm1583_vm4, %v6720_v37, %v6721_v34 }
 0x285   : > { %v6729_v42 = vpop.permute.xlu0 %6728  ;;  %5652 = vmatpush1.bf16.msk.msra.mxu1 %vm5650_vm10, %v5651_v38 }
 0x286   : > { %v1591_v44 = vsel %vm1583_vm4, %v6725_v41, %v6726_v40  ;;  %v6731_v46 = vunpack.i.h.bf16 %v6729_v42  ;;  %v6730_v48 = vunpack.i.l.bf16 %v6729_v42 }
 0x287   : > { %v6734_v51 = vpop.permute.xlu1 %6733  ;;  %v5654_v54 = vpack.c.bf16 %v1591_v44, %v1589_v43  ;;  %v7353_v44 = vld [vmem:[%s9529_s1 + $0x98] sm:$0xff]  }
 0x288   : > { %v1588_v55 = vsel %vm1583_vm4, %v6730_v48, %v6720_v37  ;;  %v1590_v57 = vsel %vm1583_vm4, %v6731_v46, %v6725_v41  ;;  %v6736_v58 = vunpack.i.h.bf16 %v6734_v51  ;;  %v6735_v59 = vunpack.i.l.bf16 %v6734_v51  ;;  %vm8183_vm4 = vmpackc.low %vm1540_vm5, %vm1540_vm5 }
 0x289   : > { %v5657_v61 = vpack.c.bf16 %v1590_v57, %v1588_v55  ;;  %v6739_v63 = vpop.permute.xlu0 %6738  ;;  %5655 = vmatprep.subr.msk.bf16.mxu1 %vm5647_vm7, %v5654_v54  ;;  %vm8231_vm7 = vmpackc.low %vm1817_vm11, %vm1817_vm11 }
 0x28a   : > { %v6741_v1 = vunpack.i.h.bf16 %v6739_v63  ;;  %v6740_v2 = vunpack.i.l.bf16 %v6739_v63  ;;  %5644 = vmatmul.mubr.msk.bf16.gmra.mrb[4].mxu1 %vm386_vm9, %v7351_v49  ;;  %v1850_v11 = vsel %vm1848_vm12, %v6735_v59, %v6736_v58 }
 0x28b   : > { %v6744_v8 = vpop.permute.xlu1 %6743  ;;  %5658 = vmatpush1.bf16.msk.msra.mxu1 %vm5650_vm10, %v5657_v61  ;;  %1795 = vmatprep.mubr.bf16.mxu1 %v7422_v19  ;;  %vm2348_vm10 = vcmp.lt.s32.totalorder %v7527_v35, 14 }
 0x28c   : > { %v1852_v13 = vsel %vm1848_vm12, %v6740_v2, %v6741_v1  ;;  %v6746_v17 = vunpack.i.h.bf16 %v6744_v8  ;;  %v6745_v18 = vunpack.i.l.bf16 %v6744_v8 }
 0x28d   : > { %v6749_v21 = vpop.permute.xlu0 %6748  ;;  %v5668_v22 = vpack.c.bf16 %v1852_v13, %v1850_v11 }
 0x28e   : > { %v1851_v10 = vsel %vm1848_vm12, %v6746_v17, %v6740_v2  ;;  %v1849_v25 = vsel %vm1848_vm12, %v6745_v18, %v6735_v59  ;;  %v6751_v26 = vunpack.i.h.bf16 %v6749_v21  ;;  %v6750_v27 = vunpack.i.l.bf16 %v6749_v21  ;;  %v7354_v18 = vld [vmem:[%s9529_s1 + $0xb0] sm:$0xff]  }
 0x28f   : > { %v5671_v29 = vpack.c.bf16 %v1851_v10, %v1849_v25  ;;  %v6754_v30 = vpop.permute.xlu1 %6753  ;;  %5669 = vmatprep.subr.msk.bf16.mxu1 %vm5667_vm0, %v5668_v22 }
 0x290   : > { %v6756_v3 = vunpack.i.h.bf16 %v6754_v30  ;;  %v6755_v7 = vunpack.i.l.bf16 %v6754_v30  ;;  %v1854_v16 = vsel %vm1848_vm12, %v6750_v27, %v6751_v26  ;;  %v7355_v30 = vld [vmem:[%s9529_s1 + $0xb8] sm:$0xff]  }
 0x291   : > { %v6759_v9 = vpop.permute.xlu0 %6758 }
 0x292   : > { %v1856_v31 = vsel %vm1848_vm12, %v6755_v7, %v6756_v3  ;;  %v6761_v32 = vunpack.i.h.bf16 %v6759_v9  ;;  %v6760_v33 = vunpack.i.l.bf16 %v6759_v9  ;;  %5659 = vmatmul.mubr.msk.bf16.vlgmr.msra.gmra.mrb[0].mxu1 %vm386_vm9, %v7352_v28  ;;  %v7356_v9 = vld [vmem:[%s9529_s1 + $0xc0] sm:$0xff]  }
 0x293   : > { %5672 = vmatpush1.bf16.msk.msra.mxu1 %vm5670_vm15, %v5671_v29  ;;  %v6764_v6 = vpop.permute.xlu1 %6763  ;;  %v5674_v15 = vpack.c.bf16 %v1856_v31, %v1854_v16  ;;  %1805 = vmatprep.mubr.bf16.mxu1 %v7422_v19 }
 0x294   : > { %v1853_v34 = vsel %vm1848_vm12, %v6760_v33, %v6750_v27  ;;  %v1855_v37 = vsel %vm1848_vm12, %v6761_v32, %v6755_v7  ;;  %v6766_v38 = vunpack.i.h.bf16 %v6764_v6  ;;  %v6765_v39 = vunpack.i.l.bf16 %v6764_v6  ;;  %vm8255_vm12 = vmpackc.low %vm1816_vm14, %vm1816_vm14 }
 0x295   : > { %v5677_v40 = vpack.c.bf16 %v1855_v37, %v1853_v34  ;;  %v6769_v41 = vpop.permute.xlu0 %6768  ;;  %5675 = vmatprep.subr.msk.bf16.mxu1 %vm5667_vm0, %v5674_v15  ;;  %vm8267_vm0 = vmand %vm2348_vm10, %vm1540_vm5 }
 0x296   : > { %v6771_v42 = vunpack.i.h.bf16 %v6769_v41  ;;  %v6770_v43 = vunpack.i.l.bf16 %v6769_v41  ;;  %v1989_v48 = vsel %vm1987_vm3, %v6765_v39, %v6766_v38  ;;  %vm5735_vm5 = vmpackc.low %vm8267_vm0, %vm8267_vm0  ;;  %vm2839_vm0 = vcmp.ge.s32.totalorder %v7529_v36, 4 }
 0x297   : > { %v6774_v46 = vpop.permute.xlu1 %6773  ;;  %5678 = vmatpush1.bf16.msk.msra.mxu1 %vm5670_vm15, %v5677_v40  ;;  %vm8298_vm15 = vmand %vm2347_vm1, %vm1539_vm2 }
 0x298   : > { %v1991_v49 = vsel %vm1987_vm3, %v6770_v43, %v6771_v42  ;;  %v6776_v57 = vunpack.i.h.bf16 %v6774_v46  ;;  %v6775_v58 = vunpack.i.l.bf16 %v6774_v46  ;;  %vm5738_vm2 = vmpackc.low %vm8298_vm15, %vm8298_vm15  ;;  %vm2842_vm15 = vcmp.ge.s32.totalorder %v7533_v45, 4 }
 0x299   : > { %v6779_v54 = vpop.permute.xlu0 %6778  ;;  %v5688_v55 = vpack.c.bf16 %v1991_v49, %v1989_v48 }
 0x29a   : > { %5660 = vmatmul.mubr.msk.bf16.gmra.mrb[4].mxu1 %vm386_vm9, %v7353_v44  ;;  %v6781_v0 = vunpack.i.h.bf16 %v6779_v54  ;;  %v6780_v1 = vunpack.i.l.bf16 %v6779_v54  ;;  %v1990_v8 = vsel %vm1987_vm3, %v6776_v57, %v6770_v43  ;;  %v1988_v11 = vsel %vm1987_vm3, %v6775_v58, %v6765_v39  ;;  %v7358_v57 = vld [vmem:[%s9529_s1 + $0xd0] sm:$0xff]  }
 0x29b   : > { %v6784_v59 = vpop.permute.xlu1 %6783  ;;  %5689 = vmatprep.subr.msk.bf16.mxu1 %vm8183_vm4, %v5688_v55  ;;  %1930 = vmatprep.mubr.bf16.mxu1 %v7422_v19  ;;  %v5691_v22 = vpack.c.bf16 %v1990_v8, %v1988_v11 }
 0x29c   : > { %v6786_v61 = vunpack.i.h.bf16 %v6784_v59  ;;  %v6785_v63 = vunpack.i.l.bf16 %v6784_v59  ;;  %v1993_v5 = vsel %vm1987_vm3, %v6780_v1, %v6781_v0 }
 0x29d   : > { %v6789_v2 = vpop.permute.xlu0 %6788 }
 0x29e   : > { %v6791_v13 = vunpack.i.h.bf16 %v6789_v2  ;;  %v6790_v17 = vunpack.i.l.bf16 %v6789_v2  ;;  %v1995_v21 = vsel %vm1987_vm3, %v6785_v63, %v6786_v61 }
 0x29f   : > { %v5694_v26 = vpack.c.bf16 %v1995_v21, %v1993_v5  ;;  %v6794_v28 = vpop.permute.xlu1 %6793 }
 0x2a0   : > { %v1992_v10 = vsel %vm1987_vm3, %v6790_v17, %v6780_v1  ;;  %v1994_v25 = vsel %vm1987_vm3, %v6791_v13, %v6785_v63  ;;  %v6796_v32 = vunpack.i.h.bf16 %v6794_v28  ;;  %v6795_v33 = vunpack.i.l.bf16 %v6794_v28 }
 0x2a1   : > { %v5697_v27 = vpack.c.bf16 %v1994_v25, %v1992_v10  ;;  %v6799_v29 = vpop.permute.xlu0 %6798  ;;  %vm2518_vm3 = vcmask 785408  }
 0x2a2   : > { %5679 = vmatmul.mubr.msk.bf16.vlgmr.msra.gmra.mrb[0].mxu1 %vm386_vm9, %v7354_v18  ;;  %v6801_v16 = vunpack.i.h.bf16 %v6799_v29  ;;  %v6800_v31 = vunpack.i.l.bf16 %v6799_v29  ;;  %v2238_v34 = vsel %vm2236_vm8, %v6795_v33, %v6796_v32 }
 0x2a3   : > { %5692 = vmatpush1.bf16.msk.msra.mxu1 %vm5690_vm6, %v5691_v22  ;;  %1940 = vmatprep.mubr.bf16.mxu1 %v7422_v19  ;;  %v6804_v3 = vpop.permute.xlu1 %6803 }
 0x2a4   : > { %5695 = vmatprep.subr.msk.bf16.mxu1 %vm8183_vm4, %v5694_v26  ;;  %v6806_v40 = vunpack.i.h.bf16 %v6804_v3  ;;  %v6805_v41 = vunpack.i.l.bf16 %v6804_v3  ;;  %vm8331_vm4 = vmpackc.low %vm2348_vm10, %vm2348_vm10 }
 0x2a5   : > { %v6809_v7 = vpop.permute.xlu0 %6808 }
 0x2a6   : > { %v6811_v44 = vunpack.i.h.bf16 %v6809_v7  ;;  %v6810_v46 = vunpack.i.l.bf16 %v6809_v7  ;;  %v2239_v48 = vsel %vm2236_vm8, %v6806_v40, %v6800_v31  ;;  %v2237_v49 = vsel %vm2236_vm8, %v6805_v41, %v6795_v33 }
 0x2a7   : > { %5698 = vmatpush1.bf16.msk.msra.mxu1 %vm5690_vm6, %v5697_v27  ;;  %v6814_v6 = vpop.permute.xlu1 %6813  ;;  %v5719_v0 = vpack.c.bf16 %v2239_v48, %v2237_v49  ;;  %v7359_v27 = vld [vmem:[%s9529_s1 + $0xd8] sm:$0xff]   ;;  %vm8356_vm6 = vmpackc.low %vm2347_vm1, %vm2347_vm1 }
 0x2a8   : > { %2123 = vmatprep.subr.bf16.mxu1 %v2104_v60  ;;  %v2240_v60 = vsel %vm2236_vm8, %v6800_v31, %v6801_v16  ;;  %v6816_v42 = vunpack.i.h.bf16 %v6814_v6  ;;  %v6815_v43 = vunpack.i.l.bf16 %v6814_v6  ;;  %v2242_v1 = vsel %vm2236_vm8, %v6810_v46, %v6811_v44 }
 0x2a9   : > { %v6819_v15 = vpop.permute.xlu0 %6818  ;;  %v5716_v38 = vpack.c.bf16 %v2240_v60, %v2238_v34  ;;  %v7360_v34 = vld [vmem:[%s9529_s1 + $0xe0] sm:$0xff]  }
 0x2aa   : > { %5680 = vmatmul.mubr.msk.bf16.gmra.mrb[4].mxu1 %vm386_vm9, %v7355_v30  ;;  %v6820_v51 = vunpack.i.l.bf16 %v6819_v15  ;;  %v2244_v58 = vsel %vm2236_vm8, %v6815_v43, %v6816_v42 }
 0x2ab   : > { %2069 = vmatprep.mubr.bf16.mxu1 %v7422_v19  ;;  %v6824_v39 = vpop.permute.xlu1 %6823  ;;  %v5722_v17 = vpack.c.bf16 %v2244_v58, %v2242_v1 }
 0x2ac   : > { %v6826_v2 = vunpack.i.h.bf16 %v6824_v39  ;;  %v6825_v8 = vunpack.i.l.bf16 %v6824_v39  ;;  %v2241_v11 = vsel %vm2236_vm8, %v6820_v51, %v6810_v46 }
 0x2ae   : > { %v2381_v25 = vsel %vm2379_vm13, %v6825_v8, %v6826_v2 }
 0x2af   : > { %v6834_v54 = vpop.permute.xlu1 %6833 }
 0x2b0   : > { %v6836_v28 = vunpack.i.h.bf16 %v6834_v54  ;;  %v6835_v29 = vunpack.i.l.bf16 %v6834_v54 }
 0x2b2   : > { %5699 = vmatmul.mubr.msk.bf16.vlgmr.msra.gmra.mrb[0].mxu1 %vm386_vm9, %v7356_v9  ;;  %v2380_v6 = vsel %vm2379_vm13, %v6835_v29, %v6825_v8 }
 0x2b3   : > { %2124 = vmatpush1.bf16.msra.mxu1 %v2103_v56  ;;  %2079 = vmatprep.mubr.bf16.mxu1 %v7422_v19  ;;  %v7357_v56 = vld [vmem:[%s9529_s1 + $0xc8] sm:$0xff]   ;;  %v6844_v22 = vpop.permute.xlu1 %6843 }
 0x2b4   : > { %2125 = vmatprep.subr.bf16.mxu1 %v2106_v24  ;;  %v6829_v24 = vpop.permute.xlu0 %6828  ;;  %v6846_v7 = vunpack.i.h.bf16 %v6844_v22  ;;  %v6845_v9 = vunpack.i.l.bf16 %v6844_v22 }
 0x2b5   : > { %v6831_v59 = vunpack.i.h.bf16 %v6829_v24  ;;  %v6830_v61 = vunpack.i.l.bf16 %v6829_v24 }
 0x2b6   : > { %v2387_v37 = vsel %vm2379_vm13, %v6845_v9, %v6846_v7 }
 0x2b7   : > { %2126 = vmatpush1.bf16.msra.mxu1 %v2105_v23  ;;  %v6821_v23 = vunpack.i.h.bf16 %v6819_v15  ;;  %v2383_v21 = vsel %vm2379_vm13, %v6830_v61, %v6831_v59  ;;  %v6854_v30 = vpop.permute.xlu1 %6853  ;;  %v2382_v33 = vsel %vm2379_vm13, %v6836_v28, %v6830_v61  ;;  %v7361_v59 = vld [vmem:[%s9529_s1 + $0xe8] sm:$0xff]  }
 0x2b8   : > { %5717 = vmatprep.subr.msk.bf16.mxu1 %vm8231_vm7, %v5716_v38  ;;  %v6839_v55 = vpop.permute.xlu0 %6838  ;;  %v5736_v26 = vpack.c.bf16 %v2383_v21, %v2381_v25  ;;  %v5739_v40 = vpack.c.bf16 %v2382_v33, %v2380_v6  ;;  %v6856_v42 = vunpack.i.h.bf16 %v6854_v30 }
 0x2b9   : > { %v2243_v13 = vsel %vm2236_vm8, %v6821_v23, %v6815_v43  ;;  %v6841_v16 = vunpack.i.h.bf16 %v6839_v55  ;;  %v6840_v31 = vunpack.i.l.bf16 %v6839_v55  ;;  %v6855_v43 = vunpack.i.l.bf16 %v6854_v30 }
 0x2ba   : > { %5700 = vmatmul.mubr.msk.bf16.gmra.mrb[4].mxu1 %vm386_vm9, %v7357_v56  ;;  %v5725_v10 = vpack.c.bf16 %v2243_v13, %v2241_v11  ;;  %vm2659_vm8 = vcmask 769024  }
 0x2bb   : > { %2155 = vmatprep.mubr.bf16.mxu1 %v7422_v19  ;;  %v6864_v39 = vpop.permute.xlu1 %6863  ;;  %v2385_v41 = vsel %vm2379_vm13, %v6840_v31, %v6841_v16  ;;  %v2520_v51 = vsel %vm2518_vm3, %v6855_v43, %v6856_v42 }
 0x2bc   : > { %v6849_v5 = vpop.permute.xlu0 %6848  ;;  %v5742_v48 = vpack.c.bf16 %v2387_v37, %v2385_v41  ;;  %v6866_v61 = vunpack.i.h.bf16 %v6864_v39  ;;  %v6865_v63 = vunpack.i.l.bf16 %v6864_v39  ;;  %v7363_v37 = vld [vmem:[%s9529_s1 + $0xf8] sm:$0xff]  }
 0x2bd   : > { %v6851_v15 = vunpack.i.h.bf16 %v6849_v5  ;;  %v6850_v60 = vunpack.i.l.bf16 %v6849_v5  ;;  %v7362_v5 = vld [vmem:[%s9529_s1 + $0xf0] sm:$0xff]  }
 0x2be   : > { %v2519_v18 = vsel %vm2518_vm3, %v6865_v63, %v6855_v43 }
 0x2bf   : > { %v2384_v44 = vsel %vm2379_vm13, %v6850_v60, %v6840_v31  ;;  %v2386_v46 = vsel %vm2379_vm13, %v6851_v15, %v6845_v9  ;;  %v6874_v55 = vpop.permute.xlu1 %6873  ;;  %vm2840_vm13 = vcmp.ge.s32.totalorder %v7527_v35, 4 }
 0x2c0   : > { %v6859_v3 = vpop.permute.xlu0 %6858  ;;  %v5745_v23 = vpack.c.bf16 %v2386_v46, %v2384_v44  ;;  %v6875_v1 = vunpack.i.l.bf16 %v6874_v55 }
 0x2c1   : > { %v6861_v38 = vunpack.i.h.bf16 %v6859_v3  ;;  %v6860_v56 = vunpack.i.l.bf16 %v6859_v3 }
 0x2c2   : > { %5707 = vmatmul.mubr.msk.bf16.vlgmr.msra.gmra.mrb[0].mxu1 %vm386_vm9, %v7358_v57 }
 0x2c3   : > { %5720 = vmatpush1.bf16.msk.msra.mxu1 %vm8255_vm12, %v5719_v0  ;;  %2165 = vmatprep.mubr.bf16.mxu1 %v7422_v19  ;;  %v2522_v49 = vsel %vm2518_vm3, %v6860_v56, %v6861_v38  ;;  %v6876_v0 = vunpack.i.h.bf16 %v6874_v55  ;;  %v6884_v2 = vpop.permute.xlu1 %6883 }
 0x2c4   : > { %5723 = vmatprep.subr.msk.bf16.mxu1 %vm8231_vm7, %v5722_v17  ;;  %v6869_v24 = vpop.permute.xlu0 %6868  ;;  %v5756_v58 = vpack.c.bf16 %v2522_v49, %v2520_v51  ;;  %v2521_v17 = vsel %vm2518_vm3, %v6866_v61, %v6860_v56  ;;  %v6886_v30 = vunpack.i.h.bf16 %v6884_v2  ;;  %v6885_v3 = vunpack.i.l.bf16 %v6884_v2  ;;  %vm8368_vm7 = vmand %vm2348_vm10, %vm1817_vm11  ;;  %v7364_v51 = vld [vmem:[%s9529_s1 + $0x100] sm:$0xff]   ;;  %v7367_v2 = vld [vmem:[%s9529_s1 + $0x118] sm:$0xff]  }
 0x2c5   : > { %v6871_v11 = vunpack.i.h.bf16 %v6869_v24  ;;  %v6870_v13 = vunpack.i.l.bf16 %v6869_v24  ;;  %v5759_v28 = vpack.c.bf16 %v2521_v17, %v2519_v18  ;;  %vm5775_vm11 = vmpackc.low %vm8368_vm7, %vm8368_vm7 }
 0x2c6   : > { %v2661_v15 = vsel %vm2659_vm8, %v6885_v3, %v6886_v30  ;;  %vm8398_vm10 = vmand %vm2347_vm1, %vm1816_vm14  ;;  %vm2947_vm14 = vcmask 523264  }
 0x2c7   : > { %5726 = vmatpush1.bf16.msk.msra.mxu1 %vm8255_vm12, %v5725_v10  ;;  %v2526_v10 = vsel %vm2518_vm3, %v6875_v1, %v6876_v0  ;;  %v2524_v29 = vsel %vm2518_vm3, %v6870_v13, %v6871_v11  ;;  %v6894_v16 = vpop.permute.xlu1 %6893  ;;  %vm5778_vm12 = vmpackc.low %vm8398_vm10, %vm8398_vm10  ;;  %v7365_v0 = vld [vmem:[%s9529_s1 + $0x108] sm:$0xff]   ;;  %v2830_v11 = vld [vmem:[#allocation2 + $0x38] sm:$0xff]  ;;  %vm3151_vm10 = vcmask 490496  }
 0x2c8   : > { %5737 = vmatprep.subr.msk.bf16.mxu1 %vm5735_vm5, %v5736_v26  ;;  %v6879_v57 = vpop.permute.xlu0 %6878  ;;  %v5762_v31 = vpack.c.bf16 %v2526_v10, %v2524_v29  ;;  %v6896_v56 = vunpack.i.h.bf16 %v6894_v16  ;;  %v6895_v39 = vunpack.i.l.bf16 %v6894_v16  ;;  %vm8592_vm1 = vmpackc.low %vm2839_vm0, %vm2839_vm0 }
 0x2c9   : > { %v6881_v21 = vunpack.i.h.bf16 %v6879_v57  ;;  %v6880_v22 = vunpack.i.l.bf16 %v6879_v57 }
 0x2ca   : > { %5708 = vmatmul.mubr.msk.bf16.gmra.mrb[4].mxu1 %vm386_vm9, %v7359_v27 }
 0x2cb   : > { %2318 = vmatprep.mubr.bf16.mxu1 %v7422_v19  ;;  %v2523_v7 = vsel %vm2518_vm3, %v6880_v22, %v6870_v13  ;;  %v2525_v9 = vsel %vm2518_vm3, %v6881_v21, %v6875_v1  ;;  %v6904_v38 = vpop.permute.xlu1 %6903  ;;  %v7366_v1 = vld [vmem:[%s9529_s1 + $0x110] sm:$0xff]   ;;  %vm2885_vm3 = vcmask 556032  }
 0x2cc   : > { %v6889_v8 = vpop.permute.xlu0 %6888  ;;  %v5765_v6 = vpack.c.bf16 %v2525_v9, %v2523_v7  ;;  %v6906_v24 = vunpack.i.h.bf16 %v6904_v38 }
 0x2cd   : > { %v6891_v25 = vunpack.i.h.bf16 %v6889_v8  ;;  %v6890_v26 = vunpack.i.l.bf16 %v6889_v8  ;;  %v2827_v8 = vld [vmem:[#allocation2 + $0x8] sm:$0xff] }
 0x2ce   : > { %v8436_v13 = vpack.i.bf16 %v2830_v11, %v2827_v8  ;;  %v7411_v8 = vld [vmem:[%s7476_s18 + $0x38] sm:$0xff] }
 0x2cf   : > { %v2663_v33 = vsel %vm2659_vm8, %v6890_v26, %v6891_v25  ;;  %v2662_v46 = vsel %vm2659_vm8, %v6896_v56, %v6890_v26  ;;  %v7404_v26 = vld [vmem:[%s7476_s18] sm:$0xff]  ;;  %v1516_v11 = vadd.f32 %v7411_v8, %v7980_v20 }
 0x2d0   : > { %v6899_v60 = vpop.permute.xlu0 %6898  ;;  %6913 = vrot.lane.b32.xlu1 %v8436_v13, %s7438_s30  ;;  %v1509_v27 = vadd.f32 %v7404_v26, %v7952_v47  ;;  %v3489_v26 = vld [vmem:[#allocation2 + $0x20] sm:$0xff] }
 0x2d1   : > { %v6901_v42 = vunpack.i.h.bf16 %v6899_v60  ;;  %v6900_v43 = vunpack.i.l.bf16 %v6899_v60 }
 0x2d2   : > { %5727 = vmatmul.mubr.msk.bf16.vlgmr.msra.gmra.mrb[0].mxu1 %vm386_vm9, %v7360_v34  ;;  %v5776_v34 = vpack.c.bf16 %v2663_v33, %v2661_v15  ;;  %v7407_v15 = vld [vmem:[%s7476_s18 + $0x18] sm:$0xff] }
 0x2d3   : > { %5740 = vmatpush1.bf16.msk.msra.mxu1 %vm5738_vm2, %v5739_v40  ;;  %2328 = vmatprep.mubr.bf16.mxu1 %v7422_v19  ;;  %v6905_v40 = vunpack.i.l.bf16 %v6904_v38  ;;  %v2665_v57 = vsel %vm2659_vm8, %v6900_v43, %v6901_v42  ;;  %v1512_v47 = vadd.f32 %v7407_v15, %v7958_v53  ;;  %v5963_v15 = vld [vmem:[%s9530_s2 + $0x50] sm:$0xff] }
 0x2d4   : > { %5743 = vmatprep.subr.msk.bf16.mxu1 %vm5735_vm5, %v5742_v48  ;;  %v6909_v41 = vpop.permute.xlu0 %6908  ;;  %v2660_v48 = vsel %vm2659_vm8, %v6895_v39, %v6885_v3  ;;  %v7405_v3 = vld [vmem:[%s7476_s18 + $0x8] sm:$0xff]  ;;  %vm8585_vm5 = vmpackc.low %vm2840_vm13, %vm2840_vm13 }
 0x2d5   : > { %v6911_v49 = vunpack.i.h.bf16 %v6909_v41  ;;  %v2667_v54 = vsel %vm2659_vm8, %v6905_v40, %v6906_v24  ;;  %v5779_v55 = vpack.c.bf16 %v2662_v46, %v2660_v48  ;;  %v1510_v7 = vadd.f32 %v7405_v3, %v7954_v50  ;;  %v7408_v48 = vld [vmem:[%s7476_s18 + $0x20] sm:$0xff] }
 0x2d6   : > { %v3495_v3 = vld [vmem:[#allocation2 + $0x80] sm:$0xff] }
 0x2d7   : > { %5746 = vmatpush1.bf16.msk.msra.mxu1 %vm5738_vm2, %v5745_v23  ;;  %v6910_v23 = vunpack.i.l.bf16 %v6909_v41  ;;  %v2666_v61 = vsel %vm2659_vm8, %v6911_v49, %v6905_v40  ;;  %v1513_v49 = vadd.f32 %v7408_v48, %v7974_v4  ;;  %v2836_v4 = vld [vmem:[#allocation2 + $0x98] sm:$0xff]  ;;  %vm2841_vm2 = vcmp.ge.s32.totalorder %v7554_v62, 4 }
 0x2d8   : > { %5757 = vmatprep.subr.msk.bf16.mxu1 %vm8331_vm4, %v5756_v58  ;;  %v5782_v58 = vpack.c.bf16 %v2667_v54, %v2665_v57 }
 0x2da   : > { %5728 = vmatmul.mubr.msk.bf16.gmra.mrb[4].mxu1 %vm386_vm9, %v7361_v59  ;;  %v2664_v59 = vsel %vm2659_vm8, %v6910_v23, %v6900_v43 }
 0x2db   : > { %2461 = vmatprep.mubr.bf16.mxu1 %v7422_v19  ;;  %v5785_v63 = vpack.c.bf16 %v2666_v61, %v2664_v59  ;;  %v7410_v61 = vld [vmem:[%s7476_s18 + $0x30] sm:$0xff] }
 0x2dc   : > { %v2778_v17 = vpop.permute.xlu1 %2777 }
 0x2e0   : > { %v2788_v53 = vpop.permute.xlu1 %2787 }
 0x2e2   : > { %5747 = vmatmul.mubr.msk.bf16.vlgmr.msra.gmra.mrb[0].mxu1 %vm386_vm9, %v7362_v5  ;;  %v2783_v5 = vpop.permute.xlu0 %2782 }
 0x2e3   : > { %5760 = vmatpush1.bf16.msk.msra.mxu1 %vm8356_vm6, %v5759_v28  ;;  %2471 = vmatprep.mubr.bf16.mxu1 %v7422_v19 }
 0x2e4   : > { %5763 = vmatprep.subr.msk.bf16.mxu1 %vm8331_vm4, %v5762_v31  ;;  %v7406_v31 = vld [vmem:[%s7476_s18 + $0x10] sm:$0xff]  ;;  %vm8612_vm4 = vmand %vm2840_vm13, %vm2842_vm15 }
 0x2e5   : > { %v1511_v32 = vadd.f32 %v7406_v31, %v7956_v52  ;;  %v5961_v31 = vld [vmem:[%s9530_s2 + $0x40] sm:$0xff]  ;;  %vm5819_vm8 = vmpackc.low %vm8612_vm4, %vm8612_vm4  ;;  %vm3290_vm4 = vcmask 31744  }
 0x2e6   : > { %v2793_v43 = vpop.permute.xlu0 %2792 }
 0x2e7   : > { %5766 = vmatpush1.bf16.msk.msra.mxu1 %vm8356_vm6, %v5765_v6  ;;  %vm8625_vm6 = vmand %vm2839_vm0, %vm2841_vm2 }
 0x2e8   : > { %5777 = vmatprep.subr.msk.bf16.mxu1 %vm5775_vm11, %v5776_v34  ;;  %vm5822_vm7 = vmpackc.low %vm8625_vm6, %vm8625_vm6 }
 0x2e9   : > { %vm8735_vm6 = vmpackc.low %vm2842_vm15, %vm2842_vm15 }
 0x2ea   : > { %5748 = vmatmul.mubr.msk.bf16.gmra.mrb[4].mxu1 %vm386_vm9, %v7363_v37 }
 0x2eb   : > { %2600 = vmatprep.mubr.bf16.mxu1 %v7422_v19 }
 0x2f2   : > { %5767 = vmatmul.mubr.msk.bf16.vlgmr.msra.gmra.mrb[0].mxu1 %vm386_vm9, %v7364_v51 }
 0x2f3   : > { %5780 = vmatpush1.bf16.msk.msra.mxu1 %vm5778_vm12, %v5779_v55  ;;  %2610 = vmatprep.mubr.bf16.mxu1 %v7422_v19  ;;  %v7409_v55 = vld [vmem:[%s7476_s18 + $0x28] sm:$0xff]  ;;  %s7439_s18 = smov 68  }
 0x2f4   : > { %5783 = vmatprep.subr.msk.bf16.mxu1 %vm5775_vm11, %v5782_v58  ;;  %v1514_v57 = vadd.f32 %v7409_v55, %v7976_v12  ;;  %vm3120_vm11 = vcmp.lt.s32.totalorder %v7533_v45, 12 }
 0x2f7   : > { %5786 = vmatpush1.bf16.msk.msra.mxu1 %vm5778_vm12, %v5785_v63  ;;  %v1515_v63 = vadd.f32 %v7410_v61, %v7978_v14  ;;  %vm8668_vm12 = vmand %vm2840_vm13, %vm3120_vm11 }
 0x2f8   : > { %vm5839_vm13 = vmpackc.low %vm8668_vm12, %vm8668_vm12 }
 0x2f9   : > { %vm8783_vm12 = vmpackc.low %vm3120_vm11, %vm3120_vm11 }
 0x2fa   : > { %5768 = vmatmul.mubr.msk.bf16.gmra.mrb[4].mxu1 %vm386_vm9, %v7365_v0 }
 0x2fb   : > { %2741 = vmatprep.mubr.bf16.mxu1 %v7422_v19 }
 0x302   : > { %5787 = vmatmul.mubr.msk.bf16.vlgmr.msra.gmra.mrb[0].mxu1 %vm386_vm9, %v7366_v1 }
 0x303   : > { %2751 = vmatprep.mubr.bf16.mxu1 %v7422_v19 }
 0x30a   : > { %5788 = vmatmul.mubr.msk.bf16.gmra.mrb[4].mxu1 %vm386_vm9, %v7367_v2  ;;  %v2833_v2 = vld [vmem:[#allocation2 + $0x68] sm:$0xff] }
 0x30b   : > { %4288 = vmatprep.mubr.bf16.mxu1 %v7422_v19 }
 0x3d5   : > { %v2743_v18 = vpop.f32.mrb[0].mxu1 }
 0x3d6   : > { %v2795_v21 = vadd.f32 %v2778_v17, %v2743_v18  ;;  %v2745_v22 = vpop.f32.mrb[1].mxu1 }
 0x3d7   : > { %v2796_v10 = vadd.f32 %v2778_v17, %v2745_v22  ;;  %v2747_v25 = vpop.f32.mrb[2].mxu1 }
 0x3d8   : > { %v8442_v28 = vmax.f32 %v2795_v21, 0.0  ;;  %v2797_v29 = vadd.f32 %v2783_v5, %v2747_v25  ;;  %v2749_v30 = vpop.f32.mrb[3].mxu1 }
 0x3d9   : > { %v8446_v9 = vmax.f32 %v2796_v10, 0.0  ;;  %v2798_v16 = vadd.f32 %v2783_v5, %v2749_v30  ;;  %v6937_v10 = vpack.i.bf16 %v2836_v4, %v2833_v2 }
 0x3da   : > { %v8451_v33 = vadd.f32 %v8442_v28, %v1509_v27  ;;  %v8453_v6 = vmax.f32 %v2797_v29, 0.0  ;;  %v3492_v27 = vld [vmem:[#allocation2 + $0x50] sm:$0xff] }
 0x3db   : > { %v8458_v60 = vadd.f32 %v8446_v9, %v1510_v7  ;;  %v8460_v34 = vmax.f32 %v2798_v16, 0.0  ;;  %v6917_v50 = vpack.i.bf16 %v8446_v9, %v8442_v28  ;;  %v7032_v29 = vpack.i.bf16 %v3489_v26, %v8446_v9  ;;  %v3498_v7 = vld [vmem:[#allocation2 + $0xb0] sm:$0xff] }
 0x3dc   : > { %v8465_v37 = vadd.f32 %v8453_v6, %v1511_v32  ;;  %v8469_v52 = vpack.i.bf16 %v8453_v6, %v8442_v28  ;;  %v3406_v38 = vpack.c.bf16 %v8453_v6, %v8442_v28  ;;  %v5962_v32 = vld [vmem:[%s9530_s2 + $0x48] sm:$0xff]  ;;  %v7375_v28 = vld [vmem:[%s9529_s1 + $0x158] sm:$0xff]  }
 0x3dd   : > { %v8474_v56 = vadd.f32 %v8460_v34, %v1512_v47  ;;  %v2753_v39 = vpop.f32.mrb[4].mxu1  ;;  %6918 = vrot.lane.b32.xlu1 %v6917_v50, %s7438_s30  ;;  %v6922_v24 = vpack.i.bf16 %v8460_v34, %v8453_v6  ;;  %v3407_v40 = vpack.c.bf16 %v8460_v34, %v8446_v9  ;;  %v7037_v30 = vpack.i.bf16 %v3492_v27, %v8460_v34  ;;  %v5964_v47 = vld [vmem:[%s9530_s2 + $0x58] sm:$0xff] }
 0x3de   : > { %v2799_v41 = vadd.f32 %v2788_v53, %v2753_v39  ;;  %v2755_v42 = vpop.f32.mrb[5].mxu1 }
 0x3df   : > { %v2800_v44 = vadd.f32 %v2788_v53, %v2755_v42  ;;  %v2757_v46 = vpop.f32.mrb[6].mxu1  ;;  %6923 = vrot.lane.b32.xlu0 %v6922_v24, %s7438_s30 }
 0x3e0   : > { %v8484_v23 = vmax.f32 %v2799_v41, 0.0  ;;  %v2801_v51 = vadd.f32 %v2793_v43, %v2757_v46  ;;  %v2759_v54 = vpop.f32.mrb[7].mxu1 }
 0x3e1   : > { %v8488_v58 = vmax.f32 %v2800_v44, 0.0  ;;  %v2802_v59 = vadd.f32 %v2793_v43, %v2759_v54 }
 0x3e2   : > { %v8493_v0 = vadd.f32 %v8484_v23, %v1513_v49  ;;  %v8495_v1 = vmax.f32 %v2801_v51, 0.0 }
 0x3e3   : > { %v8500_v17 = vadd.f32 %v8488_v58, %v1514_v57  ;;  %v8502_v12 = vmax.f32 %v2802_v59, 0.0  ;;  %v6927_v18 = vpack.i.bf16 %v8488_v58, %v8484_v23  ;;  %v7047_v16 = vpack.i.bf16 %v3495_v3, %v8488_v58 }
 0x3e4   : > { %v8507_v14 = vadd.f32 %v8495_v1, %v1515_v63  ;;  %v7057_v21 = vpack.i.bf16 %v8495_v1, %v8484_v23  ;;  %v3408_v22 = vpack.c.bf16 %v8495_v1, %v8484_v23 }
 0x3e5   : > { %v8514_v5 = vadd.f32 %v8502_v12, %v1516_v11  ;;  %6928 = vrot.lane.b32.xlu0 %v6927_v18, %s7438_s30  ;;  %v6932_v20 = vpack.i.bf16 %v8502_v12, %v8495_v1  ;;  %v3409_v25 = vpack.c.bf16 %v8502_v12, %v8488_v58 }
 0x3e7   : > { %6933 = vrot.lane.b32.xlu1 %v6932_v20, %s7438_s30 }
 0x3e9   : > { %6938 = vrot.lane.b32.xlu0 %v6937_v10, %s7438_s30 }
 0x3eb   : > { %6943 = vrot.lane.b32.xlu1 %v6917_v50, %s7439_s18 }
 0x3ed   : > { %6948 = vrot.lane.b32.xlu0 %v6922_v24, %s7439_s18 }
 0x3ef   : > { %6953 = vrot.lane.b32.xlu1 %v8436_v13, %s7439_s18 }
 0x3f1   : > { %6958 = vrot.lane.b32.xlu0 %v6927_v18, %s7439_s18 }
 0x3f3   : > { %6963 = vrot.lane.b32.xlu1 %v6932_v20, %s7439_s18 }
 0x3f5   : > { %6968 = vrot.lane.b32.xlu0 %v6937_v10, %s7439_s18 }
 0x3f7   : > { %6973 = vrot.lane.b32.xlu1 %v6917_v50, %s7440_s4 }
 0x3f9   : > { %6978 = vrot.lane.b32.xlu0 %v6922_v24, %s7440_s4 }
 0x3fb   : > { %6983 = vrot.lane.b32.xlu1 %v8436_v13, %s7440_s4 }
 0x3fd   : > { %6988 = vrot.lane.b32.xlu0 %v6927_v18, %s7440_s4 }
 0x3ff   : > { %6993 = vrot.lane.b32.xlu1 %v6932_v20, %s7440_s4 }
 0x401   : > { %6998 = vrot.lane.b32.xlu0 %v6937_v10, %s7440_s4 }
 0x403   : > { %7003 = vrot.lane.b32.xlu1 %v6917_v50, %s7441_s5  ;;  %v6914_v50 = vpop.permute.xlu1 %6913 }
 0x404   : > { %v6916_v53 = vunpack.i.h.bf16 %v6914_v50  ;;  %v6915_v39 = vunpack.i.l.bf16 %v6914_v50  ;;  %v7368_v50 = vld [vmem:[%s9529_s1 + $0x130] sm:$0xff]  }
 0x405   : > { %7008 = vrot.lane.b32.xlu0 %v6922_v24, %s7441_s5 }
 0x407   : > { %7013 = vrot.lane.b32.xlu1 %v8436_v13, %s7441_s5  ;;  %v7052_v13 = vpack.i.bf16 %v3498_v7, %v8502_v12 }
 0x409   : > { %7018 = vrot.lane.b32.xlu0 %v6927_v18, %s7441_s5 }
 0x40b   : > { %7023 = vrot.lane.b32.xlu1 %v6932_v20, %s7441_s5 }
 0x40d   : > { %7028 = vrot.lane.b32.xlu0 %v6937_v10, %s7441_s5 }
 0x40f   : > { %7033 = vrot.lane.b32.xlu1 %v7032_v29, %s7442_s6 }
 0x411   : > { %7038 = vrot.lane.b32.xlu0 %v7037_v30, %s7442_s6 }
 0x413   : > { %7043 = vrot.lane.b32.xlu1 %v8469_v52, %s7442_s6 }
 0x415   : > { %7048 = vrot.lane.b32.xlu0 %v7047_v16, %s7442_s6 }
 0x417   : > { %7053 = vrot.lane.b32.xlu1 %v7052_v13, %s7442_s6 }
 0x419   : > { %7058 = vrot.lane.b32.xlu0 %v7057_v21, %s7442_s6 }
 0x41b   : > { %7063 = vrot.lane.b32.xlu1 %v7032_v29, %s7439_s18 }
 0x41d   : > { %7068 = vrot.lane.b32.xlu0 %v7037_v30, %s7439_s18 }
 0x41f   : > { %7073 = vrot.lane.b32.xlu1 %v8469_v52, %s7439_s18 }
 0x421   : > { %7078 = vrot.lane.b32.xlu0 %v7047_v16, %s7439_s18 }
 0x423   : > { %7083 = vrot.lane.b32.xlu1 %v7052_v13, %s7439_s18 }
 0x425   : > { %7088 = vrot.lane.b32.xlu0 %v7057_v21, %s7439_s18 }
 0x427   : > { %7093 = vrot.lane.b32.xlu1 %v7032_v29, %s7438_s30 }
 0x429   : > { %7098 = vrot.lane.b32.xlu0 %v7037_v30, %s7438_s30 }
 0x42b   : > { %7103 = vrot.lane.b32.xlu1 %v8469_v52, %s7438_s30 }
 0x42d   : > { %7108 = vrot.lane.b32.xlu0 %v7047_v16, %s7438_s30 }
 0x42f   : > { %7113 = vrot.lane.b32.xlu1 %v7052_v13, %s7438_s30 }
 0x431   : > { %7118 = vrot.lane.b32.xlu0 %v7057_v21, %s7438_s30 }
 0x433   : > { %7123 = vrot.lane.b32.xlu1 %v7032_v29, %s7440_s4 }
 0x435   : > { %7128 = vrot.lane.b32.xlu0 %v7037_v30, %s7440_s4 }
 0x437   : > { %7133 = vrot.lane.b32.xlu1 %v8469_v52, %s7440_s4 }
 0x439   : > { %7138 = vrot.lane.b32.xlu0 %v7047_v16, %s7440_s4 }
 0x43b   : > { %7143 = vrot.lane.b32.xlu1 %v7052_v13, %s7440_s4 }
 0x43d   : > { %7148 = vrot.lane.b32.xlu0 %v7057_v21, %s7440_s4  ;;  %s7444_s4 = smov 120  }
 0x43f   : > { %4077 = vperm.xlu1 %6671, %v5961_v31  }
 0x441   : > { %4082 = vperm.xlu0 %6670, %v5962_v32  }
 0x443   : > { %4087 = vperm.xlu1 %6671, %v5963_v15  }
 0x445   : > { %4092 = vperm.xlu0 %6670, %v5964_v47  }
 0x44f   : > { %v6919_v52 = vpop.permute.xlu1 %6918 }
 0x450   : > { %v6921_v24 = vunpack.i.h.bf16 %v6919_v52  ;;  %v6920_v41 = vunpack.i.l.bf16 %v6919_v52 }
 0x451   : > { %v6924_v42 = vpop.permute.xlu0 %6923 }
 0x452   : > { %v6926_v43 = vunpack.i.h.bf16 %v6924_v42  ;;  %v6925_v44 = vunpack.i.l.bf16 %v6924_v42  ;;  %v2948_v46 = vsel %vm2947_vm14, %v6915_v39, %v6920_v41  ;;  %v2949_v48 = vsel %vm2947_vm14, %v6920_v41, %v6921_v24 }
 0x454   : > { %v2950_v49 = vsel %vm2947_vm14, %v6916_v53, %v6925_v44  ;;  %v2951_v51 = vsel %vm2947_vm14, %v6925_v44, %v6926_v43 }
 0x455   : > { %v5804_v55 = vpack.c.bf16 %v2951_v51, %v2949_v48  ;;  %v5807_v57 = vpack.c.bf16 %v2950_v49, %v2948_v46 }
 0x457   : > { %5805 = vmatprep.subr.msk.bf16.mxu0 %vm8585_vm5, %v5804_v55  ;;  %v6929_v61 = vpop.permute.xlu0 %6928 }
 0x458   : > { %v6931_v63 = vunpack.i.h.bf16 %v6929_v61  ;;  %v6930_v2 = vunpack.i.l.bf16 %v6929_v61  ;;  %5808 = vmatpush1.bf16.msk.msra.mxu0 %vm8592_vm1, %v5807_v57 }
 0x459   : > { %v6934_v4 = vpop.permute.xlu1 %6933 }
 0x45a   : > { %v6936_v8 = vunpack.i.h.bf16 %v6934_v4  ;;  %v6935_v11 = vunpack.i.l.bf16 %v6934_v4  ;;  %v2953_v21 = vsel %vm2947_vm14, %v6930_v2, %v6931_v63 }
 0x45b   : > { %v6939_v18 = vpop.permute.xlu0 %6938 }
 0x45c   : > { %v2955_v20 = vsel %vm2947_vm14, %v6935_v11, %v6936_v8  ;;  %v6941_v10 = vunpack.i.h.bf16 %v6939_v18  ;;  %v6940_v26 = vunpack.i.l.bf16 %v6939_v18 }
 0x45d   : > { %v5810_v27 = vpack.c.bf16 %v2955_v20, %v2953_v21  ;;  %v6944_v29 = vpop.permute.xlu1 %6943 }
 0x45e   : > { %v2952_v30 = vsel %vm2947_vm14, %v6940_v26, %v6930_v2  ;;  %v2954_v3 = vsel %vm2947_vm14, %v6941_v10, %v6935_v11  ;;  %v6946_v7 = vunpack.i.h.bf16 %v6944_v29  ;;  %v6945_v16 = vunpack.i.l.bf16 %v6944_v29  ;;  %v7369_v11 = vld [vmem:[%s9529_s1 + $0x138] sm:$0xff]  }
 0x45f   : > { %v5813_v13 = vpack.c.bf16 %v2954_v3, %v2952_v30  ;;  %v6949_v31 = vpop.permute.xlu0 %6948  ;;  %5811 = vmatprep.subr.msk.bf16.mxu0 %vm8585_vm5, %v5810_v27  ;;  %vm3119_vm5 = vcmp.lt.s32.totalorder %v7554_v62, 12 }
 0x460   : > { %v6951_v15 = vunpack.i.h.bf16 %v6949_v31  ;;  %v6950_v47 = vunpack.i.l.bf16 %v6949_v31  ;;  %v2887_v39 = vsel %vm2885_vm3, %v6945_v16, %v6946_v7 }
 0x461   : > { %v6954_v52 = vpop.permute.xlu1 %6953  ;;  %5814 = vmatpush1.bf16.msk.msra.mxu0 %vm8592_vm1, %v5813_v13  ;;  %vm8689_vm1 = vmand %vm2839_vm0, %vm3119_vm5 }
 0x462   : > { %v2889_v24 = vsel %vm2885_vm3, %v6950_v47, %v6951_v15  ;;  %v6956_v41 = vunpack.i.h.bf16 %v6954_v52  ;;  %v6955_v42 = vunpack.i.l.bf16 %v6954_v52  ;;  %vm5842_vm0 = vmpackc.low %vm8689_vm1, %vm8689_vm1 }
 0x463   : > { %v5820_v43 = vpack.c.bf16 %v2889_v24, %v2887_v39  ;;  %v6959_v44 = vpop.permute.xlu0 %6958  ;;  %vm8807_vm1 = vmpackc.low %vm3119_vm5, %vm3119_vm5 }
 0x464   : > { %v2888_v46 = vsel %vm2885_vm3, %v6956_v41, %v6950_v47  ;;  %v2886_v48 = vsel %vm2885_vm3, %v6955_v42, %v6945_v16  ;;  %v6961_v49 = vunpack.i.h.bf16 %v6959_v44  ;;  %v6960_v51 = vunpack.i.l.bf16 %v6959_v44  ;;  %5815 = vmatmul.mubr.msk.bf16.vlgmr.msra.gmra.mrb[8].mxu0 %vm386_vm9, %v7368_v50 }
 0x465   : > { %v5823_v54 = vpack.c.bf16 %v2888_v46, %v2886_v48  ;;  %v6964_v55 = vpop.permute.xlu1 %6963  ;;  %5821 = vmatprep.subr.msk.bf16.mxu0 %vm5819_vm8, %v5820_v43  ;;  %3039 = vmatprep.mubr.bf16.mxu0 %v7422_v19  ;;  %v7370_v43 = vld [vmem:[%s9529_s1 + $0x120] sm:$0xff]  }
 0x466   : > { %v6966_v57 = vunpack.i.h.bf16 %v6964_v55  ;;  %v6965_v59 = vunpack.i.l.bf16 %v6964_v55  ;;  %v2891_v63 = vsel %vm2885_vm3, %v6960_v51, %v6961_v49 }
 0x467   : > { %v6969_v61 = vpop.permute.xlu0 %6968  ;;  %5824 = vmatpush1.bf16.msk.msra.mxu0 %vm5822_vm7, %v5823_v54 }
 0x468   : > { %v2893_v2 = vsel %vm2885_vm3, %v6965_v59, %v6966_v57  ;;  %v6971_v4 = vunpack.i.h.bf16 %v6969_v61  ;;  %v6970_v8 = vunpack.i.l.bf16 %v6969_v61 }
 0x469   : > { %v5826_v18 = vpack.c.bf16 %v2893_v2, %v2891_v63  ;;  %v6974_v21 = vpop.permute.xlu1 %6973 }
 0x46a   : > { %v2890_v20 = vsel %vm2885_vm3, %v6970_v8, %v6960_v51  ;;  %v2892_v10 = vsel %vm2885_vm3, %v6971_v4, %v6965_v59  ;;  %v6976_v26 = vunpack.i.h.bf16 %v6974_v21  ;;  %v6975_v27 = vunpack.i.l.bf16 %v6974_v21 }
 0x46b   : > { %v5829_v29 = vpack.c.bf16 %v2892_v10, %v2890_v20  ;;  %v6979_v30 = vpop.permute.xlu0 %6978  ;;  %5827 = vmatprep.subr.msk.bf16.mxu0 %vm5819_vm8, %v5826_v18  ;;  %vm5862_vm8 = vmpackc.low %vm2841_vm2, %vm2841_vm2 }
 0x46c   : > { %v6981_v7 = vunpack.i.h.bf16 %v6979_v30  ;;  %v6980_v16 = vunpack.i.l.bf16 %v6979_v30  ;;  %5816 = vmatmul.mubr.msk.bf16.gmra.mrb[12].mxu0 %vm386_vm9, %v7369_v11  ;;  %v3153_v31 = vsel %vm3151_vm10, %v6975_v27, %v6976_v26  ;;  %v7371_v26 = vld [vmem:[%s9529_s1 + $0x128] sm:$0xff]  }
 0x46d   : > { %v6984_v13 = vpop.permute.xlu1 %6983  ;;  %5830 = vmatpush1.bf16.msk.msra.mxu0 %vm5822_vm7, %v5829_v29  ;;  %3098 = vmatprep.mubr.bf16.mxu0 %v7422_v19  ;;  %vm3539_vm7 = vcmask 1014784  }
 0x46e   : > { %v3155_v32 = vsel %vm3151_vm10, %v6980_v16, %v6981_v7  ;;  %v6986_v15 = vunpack.i.h.bf16 %v6984_v13  ;;  %v6985_v47 = vunpack.i.l.bf16 %v6984_v13 }
 0x46f   : > { %v5840_v50 = vpack.c.bf16 %v3155_v32, %v3153_v31  ;;  %v6989_v52 = vpop.permute.xlu0 %6988 }
 0x470   : > { %v3154_v39 = vsel %vm3151_vm10, %v6986_v15, %v6980_v16  ;;  %v3152_v24 = vsel %vm3151_vm10, %v6985_v47, %v6975_v27  ;;  %v6991_v41 = vunpack.i.h.bf16 %v6989_v52  ;;  %v6990_v42 = vunpack.i.l.bf16 %v6989_v52 }
 0x471   : > { %v5843_v44 = vpack.c.bf16 %v3154_v39, %v3152_v24  ;;  %v6994_v46 = vpop.permute.xlu1 %6993  ;;  %5841 = vmatprep.subr.msk.bf16.mxu0 %vm5839_vm13, %v5840_v50 }
 0x472   : > { %v6996_v48 = vunpack.i.h.bf16 %v6994_v46  ;;  %v6995_v49 = vunpack.i.l.bf16 %v6994_v46  ;;  %v3157_v54 = vsel %vm3151_vm10, %v6990_v42, %v6991_v41 }
 0x473   : > { %v6999_v51 = vpop.permute.xlu0 %6998 }
 0x474   : > { %v3159_v55 = vsel %vm3151_vm10, %v6995_v49, %v6996_v48  ;;  %v7001_v57 = vunpack.i.h.bf16 %v6999_v51  ;;  %v7000_v59 = vunpack.i.l.bf16 %v6999_v51  ;;  %5831 = vmatmul.mubr.msk.bf16.vlgmr.msra.gmra.mrb[8].mxu0 %vm386_vm9, %v7370_v43  ;;  %v7372_v43 = vld [vmem:[%s9529_s1 + $0x140] sm:$0xff]  }
 0x475   : > { %v5846_v61 = vpack.c.bf16 %v3159_v55, %v3157_v54  ;;  %5844 = vmatpush1.bf16.msk.msra.mxu0 %vm5842_vm0, %v5843_v44  ;;  %v7004_v63 = vpop.permute.xlu1 %7003  ;;  %3108 = vmatprep.mubr.bf16.mxu0 %v7422_v19 }
 0x476   : > { %v3156_v2 = vsel %vm3151_vm10, %v7000_v59, %v6990_v42  ;;  %v3158_v4 = vsel %vm3151_vm10, %v7001_v57, %v6995_v49  ;;  %v7006_v8 = vunpack.i.h.bf16 %v7004_v63  ;;  %v7005_v11 = vunpack.i.l.bf16 %v7004_v63 }
 0x477   : > { %v5849_v18 = vpack.c.bf16 %v3158_v4, %v3156_v2  ;;  %v7009_v21 = vpop.permute.xlu0 %7008  ;;  %5847 = vmatprep.subr.msk.bf16.mxu0 %vm5839_vm13, %v5846_v61  ;;  %v7373_v61 = vld [vmem:[%s9529_s1 + $0x148] sm:$0xff]   ;;  %v7374_v4 = vld [vmem:[%s9529_s1 + $0x150] sm:$0xff]   ;;  %vm3651_vm13 = vcmp.lt.s32.totalorder %v7527_v35, 12 }
 0x478   : > { %v7011_v20 = vunpack.i.h.bf16 %v7009_v21  ;;  %v7010_v10 = vunpack.i.l.bf16 %v7009_v21  ;;  %v3292_v29 = vsel %vm3290_vm4, %v7005_v11, %v7006_v8 }
 0x479   : > { %v7014_v27 = vpop.permute.xlu1 %7013  ;;  %5850 = vmatpush1.bf16.msk.msra.mxu0 %vm5842_vm0, %v5849_v18  ;;  %vm8819_vm0 = vmand %vm3651_vm13, %vm2842_vm15 }
 0x47a   : > { %v3294_v30 = vsel %vm3290_vm4, %v7010_v10, %v7011_v20  ;;  %v7016_v13 = vunpack.i.h.bf16 %v7014_v27  ;;  %v7015_v31 = vunpack.i.l.bf16 %v7014_v27  ;;  %vm5907_vm15 = vmpackc.low %vm8819_vm0, %vm8819_vm0  ;;  %vm4142_vm0 = vcmp.ge.s32.totalorder %v7533_v45, 8 }
 0x47b   : > { %v5860_v7 = vpack.c.bf16 %v3294_v30, %v3292_v29  ;;  %v7019_v16 = vpop.permute.xlu0 %7018 }
 0x47c   : > { %5832 = vmatmul.mubr.msk.bf16.gmra.mrb[12].mxu0 %vm386_vm9, %v7371_v26  ;;  %v7021_v50 = vunpack.i.h.bf16 %v7019_v16  ;;  %v7020_v52 = vunpack.i.l.bf16 %v7019_v16  ;;  %v3293_v39 = vsel %vm3290_vm4, %v7016_v13, %v7010_v10  ;;  %v3291_v24 = vsel %vm3290_vm4, %v7015_v31, %v7005_v11  ;;  %v7376_v13 = vld [vmem:[%s9529_s1 + $0x160] sm:$0xff]  }
 0x47d   : > { %v7024_v32 = vpop.permute.xlu1 %7023  ;;  %5861 = vmatprep.subr.msk.bf16.mxu0 %vm8735_vm6, %v5860_v7  ;;  %3233 = vmatprep.mubr.bf16.mxu0 %v7422_v19  ;;  %v5863_v46 = vpack.c.bf16 %v3293_v39, %v3291_v24 }
 0x47e   : > { %v7026_v15 = vunpack.i.h.bf16 %v7024_v32  ;;  %v7025_v47 = vunpack.i.l.bf16 %v7024_v32  ;;  %v3296_v48 = vsel %vm3290_vm4, %v7020_v52, %v7021_v50 }
 0x47f   : > { %v7029_v53 = vpop.permute.xlu0 %7028 }
 0x480   : > { %v7031_v41 = vunpack.i.h.bf16 %v7029_v53  ;;  %v7030_v42 = vunpack.i.l.bf16 %v7029_v53  ;;  %v3298_v44 = vsel %vm3290_vm4, %v7025_v47, %v7026_v15 }
 0x481   : > { %v5866_v49 = vpack.c.bf16 %v3298_v44, %v3296_v48  ;;  %v7034_v57 = vpop.permute.xlu1 %7033 }
 0x482   : > { %v3295_v51 = vsel %vm3290_vm4, %v7030_v42, %v7020_v52  ;;  %v3297_v54 = vsel %vm3290_vm4, %v7031_v41, %v7025_v47  ;;  %v7036_v18 = vunpack.i.h.bf16 %v7034_v57  ;;  %v7035_v21 = vunpack.i.l.bf16 %v7034_v57 }
 0x483   : > { %v5869_v55 = vpack.c.bf16 %v3297_v54, %v3295_v51  ;;  %v7039_v59 = vpop.permute.xlu0 %7038  ;;  %vm3650_vm4 = vcmp.lt.s32.totalorder %v7529_v36, 12 }
 0x484   : > { %5851 = vmatmul.mubr.msk.bf16.vlgmr.msra.gmra.mrb[8].mxu0 %vm386_vm9, %v7372_v43  ;;  %v7041_v8 = vunpack.i.h.bf16 %v7039_v59  ;;  %v7040_v11 = vunpack.i.l.bf16 %v7039_v59  ;;  %v3541_v34 = vsel %vm3539_vm7, %v7035_v21, %v7036_v18 }
 0x485   : > { %5864 = vmatpush1.bf16.msk.msra.mxu0 %vm5862_vm8, %v5863_v46  ;;  %3243 = vmatprep.mubr.bf16.mxu0 %v7422_v19  ;;  %v7044_v63 = vpop.permute.xlu1 %7043 }
 0x486   : > { %5867 = vmatprep.subr.msk.bf16.mxu0 %vm8735_vm6, %v5866_v49  ;;  %v3543_v9 = vsel %vm3539_vm7, %v7040_v11, %v7041_v8  ;;  %v7046_v58 = vunpack.i.h.bf16 %v7044_v63  ;;  %v7045_v12 = vunpack.i.l.bf16 %v7044_v63  ;;  %vm8850_vm6 = vmand %vm3650_vm4, %vm2841_vm2 }
 0x487   : > { %v7049_v2 = vpop.permute.xlu0 %7048  ;;  %v5888_v26 = vpack.c.bf16 %v3543_v9, %v3541_v34  ;;  %v7378_v34 = vld [vmem:[%s9529_s1 + $0x170] sm:$0xff]   ;;  %vm5910_vm2 = vmpackc.low %vm8850_vm6, %vm8850_vm6 }
 0x488   : > { %v7051_v29 = vunpack.i.h.bf16 %v7049_v2  ;;  %v7050_v30 = vunpack.i.l.bf16 %v7049_v2  ;;  %v3542_v3 = vsel %vm3539_vm7, %v7046_v58, %v7040_v11  ;;  %v3540_v23 = vsel %vm3539_vm7, %v7045_v12, %v7035_v21 }
 0x489   : > { %5870 = vmatpush1.bf16.msk.msra.mxu0 %vm5862_vm8, %v5869_v55  ;;  %v7054_v20 = vpop.permute.xlu1 %7053  ;;  %v5891_v50 = vpack.c.bf16 %v3542_v3, %v3540_v23  ;;  %v7377_v55 = vld [vmem:[%s9529_s1 + $0x168] sm:$0xff]   ;;  %vm8908_vm8 = vmpackc.low %vm3650_vm4, %vm3650_vm4 }
 0x48a   : > { %3426 = vmatprep.subr.bf16.mxu0 %v3407_v40  ;;  %v7055_v27 = vunpack.i.l.bf16 %v7054_v20  ;;  %v3545_v52 = vsel %vm3539_vm7, %v7050_v30, %v7051_v29 }
 0x48b   : > { %v7059_v10 = vpop.permute.xlu0 %7058 }
 0x48c   : > { %5852 = vmatmul.mubr.msk.bf16.gmra.mrb[12].mxu0 %vm386_vm9, %v7373_v61  ;;  %v7061_v1 = vunpack.i.h.bf16 %v7059_v10 }
 0x48d   : > { %3372 = vmatprep.mubr.bf16.mxu0 %v7422_v19  ;;  %v7064_v6 = vpop.permute.xlu1 %7063 }
 0x48e   : > { %v7066_v53 = vunpack.i.h.bf16 %v7064_v6  ;;  %v7065_v39 = vunpack.i.l.bf16 %v7064_v6  ;;  %v3546_v42 = vsel %vm3539_vm7, %v7061_v1, %v7055_v27 }
 0x490   : > { %v3683_v51 = vsel %vm2885_vm3, %v7065_v39, %v7066_v53 }
 0x491   : > { %v7074_v7 = vpop.permute.xlu1 %7073 }
 0x492   : > { %v7076_v57 = vunpack.i.h.bf16 %v7074_v7  ;;  %v7075_v59 = vunpack.i.l.bf16 %v7074_v7 }
 0x494   : > { %5871 = vmatmul.mubr.msk.bf16.vlgmr.msra.gmra.mrb[8].mxu0 %vm386_vm9, %v7374_v4 }
 0x495   : > { %3427 = vmatpush1.bf16.msra.mxu0 %v3406_v38  ;;  %3382 = vmatprep.mubr.bf16.mxu0 %v7422_v19  ;;  %v7069_v38 = vpop.permute.xlu0 %7068  ;;  %v7084_v46 = vpop.permute.xlu1 %7083 }
 0x496   : > { %3428 = vmatprep.subr.bf16.mxu0 %v3409_v25  ;;  %v7056_v25 = vunpack.i.h.bf16 %v7054_v20  ;;  %v7071_v32 = vunpack.i.h.bf16 %v7069_v38  ;;  %v7070_v15 = vunpack.i.l.bf16 %v7069_v38  ;;  %v7086_v2 = vunpack.i.h.bf16 %v7084_v46 }
 0x497   : > { %v7085_v4 = vunpack.i.l.bf16 %v7084_v46  ;;  %v3682_v20 = vsel %vm2885_vm3, %v7075_v59, %v7065_v39 }
 0x498   : > { %v3547_v31 = vsel %vm3539_vm7, %v7055_v27, %v7056_v25  ;;  %v3685_v44 = vsel %vm2885_vm3, %v7070_v15, %v7071_v32  ;;  %v3684_v21 = vsel %vm2885_vm3, %v7076_v57, %v7070_v15  ;;  %v7379_v32 = vld [vmem:[%s9529_s1 + $0x178] sm:$0xff]  }
 0x499   : > { %3429 = vmatpush1.bf16.msra.mxu0 %v3408_v22  ;;  %v7060_v22 = vunpack.i.l.bf16 %v7059_v10  ;;  %v7079_v16 = vpop.permute.xlu0 %7078  ;;  %v5894_v24 = vpack.c.bf16 %v3547_v31, %v3545_v52  ;;  %v5908_v54 = vpack.c.bf16 %v3685_v44, %v3683_v51  ;;  %v7094_v61 = vpop.permute.xlu1 %7093  ;;  %v3689_v40 = vsel %vm2885_vm3, %v7085_v4, %v7086_v2 }
 0x49a   : > { %5889 = vmatprep.subr.msk.bf16.mxu0 %vm8783_vm12, %v5888_v26  ;;  %v7081_v8 = vunpack.i.h.bf16 %v7079_v16  ;;  %v7080_v11 = vunpack.i.l.bf16 %v7079_v16  ;;  %v5911_v58 = vpack.c.bf16 %v3684_v21, %v3682_v20  ;;  %v7096_v25 = vunpack.i.h.bf16 %v7094_v61 }
 0x49b   : > { %v3544_v41 = vsel %vm3539_vm7, %v7060_v22, %v7050_v30  ;;  %v7095_v27 = vunpack.i.l.bf16 %v7094_v61  ;;  %vm8920_vm7 = vmand %vm3651_vm13, %vm3120_vm11 }
 0x49c   : > { %5872 = vmatmul.mubr.msk.bf16.gmra.mrb[12].mxu0 %vm386_vm9, %v7375_v28  ;;  %v5897_v49 = vpack.c.bf16 %v3546_v42, %v3544_v41  ;;  %v3687_v12 = vsel %vm2885_vm3, %v7080_v11, %v7081_v8  ;;  %vm8950_vm11 = vmand %vm3650_vm4, %vm3119_vm5  ;;  %vm4139_vm5 = vcmp.ge.s32.totalorder %v7529_v36, 8  ;;  %vm4185_vm4 = vcmask 64512  }
 0x49d   : > { %3458 = vmatprep.mubr.bf16.mxu0 %v7422_v19  ;;  %v7089_v48 = vpop.permute.xlu0 %7088  ;;  %v7104_v6 = vpop.permute.xlu1 %7103  ;;  %v5914_v29 = vpack.c.bf16 %v3689_v40, %v3687_v12  ;;  %v3821_v22 = vsel %vm2947_vm14, %v7095_v27, %v7096_v25  ;;  %v7381_v40 = vld [vmem:[%s9529_s1 + $0x188] sm:$0xff]  }
 0x49e   : > { %v7091_v10 = vunpack.i.h.bf16 %v7089_v48  ;;  %v7090_v9 = vunpack.i.l.bf16 %v7089_v48  ;;  %v7106_v15 = vunpack.i.h.bf16 %v7104_v6  ;;  %v7105_v47 = vunpack.i.l.bf16 %v7104_v6  ;;  %v7380_v48 = vld [vmem:[%s9529_s1 + $0x180] sm:$0xff]  }
 0x4a0   : > { %v3686_v30 = vsel %vm2885_vm3, %v7090_v9, %v7080_v11  ;;  %v3688_v3 = vsel %vm2885_vm3, %v7091_v10, %v7085_v4  ;;  %vm8883_vm3 = vmpackc.low %vm3651_vm13, %vm3651_vm13  ;;  %v3820_v43 = vsel %vm2947_vm14, %v7105_v47, %v7095_v27 }
 0x4a1   : > { %v7099_v63 = vpop.permute.xlu0 %7098  ;;  %v5917_v1 = vpack.c.bf16 %v3688_v3, %v3686_v30 }
 0x4a2   : > { %v7101_v26 = vunpack.i.h.bf16 %v7099_v63  ;;  %v7100_v28 = vunpack.i.l.bf16 %v7099_v63 }
 0x4a4   : > { %5879 = vmatmul.mubr.msk.bf16.vlgmr.msra.gmra.mrb[8].mxu0 %vm386_vm9, %v7376_v13  ;;  %v3823_v23 = vsel %vm2947_vm14, %v7100_v28, %v7101_v26  ;;  %v7114_v13 = vpop.permute.xlu1 %7113  ;;  %v3822_v42 = vsel %vm2947_vm14, %v7106_v15, %v7100_v28 }
 0x4a5   : > { %5892 = vmatpush1.bf16.msk.msra.mxu0 %vm8807_vm1, %v5891_v50  ;;  %3468 = vmatprep.mubr.bf16.mxu0 %v7422_v19  ;;  %v7109_v38 = vpop.permute.xlu0 %7108  ;;  %v5928_v16 = vpack.c.bf16 %v3823_v23, %v3821_v22  ;;  %v7116_v50 = vunpack.i.h.bf16 %v7114_v13  ;;  %v7115_v52 = vunpack.i.l.bf16 %v7114_v13  ;;  %v5931_v57 = vpack.c.bf16 %v3822_v42, %v3820_v43  ;;  %v7382_v22 = vld [vmem:[%s9529_s1 + $0x190] sm:$0xff]  }
 0x4a6   : > { %5895 = vmatprep.subr.msk.bf16.mxu0 %vm8783_vm12, %v5894_v24  ;;  %v7111_v24 = vunpack.i.h.bf16 %v7109_v38  ;;  %v7110_v41 = vunpack.i.l.bf16 %v7109_v38  ;;  %vm5950_vm12 = vmpackc.low %vm8950_vm11, %vm8950_vm11  ;;  %vm4434_vm11 = vcmask 982016  }
 0x4a8   : > { %v7124_v53 = vpop.permute.xlu1 %7123  ;;  %v3825_v59 = vsel %vm2947_vm14, %v7110_v41, %v7111_v24  ;;  %v4130_v24 = vld [vmem:[#allocation2 + $0x30] sm:$0xff] }
 0x4a9   : > { %5898 = vmatpush1.bf16.msk.msra.mxu0 %vm8807_vm1, %v5897_v49  ;;  %v7119_v31 = vpop.permute.xlu0 %7118  ;;  %v3827_v49 = vsel %vm2947_vm14, %v7115_v52, %v7116_v50  ;;  %v7126_v61 = vunpack.i.h.bf16 %v7124_v53  ;;  %v7125_v63 = vunpack.i.l.bf16 %v7124_v53  ;;  %v7383_v50 = vld [vmem:[%s9529_s1 + $0x198] sm:$0xff]   ;;  %v7385_v53 = vld [vmem:[%s9529_s1 + $0x1a8] sm:$0xff]   ;;  %vm9028_vm1 = vmpackc.low %vm4139_vm5, %vm4139_vm5 }
 0x4aa   : > { %5909 = vmatprep.subr.msk.bf16.mxu0 %vm5907_vm15, %v5908_v54  ;;  %v7121_v44 = vunpack.i.h.bf16 %v7119_v31  ;;  %v7120_v46 = vunpack.i.l.bf16 %v7119_v31  ;;  %v5934_v2 = vpack.c.bf16 %v3827_v49, %v3825_v59 }
 0x4ab   : > { %v3961_v10 = vsel %vm3151_vm10, %v7125_v63, %v7126_v61 }
 0x4ac   : > { %5880 = vmatmul.mubr.msk.bf16.gmra.mrb[12].mxu0 %vm386_vm9, %v7377_v55  ;;  %v3824_v4 = vsel %vm2947_vm14, %v7120_v46, %v7110_v41  ;;  %v3826_v8 = vsel %vm2947_vm14, %v7121_v44, %v7115_v52  ;;  %v7134_v11 = vpop.permute.xlu1 %7133  ;;  %vm5947_vm14 = vmpackc.low %vm8920_vm7, %vm8920_vm7  ;;  %v7384_v52 = vld [vmem:[%s9529_s1 + $0x1a0] sm:$0xff]   ;;  %vm4391_vm7 = vcmp.lt.s32.totalorder %v7533_v45, 8 }
 0x4ad   : > { %3621 = vmatprep.mubr.bf16.mxu0 %v7422_v19  ;;  %v7129_v39 = vpop.permute.xlu0 %7128  ;;  %v5937_v20 = vpack.c.bf16 %v3826_v8, %v3824_v4  ;;  %v7136_v28 = vunpack.i.h.bf16 %v7134_v11  ;;  %v7135_v6 = vunpack.i.l.bf16 %v7134_v11 }
 0x4ae   : > { %v7131_v51 = vunpack.i.h.bf16 %v7129_v39  ;;  %v7130_v54 = vunpack.i.l.bf16 %v7129_v39  ;;  %v4127_v39 = vld [vmem:[#allocation2] sm:$0xff] }
 0x4af   : > { %v3960_v3 = vsel %vm3151_vm10, %v7135_v6, %v7125_v63  ;;  %v7152_v41 = vpack.i.bf16 %v4130_v24, %v4127_v39 }
 0x4b0   : > { %v3963_v21 = vsel %vm3151_vm10, %v7130_v54, %v7131_v51  ;;  %v7144_v26 = vpop.permute.xlu1 %7143  ;;  %v3962_v30 = vsel %vm3151_vm10, %v7136_v28, %v7130_v54  ;;  %v8988_v54 = vld [vmem:[#allocation2 + $0x8] sm:$0xff] }
 0x4b1   : > { %v7139_v9 = vpop.permute.xlu0 %7138  ;;  %v7146_v38 = vunpack.i.h.bf16 %v7144_v26  ;;  %7153 = vrot.lane.b32.xlu1 %v7152_v41, %s7443_s29 }
 0x4b2   : > { %v7141_v25 = vunpack.i.h.bf16 %v7139_v9  ;;  %v7140_v27 = vunpack.i.l.bf16 %v7139_v9 }
 0x4b4   : > { %5899 = vmatmul.mubr.msk.bf16.vlgmr.msra.gmra.mrb[8].mxu0 %vm386_vm9, %v7378_v34  ;;  %v5948_v34 = vpack.c.bf16 %v3963_v21, %v3961_v10  ;;  %v3965_v13 = vsel %vm3151_vm10, %v7140_v27, %v7141_v25  ;;  %v5173_v10 = vld [vmem:[#allocation2 + $0x28] sm:$0xff] }
 0x4b5   : > { %5912 = vmatpush1.bf16.msk.msra.mxu0 %vm5910_vm2, %v5911_v58  ;;  %3631 = vmatprep.mubr.bf16.mxu0 %v7422_v19  ;;  %v7145_v58 = vunpack.i.l.bf16 %v7144_v26  ;;  %v7149_v12 = vpop.permute.xlu0 %7148 }
 0x4b6   : > { %5915 = vmatprep.subr.msk.bf16.mxu0 %vm5907_vm15, %v5914_v29  ;;  %v7151_v23 = vunpack.i.h.bf16 %v7149_v12  ;;  %vm4141_vm15 = vcmp.ge.s32.totalorder %v7554_v62, 8 }
 0x4b7   : > { %v3967_v7 = vsel %vm3151_vm10, %v7145_v58, %v7146_v38 }
 0x4b8   : > { %v5954_v31 = vpack.c.bf16 %v3967_v7, %v3965_v13  ;;  %v3966_v15 = vsel %vm3151_vm10, %v7151_v23, %v7145_v58  ;;  %v4133_v7 = vld [vmem:[#allocation2 + $0x60] sm:$0xff] }
 0x4b9   : > { %5918 = vmatpush1.bf16.msk.msra.mxu0 %vm5910_vm2, %v5917_v1  ;;  %v7150_v1 = vunpack.i.l.bf16 %v7149_v12  ;;  %vm9182_vm2 = vmand %vm4139_vm5, %vm4141_vm15 }
 0x4ba   : > { %5929 = vmatprep.subr.msk.bf16.mxu0 %vm8883_vm3, %v5928_v16  ;;  %v5951_v16 = vpack.c.bf16 %v3962_v30, %v3960_v3  ;;  %v4134_v3 = vld [vmem:[#allocation2 + $0x68] sm:$0xff] }
 0x4bc   : > { %5900 = vmatmul.mubr.msk.bf16.gmra.mrb[12].mxu0 %vm386_vm9, %v7379_v32  ;;  %v3964_v32 = vsel %vm3151_vm10, %v7150_v1, %v7140_v27  ;;  %vm4140_vm10 = vcmp.ge.s32.totalorder %v7527_v35, 8 }
 0x4bd   : > { %3763 = vmatprep.mubr.bf16.mxu0 %v7422_v19  ;;  %v5957_v47 = vpack.c.bf16 %v3966_v15, %v3964_v32  ;;  %vm9011_vm13 = vmpackc.low %vm4140_vm10, %vm4140_vm10  ;;  %v4137_v32 = vld [vmem:[#allocation2 + $0x98] sm:$0xff] }
 0x4be   : > { %v4078_v42 = vpop.permute.xlu1 %4077  ;;  %vm9174_vm6 = vmand %vm4140_vm10, %vm4142_vm0 }
 0x4c2   : > { %v4088_v28 = vpop.permute.xlu1 %4087 }
 0x4c4   : > { %5919 = vmatmul.mubr.msk.bf16.vlgmr.msra.gmra.mrb[8].mxu0 %vm386_vm9, %v7380_v48  ;;  %v4083_v48 = vpop.permute.xlu0 %4082 }
 0x4c5   : > { %5932 = vmatpush1.bf16.msk.msra.mxu0 %vm8908_vm8, %v5931_v57  ;;  %3773 = vmatprep.mubr.bf16.mxu0 %v7422_v19 }
 0x4c6   : > { %5935 = vmatprep.subr.msk.bf16.mxu0 %vm8883_vm3, %v5934_v2  ;;  %v8993_v2 = vld [vmem:[#allocation2 + $0x38] sm:$0xff]  ;;  %vm5991_vm3 = vmpackc.low %vm9174_vm6, %vm9174_vm6 }
 0x4c7   : > { %vm6034_vm6 = vmpackc.low %vm4141_vm15, %vm4141_vm15 }
 0x4c9   : > { %5938 = vmatpush1.bf16.msk.msra.mxu0 %vm8908_vm8, %v5937_v20  ;;  %v5979_v20 = vpack.c.bf16 %v8993_v2, %v8988_v54  ;;  %vm5994_vm8 = vmpackc.low %vm9182_vm2, %vm9182_vm2 }
 0x4ca   : > { %5949 = vmatprep.subr.msk.bf16.mxu0 %vm5947_vm14, %v5948_v34  ;;  %vm9327_vm2 = vmpackc.low %vm4391_vm7, %vm4391_vm7 }
 0x4cc   : > { %5920 = vmatmul.mubr.msk.bf16.gmra.mrb[12].mxu0 %vm386_vm9, %v7381_v40 }
 0x4cd   : > { %3901 = vmatprep.mubr.bf16.mxu0 %v7422_v19 }
 0x4d4   : > { %5939 = vmatmul.mubr.msk.bf16.vlgmr.msra.gmra.mrb[8].mxu0 %vm386_vm9, %v7382_v22 }
 0x4d5   : > { %5952 = vmatpush1.bf16.msk.msra.mxu0 %vm5950_vm12, %v5951_v16  ;;  %3911 = vmatprep.mubr.bf16.mxu0 %v7422_v19  ;;  %v4136_v16 = vld [vmem:[#allocation2 + $0x90] sm:$0xff] }
 0x4d6   : > { %5955 = vmatprep.subr.msk.bf16.mxu0 %vm5947_vm14, %v5954_v31  ;;  %v7177_v24 = vpack.i.bf16 %v4136_v16, %v4133_v7  ;;  %vm4390_vm14 = vcmp.lt.s32.totalorder %v7554_v62, 8 }
 0x4d9   : > { %5958 = vmatpush1.bf16.msk.msra.mxu0 %vm5950_vm12, %v5957_v47  ;;  %vm9221_vm12 = vmand %vm4140_vm10, %vm4391_vm7 }
 0x4da   : > { %vm9237_vm10 = vmand %vm4139_vm5, %vm4390_vm14 }
 0x4db   : > { %vm6014_vm5 = vmpackc.low %vm9237_vm10, %vm9237_vm10  ;;  %vm4931_vm10 = vcmp.lt.s32.totalorder %v7529_v36, 8 }
 0x4dc   : > { %5940 = vmatmul.mubr.msk.bf16.gmra.mrb[12].mxu0 %vm386_vm9, %v7383_v50 }
 0x4dd   : > { %4041 = vmatprep.mubr.bf16.mxu0 %v7422_v19 }
 0x4e4   : > { %5959 = vmatmul.mubr.msk.bf16.vlgmr.msra.gmra.mrb[8].mxu0 %vm386_vm9, %v7384_v52  ;;  %v5985_v52 = vpack.c.bf16 %v4137_v32, %v4134_v3 }
 0x4e5   : > { %4051 = vmatprep.mubr.bf16.mxu0 %v7422_v19 }
 0x4ec   : > { %5960 = vmatmul.mubr.msk.bf16.gmra.mrb[12].mxu0 %vm386_vm9, %v7385_v53 }
 0x5b7   : > { %v4043_v43 = vpop.f32.mrb[8].mxu0 }
 0x5b8   : > { %v4095_v44 = vadd.f32 %v4078_v42, %v4043_v43  ;;  %v4045_v46 = vpop.f32.mrb[9].mxu0 }
 0x5b9   : > { %v4096_v49 = vadd.f32 %v4078_v42, %v4045_v46  ;;  %v4047_v51 = vpop.f32.mrb[10].mxu0 }
 0x5ba   : > { %v4103_v55 = vmax.f32 %v4095_v44, 0.0  ;;  %v4097_v57 = vadd.f32 %v4083_v48, %v4047_v51  ;;  %v4049_v59 = vpop.f32.mrb[11].mxu0  ;;  %v7387_v51 = vld [vmem:[%s9529_s1 + $0x1c8] sm:$0xff]  }
 0x5bb   : > { %v8991_v61 = vmax.f32 %v4096_v49, 0.0  ;;  %v4098_v63 = vadd.f32 %v4083_v48, %v4049_v59 }
 0x5bc   : > { %v8997_v4 = vadd.f32 %v4103_v55, %v8451_v33  ;;  %v4105_v8 = vmax.f32 %v4097_v57, 0.0  ;;  %v7157_v11 = vpack.i.bf16 %v4103_v55, %v8988_v54  ;;  %v9114_v57 = vld [vmem:[#allocation2 + $0x50] sm:$0xff] }
 0x5bd   : > { %v9002_v18 = vadd.f32 %v8991_v61, %v8458_v60  ;;  %v9004_v21 = vmax.f32 %v4098_v63, 0.0  ;;  %v9016_v33 = vpack.i.bf16 %v8991_v61, %v4103_v55 }
 0x5be   : > { %v9019_v9 = vadd.f32 %v4105_v8, %v8465_v37  ;;  %7158 = vrot.lane.b32.xlu1 %v7157_v11, %s7443_s29  ;;  %v7162_v60 = vpack.i.bf16 %v4105_v8, %v8993_v2  ;;  %v9023_v34 = vpack.c.bf16 %v4105_v8, %v4103_v55  ;;  %v9032_v26 = vpack.i.bf16 %v4105_v8, %v4103_v55 }
 0x5bf   : > { %v9036_v37 = vadd.f32 %v9004_v21, %v8474_v56  ;;  %v4053_v6 = vpop.f32.mrb[12].mxu0  ;;  %v7187_v38 = vpack.i.bf16 %v9004_v21, %v4105_v8  ;;  %v7312_v58 = vpack.i.bf16 %v9004_v21, %v8991_v61  ;;  %v9047_v27 = vpack.c.bf16 %v9004_v21, %v8991_v61  ;;  %v4093_v56 = vpop.permute.xlu0 %4092  ;;  %v9125_v8 = vld [vmem:[#allocation2 + $0xb0] sm:$0xff] }
 0x5c0   : > { %v4099_v12 = vadd.f32 %v4088_v28, %v4053_v6  ;;  %v4055_v25 = vpop.f32.mrb[13].mxu0  ;;  %7163 = vrot.lane.b32.xlu0 %v7162_v60, %s7443_s29  ;;  %5977 = vmatprep.subr.msk.bf16.mxu1 %vm9011_vm13, %v9023_v34  ;;  %v7207_v55 = vpack.i.bf16 %v4137_v32, %v4134_v3  ;;  %v7247_v63 = vpack.i.bf16 %v9114_v57, %v9004_v21  ;;  %v5182_v6 = vld [vmem:[#allocation2 + $0xb8] sm:$0xff] }
 0x5c1   : > { %v4100_v29 = vadd.f32 %v4088_v28, %v4055_v25  ;;  %v4057_v30 = vpop.f32.mrb[14].mxu0  ;;  %5980 = vmatpush1.bf16.msk.msra.mxu1 %vm9028_vm1, %v5979_v20  ;;  %v5179_v28 = vld [vmem:[#allocation2 + $0x88] sm:$0xff]  ;;  %v6136_v21 = vld [vmem:[%s9530_s2 + $0x78] sm:$0xff] }
 0x5c2   : > { %v4107_v23 = vmax.f32 %v4099_v12, 0.0  ;;  %v4101_v1 = vadd.f32 %v4093_v56, %v4057_v30  ;;  %v4059_v22 = vpop.f32.mrb[15].mxu0  ;;  %v6133_v12 = vld [vmem:[%s9530_s2 + $0x60] sm:$0xff]  ;;  %v6134_v25 = vld [vmem:[%s9530_s2 + $0x68] sm:$0xff] }
 0x5c3   : > { %v9051_v13 = vmax.f32 %v4100_v29, 0.0  ;;  %v4102_v31 = vadd.f32 %v4093_v56, %v4059_v22 }
 0x5c4   : > { %v9054_v15 = vadd.f32 %v4107_v23, %v8493_v0  ;;  %v4109_v47 = vmax.f32 %v4101_v1, 0.0  ;;  %v7167_v50 = vpack.i.bf16 %v4107_v23, %v4134_v3 }
 0x5c5   : > { %v9058_v53 = vadd.f32 %v9051_v13, %v8500_v17  ;;  %v9060_v39 = vmax.f32 %v4102_v31, 0.0  ;;  %v7197_v41 = vpack.i.bf16 %v9051_v13, %v4107_v23 }
 0x5c6   : > { %v9064_v42 = vadd.f32 %v4109_v47, %v8507_v14  ;;  %7168 = vrot.lane.b32.xlu0 %v7167_v50, %s7443_s29  ;;  %v7172_v43 = vpack.i.bf16 %v4109_v47, %v4137_v32  ;;  %v9067_v0 = vpack.c.bf16 %v4109_v47, %v4107_v23  ;;  %v7267_v44 = vpack.i.bf16 %v4109_v47, %v4107_v23  ;;  %v7386_v14 = vld [vmem:[%s9529_s1 + $0x1c0] sm:$0xff]  }
 0x5c7   : > { %v9071_v46 = vadd.f32 %v9060_v39, %v8514_v5  ;;  %v7202_v17 = vpack.i.bf16 %v9060_v39, %v4109_v47  ;;  %v7327_v48 = vpack.i.bf16 %v9060_v39, %v9051_v13  ;;  %v9085_v49 = vpack.c.bf16 %v9060_v39, %v9051_v13 }
 0x5c8   : > { %7173 = vrot.lane.b32.xlu1 %v7172_v43, %s7443_s29  ;;  %5983 = vmatprep.subr.msk.bf16.mxu1 %vm9011_vm13, %v9067_v0  ;;  %v7192_v5 = vpack.i.bf16 %v8993_v2, %v8988_v54  ;;  %v9111_v54 = vld [vmem:[#allocation2 + $0x20] sm:$0xff]  ;;  %v7262_v20 = vpack.i.bf16 %v9125_v8, %v9060_v39  ;;  %vm6011_vm13 = vmpackc.low %vm9221_vm12, %vm9221_vm12 }
 0x5c9   : > { %5986 = vmatpush1.bf16.msk.msra.mxu1 %vm9028_vm1, %v5985_v52  ;;  %v7242_v59 = vpack.i.bf16 %v9111_v54, %v8991_v61  ;;  %v9122_v2 = vld [vmem:[#allocation2 + $0x80] sm:$0xff]  ;;  %v7302_v60 = vpack.i.bf16 %v5173_v10, %v9111_v54  ;;  %v6135_v61 = vld [vmem:[%s9530_s2 + $0x70] sm:$0xff]  ;;  %vm9287_vm1 = vmpackc.low %vm4142_vm0, %vm4142_vm0 }
 0x5ca   : > { %7178 = vrot.lane.b32.xlu0 %v7177_v24, %s7443_s29  ;;  %v7257_v11 = vpack.i.bf16 %v9122_v2, %v9051_v13 }
 0x5cc   : > { %7183 = vrot.lane.b32.xlu1 %v9016_v33, %s7444_s4  ;;  %5987 = vmatmul.mubr.msk.bf16.vlgmr.msra.gmra.mrb[8].mxu1 %vm386_vm9, %v7386_v14 }
 0x5cd   : > { %4298 = vmatprep.mubr.bf16.mxu1 %v7422_v19 }
 0x5ce   : > { %7188 = vrot.lane.b32.xlu0 %v7187_v38, %s7444_s4 }
 0x5d0   : > { %7193 = vrot.lane.b32.xlu1 %v7192_v5, %s7444_s4 }
 0x5d2   : > { %7198 = vrot.lane.b32.xlu0 %v7197_v41, %s7444_s4 }
 0x5d4   : > { %7203 = vrot.lane.b32.xlu1 %v7202_v17, %s7444_s4  ;;  %5988 = vmatmul.mubr.msk.bf16.gmra.mrb[12].mxu1 %vm386_vm9, %v7387_v51 }
 0x5d5   : > { %4357 = vmatprep.mubr.bf16.mxu1 %v7422_v19 }
 0x5d6   : > { %7208 = vrot.lane.b32.xlu0 %v7207_v55, %s7444_s4 }
 0x5d8   : > { %7213 = vrot.lane.b32.xlu1 %v9016_v33, %s7443_s29  ;;  %v5176_v33 = vld [vmem:[#allocation2 + $0x58] sm:$0xff] }
 0x5d9   : > { %v7307_v40 = vpack.i.bf16 %v5176_v33, %v9114_v57 }
 0x5da   : > { %7218 = vrot.lane.b32.xlu0 %v7187_v38, %s7443_s29  ;;  %v7322_v38 = vpack.i.bf16 %v5182_v6, %v9125_v8 }
 0x5dc   : > { %7223 = vrot.lane.b32.xlu1 %v7192_v5, %s7443_s29 }
 0x5de   : > { %7228 = vrot.lane.b32.xlu0 %v7197_v41, %s7443_s29 }
 0x5e0   : > { %7233 = vrot.lane.b32.xlu1 %v7202_v17, %s7443_s29 }
 0x5e2   : > { %7238 = vrot.lane.b32.xlu0 %v7207_v55, %s7443_s29 }
 0x5e4   : > { %7243 = vrot.lane.b32.xlu1 %v7242_v59, %s7444_s4 }
 0x5e6   : > { %7248 = vrot.lane.b32.xlu0 %v7247_v63, %s7444_s4 }
 0x5e8   : > { %7253 = vrot.lane.b32.xlu1 %v9032_v26, %s7444_s4 }
 0x5ea   : > { %7258 = vrot.lane.b32.xlu0 %v7257_v11, %s7444_s4 }
 0x5ec   : > { %7263 = vrot.lane.b32.xlu1 %v7262_v20, %s7444_s4 }
 0x5ee   : > { %7268 = vrot.lane.b32.xlu0 %v7267_v44, %s7444_s4 }
 0x5f0   : > { %7273 = vrot.lane.b32.xlu1 %v7242_v59, %s7443_s29 }
 0x5f2   : > { %7278 = vrot.lane.b32.xlu0 %v7247_v63, %s7443_s29 }
 0x5f4   : > { %7283 = vrot.lane.b32.xlu1 %v9032_v26, %s7443_s29  ;;  %v7317_v26 = vpack.i.bf16 %v5179_v28, %v9122_v2 }
 0x5f6   : > { %7288 = vrot.lane.b32.xlu0 %v7257_v11, %s7443_s29 }
 0x5f8   : > { %7293 = vrot.lane.b32.xlu1 %v7262_v20, %s7443_s29 }
 0x5fa   : > { %7298 = vrot.lane.b32.xlu0 %v7267_v44, %s7443_s29 }
 0x5fc   : > { %7303 = vrot.lane.b32.xlu1 %v7302_v60, %s7444_s4 }
 0x5fe   : > { %7308 = vrot.lane.b32.xlu0 %v7307_v40, %s7444_s4 }
 0x600   : > { %7313 = vrot.lane.b32.xlu1 %v7312_v58, %s7444_s4  ;;  %v7154_v58 = vpop.permute.xlu1 %7153 }
 0x601   : > { %v7156_v29 = vunpack.i.h.bf16 %v7154_v58  ;;  %v7155_v30 = vunpack.i.l.bf16 %v7154_v58 }
 0x602   : > { %7318 = vrot.lane.b32.xlu0 %v7317_v26, %s7444_s4 }
 0x604   : > { %7323 = vrot.lane.b32.xlu1 %v7322_v38, %s7444_s4 }
 0x606   : > { %7328 = vrot.lane.b32.xlu0 %v7327_v48, %s7444_s4 }
 0x608   : > { %5342 = vperm.xlu1 %6671, %v6133_v12   ;;  %v7388_v12 = vld [vmem:[%s9529_s1 + $0x1b0] sm:$0xff]  }
 0x60a   : > { %5347 = vperm.xlu0 %6670, %v6134_v25  }
 0x60c   : > { %5352 = vperm.xlu1 %6671, %v6135_v61   ;;  %v7390_v61 = vld [vmem:[%s9529_s1 + $0x1d0] sm:$0xff]  }
 0x60e   : > { %5357 = vperm.xlu0 %6670, %v6136_v21  }
 0x630   : > { %v7159_v56 = vpop.permute.xlu1 %7158 }
 0x631   : > { %v7161_v3 = vunpack.i.h.bf16 %v7159_v56  ;;  %v7160_v23 = vunpack.i.l.bf16 %v7159_v56 }
 0x632   : > { %v7164_v1 = vpop.permute.xlu0 %7163 }
 0x633   : > { %v7166_v7 = vunpack.i.h.bf16 %v7164_v1  ;;  %v7165_v16 = vunpack.i.l.bf16 %v7164_v1  ;;  %v4186_v31 = vsel %vm4185_vm4, %v7155_v30, %v7160_v23  ;;  %v4187_v32 = vsel %vm4185_vm4, %v7160_v23, %v7161_v3 }
 0x635   : > { %v4188_v47 = vsel %vm4185_vm4, %v7156_v29, %v7165_v16  ;;  %v4189_v50 = vsel %vm4185_vm4, %v7165_v16, %v7166_v7 }
 0x636   : > { %v5992_v52 = vpack.c.bf16 %v4189_v50, %v4187_v32  ;;  %v5995_v39 = vpack.c.bf16 %v4188_v47, %v4186_v31 }
 0x638   : > { %v7169_v24 = vpop.permute.xlu0 %7168  ;;  %5993 = vmatprep.subr.msk.bf16.mxu1 %vm5991_vm3, %v5992_v52 }
 0x639   : > { %v7171_v41 = vunpack.i.h.bf16 %v7169_v24  ;;  %v7170_v43 = vunpack.i.l.bf16 %v7169_v24  ;;  %5996 = vmatpush1.bf16.msk.msra.mxu1 %vm5994_vm8, %v5995_v39 }
 0x63a   : > { %v7174_v44 = vpop.permute.xlu1 %7173 }
 0x63b   : > { %v7176_v17 = vunpack.i.h.bf16 %v7174_v44  ;;  %v7175_v48 = vunpack.i.l.bf16 %v7174_v44  ;;  %v4191_v5 = vsel %vm4185_vm4, %v7170_v43, %v7171_v41  ;;  %v7389_v41 = vld [vmem:[%s9529_s1 + $0x1b8] sm:$0xff]  }
 0x63c   : > { %v7179_v14 = vpop.permute.xlu0 %7178 }
 0x63d   : > { %v4193_v51 = vsel %vm4185_vm4, %v7175_v48, %v7176_v17  ;;  %v7181_v55 = vunpack.i.h.bf16 %v7179_v14  ;;  %v7180_v59 = vunpack.i.l.bf16 %v7179_v14 }
 0x63e   : > { %v5998_v63 = vpack.c.bf16 %v4193_v51, %v4191_v5  ;;  %v7184_v11 = vpop.permute.xlu1 %7183 }
 0x63f   : > { %v4190_v20 = vsel %vm4185_vm4, %v7180_v59, %v7170_v43  ;;  %v4192_v10 = vsel %vm4185_vm4, %v7181_v55, %v7175_v48  ;;  %v7186_v33 = vunpack.i.h.bf16 %v7184_v11  ;;  %v7185_v60 = vunpack.i.l.bf16 %v7184_v11 }
 0x640   : > { %v6001_v40 = vpack.c.bf16 %v4192_v10, %v4190_v20  ;;  %v7189_v28 = vpop.permute.xlu0 %7188  ;;  %5999 = vmatprep.subr.msk.bf16.mxu1 %vm5991_vm3, %v5998_v63  ;;  %vm4932_vm3 = vcmp.lt.s32.totalorder %v7527_v35, 8  ;;  %v7399_v35 = vld [vmem:[%s9529_s1 + $0x218] sm:$0xff]  }
 0x641   : > { %v7191_v26 = vunpack.i.h.bf16 %v7189_v28  ;;  %v7190_v38 = vunpack.i.l.bf16 %v7189_v28  ;;  %v4436_v21 = vsel %vm4434_vm11, %v7185_v60, %v7186_v33  ;;  %vm9361_vm12 = vmand %vm4932_vm3, %vm4142_vm0 }
 0x642   : > { %v7194_v25 = vpop.permute.xlu1 %7193  ;;  %6002 = vmatpush1.bf16.msk.msra.mxu1 %vm5994_vm8, %v6001_v40  ;;  %vm9349_vm8 = vmpackc.low %vm4390_vm14, %vm4390_vm14 }
 0x643   : > { %v4438_v58 = vsel %vm4434_vm11, %v7190_v38, %v7191_v26  ;;  %v7196_v56 = vunpack.i.h.bf16 %v7194_v25  ;;  %v7195_v29 = vunpack.i.l.bf16 %v7194_v25  ;;  %vm6079_vm0 = vmpackc.low %vm9361_vm12, %vm9361_vm12 }
 0x644   : > { %v6012_v30 = vpack.c.bf16 %v4438_v58, %v4436_v21  ;;  %v7199_v3 = vpop.permute.xlu0 %7198 }
 0x645   : > { %v4437_v23 = vsel %vm4434_vm11, %v7196_v56, %v7190_v38  ;;  %v4435_v1 = vsel %vm4434_vm11, %v7195_v29, %v7185_v60  ;;  %v7201_v22 = vunpack.i.h.bf16 %v7199_v3  ;;  %v7200_v7 = vunpack.i.l.bf16 %v7199_v3  ;;  %6003 = vmatmul.mubr.msk.bf16.vlgmr.msra.gmra.mrb[8].mxu1 %vm386_vm9, %v7388_v12 }
 0x646   : > { %v6015_v16 = vpack.c.bf16 %v4437_v23, %v4435_v1  ;;  %6013 = vmatprep.subr.msk.bf16.mxu1 %vm6011_vm13, %v6012_v30  ;;  %v7204_v13 = vpop.permute.xlu1 %7203  ;;  %4367 = vmatprep.mubr.bf16.mxu1 %v7422_v19 }
 0x647   : > { %v7206_v31 = vunpack.i.h.bf16 %v7204_v13  ;;  %v7205_v32 = vunpack.i.l.bf16 %v7204_v13  ;;  %v4440_v50 = vsel %vm4434_vm11, %v7200_v7, %v7201_v22 }
 0x648   : > { %v7209_v47 = vpop.permute.xlu0 %7208  ;;  %6016 = vmatpush1.bf16.msk.msra.mxu1 %vm6014_vm5, %v6015_v16 }
 0x649   : > { %v4442_v52 = vsel %vm4434_vm11, %v7205_v32, %v7206_v31  ;;  %v7211_v39 = vunpack.i.h.bf16 %v7209_v47  ;;  %v7210_v24 = vunpack.i.l.bf16 %v7209_v47 }
 0x64a   : > { %v6018_v43 = vpack.c.bf16 %v4442_v52, %v4440_v50  ;;  %v7214_v44 = vpop.permute.xlu1 %7213  ;;  %v7392_v52 = vld [vmem:[%s9529_s1 + $0x1e0] sm:$0xff]  }
 0x64b   : > { %v4439_v17 = vsel %vm4434_vm11, %v7210_v24, %v7200_v7  ;;  %v4441_v48 = vsel %vm4434_vm11, %v7211_v39, %v7205_v32  ;;  %v7216_v14 = vunpack.i.h.bf16 %v7214_v44  ;;  %v7215_v5 = vunpack.i.l.bf16 %v7214_v44  ;;  %v7391_v32 = vld [vmem:[%s9529_s1 + $0x1d8] sm:$0xff]  }
 0x64c   : > { %v6021_v51 = vpack.c.bf16 %v4441_v48, %v4439_v17  ;;  %v7219_v55 = vpop.permute.xlu0 %7218  ;;  %6019 = vmatprep.subr.msk.bf16.mxu1 %vm6011_vm13, %v6018_v43  ;;  %vm9392_vm13 = vmand %vm4931_vm10, %vm4141_vm15 }
 0x64d   : > { %v7221_v59 = vunpack.i.h.bf16 %v7219_v55  ;;  %v7220_v63 = vunpack.i.l.bf16 %v7219_v55  ;;  %6004 = vmatmul.mubr.msk.bf16.gmra.mrb[12].mxu1 %vm386_vm9, %v7389_v41  ;;  %v4574_v20 = vsel %vm4185_vm4, %v7215_v5, %v7216_v14  ;;  %vm9420_vm15 = vmpackc.low %vm4932_vm3, %vm4932_vm3 }
 0x64e   : > { %v7224_v11 = vpop.permute.xlu1 %7223  ;;  %6022 = vmatpush1.bf16.msk.msra.mxu1 %vm6014_vm5, %v6021_v51  ;;  %4516 = vmatprep.mubr.bf16.mxu1 %v7422_v19  ;;  %vm6082_vm5 = vmpackc.low %vm9392_vm13, %vm9392_vm13 }
 0x64f   : > { %v4576_v10 = vsel %vm4185_vm4, %v7220_v63, %v7221_v59  ;;  %v7226_v33 = vunpack.i.h.bf16 %v7224_v11  ;;  %v7225_v60 = vunpack.i.l.bf16 %v7224_v11 }
 0x650   : > { %v6032_v28 = vpack.c.bf16 %v4576_v10, %v4574_v20  ;;  %v7229_v6 = vpop.permute.xlu0 %7228 }
 0x651   : > { %v4575_v26 = vsel %vm4185_vm4, %v7226_v33, %v7220_v63  ;;  %v4573_v38 = vsel %vm4185_vm4, %v7225_v60, %v7215_v5  ;;  %v7231_v12 = vunpack.i.h.bf16 %v7229_v6  ;;  %v7230_v25 = vunpack.i.l.bf16 %v7229_v6 }
 0x652   : > { %v6035_v21 = vpack.c.bf16 %v4575_v26, %v4573_v38  ;;  %v7234_v58 = vpop.permute.xlu1 %7233  ;;  %6033 = vmatprep.subr.msk.bf16.mxu1 %vm9287_vm1, %v6032_v28 }
 0x653   : > { %v7236_v56 = vunpack.i.h.bf16 %v7234_v58  ;;  %v7235_v29 = vunpack.i.l.bf16 %v7234_v58  ;;  %v4578_v3 = vsel %vm4185_vm4, %v7230_v25, %v7231_v12  ;;  %v7394_v12 = vld [vmem:[%s9529_s1 + $0x1f0] sm:$0xff]   ;;  %v6106_v58 = vpack.c.bf16 %v9125_v8, %v9122_v2 }
 0x654   : > { %v7239_v30 = vpop.permute.xlu0 %7238 }
 0x655   : > { %v4580_v23 = vsel %vm4185_vm4, %v7235_v29, %v7236_v56  ;;  %v7241_v1 = vunpack.i.h.bf16 %v7239_v30  ;;  %v7240_v22 = vunpack.i.l.bf16 %v7239_v30  ;;  %6023 = vmatmul.mubr.msk.bf16.vlgmr.msra.gmra.mrb[8].mxu1 %vm386_vm9, %v7390_v61 }
 0x656   : > { %v6038_v7 = vpack.c.bf16 %v4580_v23, %v4578_v3  ;;  %6036 = vmatpush1.bf16.msk.msra.mxu1 %vm6034_vm6, %v6035_v21  ;;  %4526 = vmatprep.mubr.bf16.mxu1 %v7422_v19  ;;  %v7244_v47 = vpop.permute.xlu1 %7243 }
 0x657   : > { %v4577_v16 = vsel %vm4185_vm4, %v7240_v22, %v7230_v25  ;;  %v4579_v13 = vsel %vm4185_vm4, %v7241_v1, %v7235_v29  ;;  %v7246_v44 = vunpack.i.h.bf16 %v7244_v47  ;;  %v7245_v17 = vunpack.i.l.bf16 %v7244_v47 }
 0x658   : > { %v6041_v31 = vpack.c.bf16 %v4579_v13, %v4577_v16  ;;  %6039 = vmatprep.subr.msk.bf16.mxu1 %vm9287_vm1, %v6038_v7  ;;  %v7249_v50 = vpop.permute.xlu0 %7248  ;;  %vm9446_vm1 = vmand %vm4932_vm3, %vm4391_vm7 }
 0x659   : > { %v7251_v39 = vunpack.i.h.bf16 %v7249_v50  ;;  %v7250_v24 = vunpack.i.l.bf16 %v7249_v50  ;;  %v4822_v14 = vsel %vm4434_vm11, %v7245_v17, %v7246_v44  ;;  %vm9474_vm7 = vmand %vm4931_vm10, %vm4390_vm14 }
 0x65a   : > { %6042 = vmatpush1.bf16.msk.msra.mxu1 %vm6034_vm6, %v6041_v31  ;;  %v7254_v41 = vpop.permute.xlu1 %7253  ;;  %vm6119_vm6 = vmpackc.low %vm9446_vm1, %vm9446_vm1 }
 0x65b   : > { %4708 = vmatprep.subr.bf16.mxu1 %v9047_v27  ;;  %v4824_v48 = vsel %vm4434_vm11, %v7250_v24, %v7251_v39  ;;  %v7256_v63 = vunpack.i.h.bf16 %v7254_v41  ;;  %v7255_v11 = vunpack.i.l.bf16 %v7254_v41 }
 0x65c   : > { %v7259_v43 = vpop.permute.xlu0 %7258  ;;  %v6060_v51 = vpack.c.bf16 %v4824_v48, %v4822_v14 }
 0x65d   : > { %6024 = vmatmul.mubr.msk.bf16.gmra.mrb[12].mxu1 %vm386_vm9, %v7391_v32  ;;  %v7261_v40 = vunpack.i.h.bf16 %v7259_v43  ;;  %v7260_v28 = vunpack.i.l.bf16 %v7259_v43  ;;  %v4823_v6 = vsel %vm4434_vm11, %v7256_v63, %v7250_v24  ;;  %v4821_v26 = vsel %vm4434_vm11, %v7255_v11, %v7245_v17  ;;  %v7396_v63 = vld [vmem:[%s9529_s1 + $0x200] sm:$0xff]  }
 0x65e   : > { %4654 = vmatprep.mubr.bf16.mxu1 %v7422_v19  ;;  %v7264_v55 = vpop.permute.xlu1 %7263  ;;  %v6063_v56 = vpack.c.bf16 %v4823_v6, %v4821_v26 }
 0x65f   : > { %v7266_v20 = vunpack.i.h.bf16 %v7264_v55  ;;  %v7265_v10 = vunpack.i.l.bf16 %v7264_v55  ;;  %v4826_v29 = vsel %vm4434_vm11, %v7260_v28, %v7261_v40 }
 0x660   : > { %v7269_v59 = vpop.permute.xlu0 %7268 }
 0x661   : > { %v7270_v38 = vunpack.i.l.bf16 %v7269_v59  ;;  %v4828_v25 = vsel %vm4434_vm11, %v7265_v10, %v7266_v20 }
 0x662   : > { %v7274_v33 = vpop.permute.xlu1 %7273  ;;  %v6066_v23 = vpack.c.bf16 %v4828_v25, %v4826_v29  ;;  %v7398_v25 = vld [vmem:[%s9529_s1 + $0x210] sm:$0xff]  }
 0x663   : > { %v7276_v30 = vunpack.i.h.bf16 %v7274_v33  ;;  %v7275_v3 = vunpack.i.l.bf16 %v7274_v33  ;;  %v4825_v1 = vsel %vm4434_vm11, %v7270_v38, %v7260_v28  ;;  %v6100_v28 = vpack.c.bf16 %v9114_v57, %v9111_v54 }
 0x664   : > { %v7279_v60 = vpop.permute.xlu0 %7278 }
 0x665   : > { %6043 = vmatmul.mubr.msk.bf16.vlgmr.msra.gmra.mrb[8].mxu1 %vm386_vm9, %v7392_v52  ;;  %v7281_v61 = vunpack.i.h.bf16 %v7279_v60  ;;  %v7280_v21 = vunpack.i.l.bf16 %v7279_v60  ;;  %v4964_v32 = vsel %vm4185_vm4, %v7275_v3, %v7276_v30  ;;  %v7395_v52 = vld [vmem:[%s9529_s1 + $0x1f8] sm:$0xff]  }
 0x666   : > { %4709 = vmatpush1.bf16.msra.mxu1 %v9023_v34  ;;  %4664 = vmatprep.mubr.bf16.mxu1 %v7422_v19  ;;  %v7393_v34 = vld [vmem:[%s9529_s1 + $0x1e8] sm:$0xff]   ;;  %v7284_v7 = vpop.permute.xlu1 %7283 }
 0x667   : > { %4710 = vmatprep.subr.bf16.mxu1 %v9085_v49  ;;  %v4966_v13 = vsel %vm4185_vm4, %v7280_v21, %v7281_v61  ;;  %v7286_v24 = vunpack.i.h.bf16 %v7284_v7  ;;  %v7285_v41 = vunpack.i.l.bf16 %v7284_v7 }
 0x668   : > { %v7289_v47 = vpop.permute.xlu0 %7288  ;;  %v6080_v50 = vpack.c.bf16 %v4966_v13, %v4964_v32 }
 0x669   : > { %v7291_v48 = vunpack.i.h.bf16 %v7289_v47  ;;  %v7290_v14 = vunpack.i.l.bf16 %v7289_v47  ;;  %v4963_v55 = vsel %vm4185_vm4, %v7285_v41, %v7275_v3 }
 0x66a   : > { %4711 = vmatpush1.bf16.msra.mxu1 %v9067_v0  ;;  %v7271_v0 = vunpack.i.h.bf16 %v7269_v59  ;;  %v7294_v39 = vpop.permute.xlu1 %7293 }
 0x66b   : > { %6061 = vmatprep.subr.msk.bf16.mxu1 %vm9327_vm2, %v6060_v51  ;;  %v7296_v43 = vunpack.i.h.bf16 %v7294_v39  ;;  %v7295_v44 = vunpack.i.l.bf16 %v7294_v39  ;;  %v4965_v51 = vsel %vm4185_vm4, %v7286_v24, %v7280_v21  ;;  %v7400_v24 = vld [vmem:[%s9529_s1 + $0x220] sm:$0xff]  }
 0x66c   : > { %v4827_v22 = vsel %vm4434_vm11, %v7271_v0, %v7265_v10  ;;  %v7299_v17 = vpop.permute.xlu0 %7298  ;;  %v6083_v20 = vpack.c.bf16 %v4965_v51, %v4963_v55  ;;  %v4968_v10 = vsel %vm4185_vm4, %v7290_v14, %v7291_v48  ;;  %v7397_v0 = vld [vmem:[%s9529_s1 + $0x208] sm:$0xff]   ;;  %v7402_v48 = vld [vmem:[%s9529_s1 + $0x230] sm:$0xff]  }
 0x66d   : > { %6044 = vmatmul.mubr.msk.bf16.gmra.mrb[12].mxu1 %vm386_vm9, %v7393_v34  ;;  %v6069_v31 = vpack.c.bf16 %v4827_v22, %v4825_v1  ;;  %v7301_v59 = vunpack.i.h.bf16 %v7299_v17  ;;  %v7300_v34 = vunpack.i.l.bf16 %v7299_v17  ;;  %v4970_v11 = vsel %vm4185_vm4, %v7295_v44, %v7296_v43  ;;  %v7401_v17 = vld [vmem:[%s9529_s1 + $0x228] sm:$0xff]  }
 0x66e   : > { %4740 = vmatprep.mubr.bf16.mxu1 %v7422_v19  ;;  %v6086_v33 = vpack.c.bf16 %v4970_v11, %v4968_v10  ;;  %v7304_v54 = vpop.permute.xlu1 %7303 }
 0x66f   : > { %v4967_v60 = vsel %vm4185_vm4, %v7300_v34, %v7290_v14  ;;  %v4969_v40 = vsel %vm4185_vm4, %v7301_v59, %v7295_v44  ;;  %v7306_v38 = vunpack.i.h.bf16 %v7304_v54  ;;  %v7305_v61 = vunpack.i.l.bf16 %v7304_v54  ;;  %vm6102_vm4 = vmpackc.low %vm4931_vm10, %vm4931_vm10  ;;  %v7403_v14 = vld [vmem:[%s9529_s1 + $0x238] sm:$0xff]  }
 0x670   : > { %v6089_v6 = vpack.c.bf16 %v4969_v40, %v4967_v60  ;;  %v7309_v57 = vpop.permute.xlu0 %7308 }
 0x671   : > { %v7310_v21 = vunpack.i.l.bf16 %v7309_v57 }
 0x672   : > { %v7314_v2 = vpop.permute.xlu1 %7313 }
 0x673   : > { %v7316_v1 = vunpack.i.h.bf16 %v7314_v2  ;;  %v7315_v22 = vunpack.i.l.bf16 %v7314_v2 }
 0x674   : > { %v7319_v8 = vpop.permute.xlu0 %7318 }
 0x675   : > { %6051 = vmatmul.mubr.msk.bf16.vlgmr.msra.gmra.mrb[8].mxu1 %vm386_vm9, %v7394_v12  ;;  %v7311_v12 = vunpack.i.h.bf16 %v7309_v57  ;;  %v7320_v7 = vunpack.i.l.bf16 %v7319_v8  ;;  %v5227_v47 = vsel %vm4434_vm11, %v7316_v1, %v7310_v21 }
 0x676   : > { %6064 = vmatpush1.bf16.msk.msra.mxu1 %vm9349_vm8, %v6063_v56  ;;  %4750 = vmatprep.mubr.bf16.mxu1 %v7422_v19  ;;  %v5226_v56 = vsel %vm4434_vm11, %v7305_v61, %v7306_v38  ;;  %v7324_v45 = vpop.permute.xlu1 %7323 }
 0x677   : > { %6067 = vmatprep.subr.msk.bf16.mxu1 %vm9327_vm2, %v6066_v23  ;;  %v5228_v29 = vsel %vm4434_vm11, %v7310_v21, %v7311_v12  ;;  %v7326_v23 = vunpack.i.h.bf16 %v7324_v45  ;;  %v7325_v13 = vunpack.i.l.bf16 %v7324_v45  ;;  %vm6122_vm2 = vmpackc.low %vm9474_vm7, %vm9474_vm7 }
 0x678   : > { %v6120_v3 = vpack.c.bf16 %v5228_v29, %v5226_v56  ;;  %v7329_v16 = vpop.permute.xlu0 %7328 }
 0x679   : > { %v7330_v39 = vunpack.i.l.bf16 %v7329_v16 }
 0x67a   : > { %6070 = vmatpush1.bf16.msk.msra.mxu1 %vm9349_vm8, %v6069_v31  ;;  %v5232_v31 = vsel %vm4434_vm11, %v7325_v13, %v7326_v23 }
 0x67b   : > { %6081 = vmatprep.subr.msk.bf16.mxu1 %vm6079_vm0, %v6080_v50  ;;  %v5225_v50 = vsel %vm4434_vm11, %v7315_v22, %v7305_v61  ;;  %v5229_v62 = vsel %vm4434_vm11, %v7330_v39, %v7320_v7 }
 0x67c   : > { %v6123_v36 = vpack.c.bf16 %v5227_v47, %v5225_v50 }
 0x67d   : > { %6052 = vmatmul.mubr.msk.bf16.gmra.mrb[12].mxu1 %vm386_vm9, %v7395_v52  ;;  %v7331_v52 = vunpack.i.h.bf16 %v7329_v16 }
 0x67e   : > { %4902 = vmatprep.mubr.bf16.mxu1 %v7422_v19 }
 0x67f   : > { %v5231_v43 = vsel %vm4434_vm11, %v7331_v52, %v7325_v13 }
 0x680   : > { %v6129_v44 = vpack.c.bf16 %v5231_v43, %v5229_v62 }
 0x685   : > { %6071 = vmatmul.mubr.msk.bf16.vlgmr.msra.gmra.mrb[8].mxu1 %vm386_vm9, %v7396_v63 }
 0x686   : > { %6084 = vmatpush1.bf16.msk.msra.mxu1 %vm6082_vm5, %v6083_v20  ;;  %4912 = vmatprep.mubr.bf16.mxu1 %v7422_v19 }
 0x687   : > { %6087 = vmatprep.subr.msk.bf16.mxu1 %vm6079_vm0, %v6086_v33  ;;  %v5343_v5 = vpop.permute.xlu1 %5342 }
 0x689   : > { %v5348_v34 = vpop.permute.xlu0 %5347 }
 0x68a   : > { %6090 = vmatpush1.bf16.msk.msra.mxu1 %vm6082_vm5, %v6089_v6 }
 0x68b   : > { %6101 = vmatprep.subr.msk.bf16.mxu1 %vm9420_vm15, %v6100_v28  ;;  %v5353_v54 = vpop.permute.xlu1 %5352 }
 0x68d   : > { %6072 = vmatmul.mubr.msk.bf16.gmra.mrb[12].mxu1 %vm386_vm9, %v7397_v0  ;;  %v5358_v61 = vpop.permute.xlu0 %5357 }
 0x68e   : > { %5044 = vmatprep.mubr.bf16.mxu1 %v7422_v19 }
 0x695   : > { %6091 = vmatmul.mubr.msk.bf16.vlgmr.msra.gmra.mrb[8].mxu1 %vm386_vm9, %v7398_v25 }
 0x696   : > { %6104 = vmatpush1.bf16.msk.msra.mxu1 %vm6102_vm4, %v9047_v27  ;;  %5054 = vmatprep.mubr.bf16.mxu1 %v7422_v19  ;;  %v7321_v27 = vunpack.i.h.bf16 %v7319_v8 }
 0x697   : > { %6107 = vmatprep.subr.msk.bf16.mxu1 %vm9420_vm15, %v6106_v58 }
 0x69a   : > { %6110 = vmatpush1.bf16.msk.msra.mxu1 %vm6102_vm4, %v9085_v49  ;;  %v5230_v49 = vsel %vm4434_vm11, %v7320_v7, %v7321_v27 }
 0x69b   : > { %6121 = vmatprep.subr.msk.bf16.mxu1 %vm6119_vm6, %v6120_v3  ;;  %v6126_v41 = vpack.c.bf16 %v5232_v31, %v5230_v49 }
 0x69d   : > { %6092 = vmatmul.mubr.msk.bf16.gmra.mrb[12].mxu1 %vm386_vm9, %v7399_v35 }
 0x69e   : > { %5142 = vmatprep.mubr.bf16.mxu1 %v7422_v19 }
 0x6a5   : > { %6111 = vmatmul.mubr.msk.bf16.vlgmr.msra.gmra.mrb[8].mxu1 %vm386_vm9, %v7400_v24 }
 0x6a6   : > { %6124 = vmatpush1.bf16.msk.msra.mxu1 %vm6122_vm2, %v6123_v36  ;;  %5152 = vmatprep.mubr.bf16.mxu1 %v7422_v19 }
 0x6a7   : > { %6127 = vmatprep.subr.msk.bf16.mxu1 %vm6119_vm6, %v6126_v41 }
 0x6aa   : > { %6130 = vmatpush1.bf16.msk.msra.mxu1 %vm6122_vm2, %v6129_v44 }
 0x6ad   : > { %6112 = vmatmul.mubr.msk.bf16.gmra.mrb[12].mxu1 %vm386_vm9, %v7401_v17 }
 0x6ae   : > { %5306 = vmatprep.mubr.bf16.mxu1 %v7422_v19 }
 0x6b5   : > { %6131 = vmatmul.mubr.msk.bf16.vlgmr.msra.gmra.mrb[8].mxu1 %vm386_vm9, %v7402_v48 }
 0x6b6   : > { %5316 = vmatprep.mubr.bf16.mxu1 %v7422_v19 }
 0x6bd   : > { %6132 = vmatmul.mubr.msk.bf16.gmra.mrb[12].mxu1 %vm386_vm9, %v7403_v14 }
 0x788   : > { %v5308_v51 = vpop.f32.mrb[8].mxu1 }
 0x789   : > { %v5360_v55 = vadd.f32 %v5343_v5, %v5308_v51  ;;  %v5310_v59 = vpop.f32.mrb[9].mxu1 }
 0x78a   : > { %v5361_v63 = vadd.f32 %v5343_v5, %v5310_v59  ;;  %v5312_v11 = vpop.f32.mrb[10].mxu1 }
 0x78b   : > { %v5368_v20 = vmax.f32 %v5360_v55, 0.0  ;;  %v5362_v10 = vadd.f32 %v5348_v34, %v5312_v11  ;;  %v5314_v33 = vpop.f32.mrb[11].mxu1 }
 0x78c   : > { %v5369_v19 = vmax.f32 %v5361_v63, 0.0  ;;  %v5363_v60 = vadd.f32 %v5348_v34, %v5314_v33 }
 0x78d   : > { %v5376_v40 = vadd.f32 %v5368_v20, %v8997_v4  ;;  %v5370_v28 = vmax.f32 %v5362_v10, 0.0 }
 0x78e   : > { %v5377_v6 = vadd.f32 %v5369_v19, %v9002_v18  ;;  %v5371_v26 = vmax.f32 %v5363_v60, 0.0 }
 0x78f   : > { %5384 = vst [vmem:[%s7481_s21] sm:$0xff] %v5376_v40  ;;  %v5378_v0 = vadd.f32 %v5370_v28, %v9019_v9 }
 0x790   : > { %5385 = vst [vmem:[%s7481_s21 + $0x8] sm:$0xff] %v5377_v6  ;;  %v5379_v57 = vadd.f32 %v5371_v26, %v9036_v37  ;;  %v5318_v38 = vpop.f32.mrb[12].mxu1 }
 0x791   : > { %5386 = vst [vmem:[%s7481_s21 + $0x10] sm:$0xff] %v5378_v0  ;;  %v5364_v12 = vadd.f32 %v5353_v54, %v5318_v38  ;;  %v5320_v25 = vpop.f32.mrb[13].mxu1 }
 0x792   : > { %5387 = vst [vmem:[%s7481_s21 + $0x18] sm:$0xff] %v5379_v57  ;;  %v5365_v4 = vadd.f32 %v5353_v54, %v5320_v25  ;;  %v5322_v18 = vpop.f32.mrb[14].mxu1 }
 0x793   : > { %v5372_v21 = vmax.f32 %v5364_v12, 0.0  ;;  %v5366_v58 = vadd.f32 %v5358_v61, %v5322_v18  ;;  %v5324_v56 = vpop.f32.mrb[15].mxu1 }
 0x794   : > { %v5373_v9 = vmax.f32 %v5365_v4, 0.0  ;;  %v5367_v29 = vadd.f32 %v5358_v61, %v5324_v56 }
 0x795   : > { %v5380_v30 = vadd.f32 %v5372_v21, %v9054_v15  ;;  %v5374_v37 = vmax.f32 %v5366_v58, 0.0 }
 0x796   : > { %v5381_v3 = vadd.f32 %v5373_v9, %v9058_v53  ;;  %v5375_v2 = vmax.f32 %v5367_v29, 0.0 }
 0x797   : > { %5388 = vst [vmem:[%s7481_s21 + $0x20] sm:$0xff] %v5380_v30  ;;  %v5382_v8 = vadd.f32 %v5374_v37, %v9064_v42 }
 0x798   : > { %5389 = vst [vmem:[%s7481_s21 + $0x28] sm:$0xff] %v5381_v3  ;;  %v5383_v35 = vadd.f32 %v5375_v2, %v9071_v46 }
 0x799   : > { %5390 = vst [vmem:[%s7481_s21 + $0x30] sm:$0xff] %v5382_v8 }
 0x79a   : > { %5391 = vst [vmem:[%s7481_s21 + $0x38] sm:$0xff] %v5383_v35 }
 0x79b PF: > { %s13_s12 = sadd.s32 1, %s7418_s12  }
 0x79c   : > { %p10_p5 = scmp.ge.s32.totalorder %s13_s12, 4  }
 0x79e   :  { %12 = sbr.rel (!%p10_p5) target bundleno = 1 (0x1), region = 104 }

</bundles_post_ra>
